<compile_context>
chip_gen: v5e
topology: v5e:2x2
jax: 0.10.0
libtpu: 0.0.40
codegen_flags: <defaults>
</compile_context>

<pallas_src>
import jax
import jax.numpy as jnp
from jax import lax
from jax.experimental import pallas as pl
from jax.experimental.pallas import tpu as pltpu

_VMEM = pl.BlockSpec(memory_space=pltpu.MemorySpace.VMEM)

K = 3          # conv kernel size
STRIDE = 2     # conv stride
COUT1 = 64     # pconv1 out channels
COUT2 = 32     # pconv2 out channels


# ----------------------------------------------------------------------------
# The single fused kernel
# ----------------------------------------------------------------------------

def _encoder_kernel(x_ref, m_ref, w1_ref, b1_ref, w2_ref, b2_ref,
                    wh_ref, bh_ref, wmv_ref, bmv_ref, out_ref, feats_ref):
    """Fused Encoder forward.

    x_ref:   (NP, 12B)  data rows, phase-split: x_ref[m, 4*r + p] = x[b, ci, 4m+p]
                        with branch-row r = ci*B + b  (NP = L//4).
    m_ref:   (NP, 4B)   mask rows, phase-split:  m_ref[m, 4*b + p] = mask[b, 4m+p].
    w1_ref:  (3, 64)    conv1 weight, w1[k, cout].
    b1_ref:  (1, 64)    conv1 bias.
    w2_ref:  (32, 192)  conv2 weight, lane-dense: w2[cout, k*64 + cin].
    b2_ref:  (1, 32)    conv2 bias.
    wh_ref:  (H, 1632)  hidden1 weight, lane-dense, columns permuted to the
                        kernel feature order (ci, j2, c).
    bh_ref:  (1, H)     hidden1 bias.
    wmv_ref: (H, 2*Z)   fused [mu | logVar] weight.
    bmv_ref: (1, 2*Z)   fused [mu | logVar] bias.
    out_ref: (B, 2*Z)   [mu | logVar].
    feats_ref: (B, 3*17*32) VMEM scratch for the flattened conv features.
    """
    npos = x_ref.shape[0]               # L // 4       (= 18)
    nb = m_ref.shape[1] // 4             # batch B
    l2 = npos - 1                        # conv2 output length (= 17)

    X = x_ref[...]                       # (NP, 12B)
    M = m_ref[...]                       # (NP, 4B)
    w1 = w1_ref[...]                     # (3, 64)
    b1 = b1_ref[...]                     # (1, 64)
    w2 = w2_ref[...]                     # (32, 192)
    b2 = b2_ref[...]                     # (1, 32)
    cout1 = w1.shape[1]
    cout2 = w2.shape[0]

    def _norm(msum):
        valid = msum > 0.0
        scale = jnp.where(valid, pl.reciprocal(jnp.where(valid, msum, 1.0)), 0.0)
        return scale, valid.astype(jnp.float32)

    # ---- per-batch mask quantities (shared by the 3 data branches) ----------
    per_b = []
    for b in range(nb):
        mp = [M[:, 4 * b + p:4 * b + p + 1] for p in range(4)]      # (NP, 1) each
        msum_e = mp[0] + mp[1] + mp[2]                              # even conv1 pos
        msum_o = mp[2][:l2] + mp[3][:l2] + mp[0][1:npos]            # odd conv1 pos
        scale_e, gate_e = _norm(msum_e)
        scale_o, gate_o = _norm(msum_o)
        wsum2 = gate_e[:l2] + gate_o + gate_e[1:l2 + 1]             # (l2, 1)
        scale2, gate2 = _norm(float(cout1) * wsum2)
        per_b.append((mp, scale_e, gate_e, scale_o, gate_o, scale2, gate2))

    # ---- per branch-row: conv1 (VPU MACs) -> conv2 (MXU) -> feature scatter --
    for ci in range(3):
        for b in range(nb):
            r = ci * nb + b
            mp, scale_e, gate_e, scale_o, gate_o, scale2, gate2 = per_b[b]
            xp = [X[:, 4 * r + p:4 * r + p + 1] for p in range(4)]  # (NP, 1)

            # partial conv 1, even output positions j1 = 2m  (window 4m..4m+2)
            o1e = ((xp[0] * mp[0]) * w1[0:1, :]
                   + (xp[1] * mp[1]) * w1[1:2, :]
                   + (xp[2] * mp[2]) * w1[2:3, :])                  # (NP, 64)
            o1e = jnp.maximum(o1e * scale_e + b1 * gate_e, 0.0)

            # partial conv 1, odd output positions j1 = 2m+1 (window 4m+2..4m+4)
            o1o = ((xp[2][:l2] * mp[2][:l2]) * w1[0:1, :]
                   + (xp[3][:l2] * mp[3][:l2]) * w1[1:2, :]
                   + (xp[0][1:npos] * mp[0][1:npos]) * w1[2:3, :])  # (l2, 64)
            o1o = jnp.maximum(o1o * scale_o + b1 * gate_o, 0.0)

            # partial conv 2: output j2 uses conv1 positions 2j2, 2j2+1, 2j2+2
            lhs = jnp.concatenate([o1e[:l2], o1o, o1e[1:l2 + 1]], axis=1)  # (l2,192)
            o2 = lax.dot_general(lhs, w2, (((1,), (1,)), ((), ())),
                                 preferred_element_type=jnp.float32)       # (l2,32)
            o2 = jnp.maximum(o2 * scale2 + b2 * gate2, 0.0)

            # scatter into the lane-dense feature row:
            #   feats[b, ci*(l2*32) + j2*32 + c]  (wh columns are permuted to match)
            base = ci * l2 * cout2
            for j2 in range(l2):
                feats_ref[b:b + 1, base + j2 * cout2: base + (j2 + 1) * cout2] = \
                    o2[j2:j2 + 1, :]

    # ---- dense head: hidden1 + tanh, fused [mu | logVar] ---------------------
    feats = feats_ref[...]                                           # (B, 1632)
    h = jnp.tanh(
        lax.dot_general(feats, wh_ref[...], (((1,), (1,)), ((), ())),
                        preferred_element_type=jnp.float32) + bh_ref[...])
    out_ref[...] = (jnp.dot(h, wmv_ref[...], preferred_element_type=jnp.float32)
                    + bmv_ref[...])


# ----------------------------------------------------------------------------
# Forward wrapper (only tiny input reshapes + one pallas_call)
# ----------------------------------------------------------------------------

def encoder_forward(x, kp):
    """x: (B, 4, L) float32; channels = [time, mag, magErr, mask]."""
    B, C, L = x.shape
    assert C == 4 and L % 4 == 0
    npos = L // 4
    l2 = npos - 1
    latent = kp["wmv"].shape[1] // 2

    # phase-split, lane-dense input slabs (rows r = ci*B + b)
    xd = jnp.transpose(x[:, :3, :], (1, 0, 2)).reshape(3 * B, L)
    X = jnp.transpose(xd.reshape(3 * B, npos, 4), (1, 0, 2)).reshape(npos, 12 * B)
    mk = x[:, 3, :]
    Mm = jnp.transpose(mk.reshape(B, npos, 4), (1, 0, 2)).reshape(npos, 4 * B)

    out = pl.pallas_call(
        _encoder_kernel,
        out_shape=jax.ShapeDtypeStruct((B, 2 * latent), jnp.float32),
        in_specs=[_VMEM] * 10,
        out_specs=_VMEM,
        scratch_shapes=[pltpu.VMEM((B, 3 * l2 * COUT2), jnp.float32)],
    )(X, Mm, kp["w1"], kp["b1"], kp["w2"], kp["b2"],
      kp["wh"], kp["bh"], kp["wmv"], kp["bmv"])
    return out[:, :latent], out[:, latent:]


# ----------------------------------------------------------------------------
# Parameters: torch-layout init + one-time kernel-layout preprocessing
# ----------------------------------------------------------------------------

def init_params(key, hidden_dim, latent_dim):
    ks = jax.random.split(key, 10)
    return {
        # pconv1: Conv1d(1 -> 64, k=3, stride=2, bias)
        "pconv1_w": 0.1 * jax.random.normal(ks[0], (COUT1, 1, K), jnp.float32),
        "pconv1_b": 0.1 * jax.random.normal(ks[1], (COUT1,), jnp.float32),
        # pconv2: Conv1d(64 -> 32, k=3, stride=2, bias)
        "pconv2_w": 0.05 * jax.random.normal(ks[2], (COUT2, COUT1, K), jnp.float32),
        "pconv2_b": 0.05 * jax.random.normal(ks[3], (COUT2,), jnp.float32),
        # hidden1: Linear(1632 -> hidden), torch layout (out, in), in-index =
        # ci*544 + c*17 + j2 (branch cat order time/mag/magErr, channel-major).
        "hidden1_w": 0.02 * jax.random.normal(ks[4], (hidden_dim, 1632), jnp.float32),
        "hidden1_b": 0.02 * jax.random.normal(ks[5], (hidden_dim,), jnp.float32),
        # mu / logVar: Linear(hidden -> latent), torch layout (out, in)
        "mu_w": 0.1 * jax.random.normal(ks[6], (latent_dim, hidden_dim), jnp.float32),
        "mu_b": 0.1 * jax.random.normal(ks[7], (latent_dim,), jnp.float32),
        "logvar_w": 0.1 * jax.random.normal(ks[8], (latent_dim, hidden_dim), jnp.float32),
        "logvar_b": 0.1 * jax.random.normal(ks[9], (latent_dim,), jnp.float32),
    }


def preprocess_params(p):
    """One-time weight layout prep (hoisted out of the forward hot path)."""
    hidden = p["hidden1_w"].shape[0]
    l2 = p["hidden1_w"].shape[1] // (3 * COUT2)          # 17
    w1 = p["pconv1_w"][:, 0, :].T                        # (3, 64): w1[k, cout]
    b1 = p["pconv1_b"].reshape(1, COUT1)
    # conv2 weight lane-dense, k-major contraction blocks: w2[cout, k*64 + cin]
    w2 = jnp.transpose(p["pconv2_w"], (0, 2, 1)).reshape(COUT2, K * COUT1)
    b2 = p["pconv2_b"].reshape(1, COUT2)
    # hidden1 weight lane-dense, columns permuted from torch order (ci, c, j2)
    # to the kernel feature order (ci, j2, c).
    wh = p["hidden1_w"].reshape(hidden, 3, COUT2, l2)
    wh = jnp.transpose(wh, (0, 1, 3, 2)).reshape(hidden, 3 * l2 * COUT2)
    bh = p["hidden1_b"].reshape(1, hidden)
    # fused [mu | logVar] head, stored (in, out)
    wmv = jnp.concatenate([p["mu_w"].T, p["logvar_w"].T], axis=1)
    bmv = jnp.concatenate([p["mu_b"], p["logvar_b"]]).reshape(1, -1)
    return {"w1": w1, "b1": b1, "w2": w2, "b2": b2,
            "wh": wh, "bh": bh, "wmv": wmv, "bmv": bmv}


# ----------------------------------------------------------------------------
# Main
# ----------------------------------------------------------------------------

if __name__ == "__main__":
    # hidden1 expects 1632 = 3 * 32 * 17 features => L = 72 (72 -> 35 -> 17).
    B, L = 2, 72
    hidden_dim, latent_dim = 32, 8

    key = jax.random.PRNGKey(0)
    k_data, k_mask, k_params = jax.random.split(key, 3)

    data = jax.random.normal(k_data, (B, 3, L), jnp.float32)
    mask = (jax.random.uniform(k_mask, (B, 1, L)) > 0.3).astype(jnp.float32)
    x = jnp.concatenate([data, mask], axis=1)              # (B, 4, L)

    params = init_params(k_params, hidden_dim, latent_dim)
    kparams = preprocess_params(params)                    # one-time layout prep

    mu, log_var = jax.jit(encoder_forward)(x, kparams)
    jax.block_until_ready((mu, log_var))

    assert mu.shape == (B, latent_dim) and log_var.shape == (B, latent_dim)
    print("KERNEL_OK")
</pallas_src>

<mosaic_0001>
module attributes {stable_mosaic.version = 11 : i64} {
  func.func @_encoder_kernel(%arg0: memref<18x24xf32, #tpu.memory_space<vmem>>, %arg1: memref<18x8xf32, #tpu.memory_space<vmem>>, %arg2: memref<3x64xf32, #tpu.memory_space<vmem>>, %arg3: memref<1x64xf32, #tpu.memory_space<vmem>>, %arg4: memref<32x192xf32, #tpu.memory_space<vmem>>, %arg5: memref<1x32xf32, #tpu.memory_space<vmem>>, %arg6: memref<32x1632xf32, #tpu.memory_space<vmem>>, %arg7: memref<1x32xf32, #tpu.memory_space<vmem>>, %arg8: memref<32x16xf32, #tpu.memory_space<vmem>>, %arg9: memref<1x16xf32, #tpu.memory_space<vmem>>, %arg10: memref<2x16xf32, #tpu.memory_space<vmem>>, %arg11: memref<2x1632xf32, #tpu.memory_space<vmem>>) attributes {dimension_semantics = [], scalar_prefetch = 0 : i64, scratch_operands = 1 : i64, tpu.core_type = #tpu.core_type<tc>} {
    %c0 = arith.constant 0 : index
    %c0_0 = arith.constant 0 : index
    %0 = vector.load %arg0[%c0, %c0_0] : memref<18x24xf32, #tpu.memory_space<vmem>>, vector<18x24xf32>
    %c0_1 = arith.constant 0 : index
    %c0_2 = arith.constant 0 : index
    %1 = vector.load %arg1[%c0_1, %c0_2] : memref<18x8xf32, #tpu.memory_space<vmem>>, vector<18x8xf32>
    %c0_3 = arith.constant 0 : index
    %c0_4 = arith.constant 0 : index
    %2 = vector.load %arg2[%c0_3, %c0_4] : memref<3x64xf32, #tpu.memory_space<vmem>>, vector<3x64xf32>
    %c0_5 = arith.constant 0 : index
    %c0_6 = arith.constant 0 : index
    %3 = vector.load %arg3[%c0_5, %c0_6] : memref<1x64xf32, #tpu.memory_space<vmem>>, vector<1x64xf32>
    %c0_7 = arith.constant 0 : index
    %c0_8 = arith.constant 0 : index
    %4 = vector.load %arg4[%c0_7, %c0_8] : memref<32x192xf32, #tpu.memory_space<vmem>>, vector<32x192xf32>
    %c0_9 = arith.constant 0 : index
    %c0_10 = arith.constant 0 : index
    %5 = vector.load %arg5[%c0_9, %c0_10] : memref<1x32xf32, #tpu.memory_space<vmem>>, vector<1x32xf32>
    %6 = vector.extract_strided_slice %1 {offsets = [0, 0], sizes = [18, 1], strides = [1, 1]} : vector<18x8xf32> to vector<18x1xf32>
    %7 = vector.extract_strided_slice %1 {offsets = [0, 1], sizes = [18, 1], strides = [1, 1]} : vector<18x8xf32> to vector<18x1xf32>
    %8 = vector.extract_strided_slice %1 {offsets = [0, 2], sizes = [18, 1], strides = [1, 1]} : vector<18x8xf32> to vector<18x1xf32>
    %9 = vector.extract_strided_slice %1 {offsets = [0, 3], sizes = [18, 1], strides = [1, 1]} : vector<18x8xf32> to vector<18x1xf32>
    %10 = arith.addf %6, %7 : vector<18x1xf32>
    %11 = arith.addf %10, %8 : vector<18x1xf32>
    %12 = vector.extract_strided_slice %8 {offsets = [0, 0], sizes = [17, 1], strides = [1, 1]} : vector<18x1xf32> to vector<17x1xf32>
    %13 = vector.extract_strided_slice %9 {offsets = [0, 0], sizes = [17, 1], strides = [1, 1]} : vector<18x1xf32> to vector<17x1xf32>
    %14 = arith.addf %12, %13 : vector<17x1xf32>
    %15 = vector.extract_strided_slice %6 {offsets = [1, 0], sizes = [17, 1], strides = [1, 1]} : vector<18x1xf32> to vector<17x1xf32>
    %16 = arith.addf %14, %15 : vector<17x1xf32>
    %cst = arith.constant 0.000000e+00 : f32
    %17 = vector.broadcast %cst : f32 to vector<18x1xf32>
    %18 = arith.cmpf ogt, %11, %17 : vector<18x1xf32>
    %cst_11 = arith.constant 1.000000e+00 : f32
    %19 = vector.broadcast %cst_11 : f32 to vector<18x1xf32>
    %20 = arith.select %18, %11, %19 : vector<18x1xi1>, vector<18x1xf32>
    %21 = tpu.reciprocal %20 : vector<18x1xf32> -> vector<18x1xf32>
    %cst_12 = arith.constant 0.000000e+00 : f32
    %22 = vector.broadcast %cst_12 : f32 to vector<18x1xf32>
    %23 = arith.select %18, %21, %22 : vector<18x1xi1>, vector<18x1xf32>
    %24 = arith.extui %18 : vector<18x1xi1> to vector<18x1xi32>
    %25 = arith.sitofp %24 : vector<18x1xi32> to vector<18x1xf32>
    %cst_13 = arith.constant 0.000000e+00 : f32
    %26 = vector.broadcast %cst_13 : f32 to vector<17x1xf32>
    %27 = arith.cmpf ogt, %16, %26 : vector<17x1xf32>
    %cst_14 = arith.constant 1.000000e+00 : f32
    %28 = vector.broadcast %cst_14 : f32 to vector<17x1xf32>
    %29 = arith.select %27, %16, %28 : vector<17x1xi1>, vector<17x1xf32>
    %30 = tpu.reciprocal %29 : vector<17x1xf32> -> vector<17x1xf32>
    %cst_15 = arith.constant 0.000000e+00 : f32
    %31 = vector.broadcast %cst_15 : f32 to vector<17x1xf32>
    %32 = arith.select %27, %30, %31 : vector<17x1xi1>, vector<17x1xf32>
    %33 = arith.extui %27 : vector<17x1xi1> to vector<17x1xi32>
    %34 = arith.sitofp %33 : vector<17x1xi32> to vector<17x1xf32>
    %35 = vector.extract_strided_slice %25 {offsets = [0, 0], sizes = [17, 1], strides = [1, 1]} : vector<18x1xf32> to vector<17x1xf32>
    %36 = arith.addf %35, %34 : vector<17x1xf32>
    %37 = vector.extract_strided_slice %25 {offsets = [1, 0], sizes = [17, 1], strides = [1, 1]} : vector<18x1xf32> to vector<17x1xf32>
    %38 = arith.addf %36, %37 : vector<17x1xf32>
    %cst_16 = arith.constant 6.400000e+01 : f32
    %39 = vector.broadcast %cst_16 : f32 to vector<17x1xf32>
    %40 = arith.mulf %39, %38 : vector<17x1xf32>
    %cst_17 = arith.constant 0.000000e+00 : f32
    %41 = vector.broadcast %cst_17 : f32 to vector<17x1xf32>
    %42 = arith.cmpf ogt, %40, %41 : vector<17x1xf32>
    %cst_18 = arith.constant 1.000000e+00 : f32
    %43 = vector.broadcast %cst_18 : f32 to vector<17x1xf32>
    %44 = arith.select %42, %40, %43 : vector<17x1xi1>, vector<17x1xf32>
    %45 = tpu.reciprocal %44 : vector<17x1xf32> -> vector<17x1xf32>
    %cst_19 = arith.constant 0.000000e+00 : f32
    %46 = vector.broadcast %cst_19 : f32 to vector<17x1xf32>
    %47 = arith.select %42, %45, %46 : vector<17x1xi1>, vector<17x1xf32>
    %48 = arith.extui %42 : vector<17x1xi1> to vector<17x1xi32>
    %49 = arith.sitofp %48 : vector<17x1xi32> to vector<17x1xf32>
    %50 = vector.extract_strided_slice %1 {offsets = [0, 4], sizes = [18, 1], strides = [1, 1]} : vector<18x8xf32> to vector<18x1xf32>
    %51 = vector.extract_strided_slice %1 {offsets = [0, 5], sizes = [18, 1], strides = [1, 1]} : vector<18x8xf32> to vector<18x1xf32>
    %52 = vector.extract_strided_slice %1 {offsets = [0, 6], sizes = [18, 1], strides = [1, 1]} : vector<18x8xf32> to vector<18x1xf32>
    %53 = vector.extract_strided_slice %1 {offsets = [0, 7], sizes = [18, 1], strides = [1, 1]} : vector<18x8xf32> to vector<18x1xf32>
    %54 = arith.addf %50, %51 : vector<18x1xf32>
    %55 = arith.addf %54, %52 : vector<18x1xf32>
    %56 = vector.extract_strided_slice %52 {offsets = [0, 0], sizes = [17, 1], strides = [1, 1]} : vector<18x1xf32> to vector<17x1xf32>
    %57 = vector.extract_strided_slice %53 {offsets = [0, 0], sizes = [17, 1], strides = [1, 1]} : vector<18x1xf32> to vector<17x1xf32>
    %58 = arith.addf %56, %57 : vector<17x1xf32>
    %59 = vector.extract_strided_slice %50 {offsets = [1, 0], sizes = [17, 1], strides = [1, 1]} : vector<18x1xf32> to vector<17x1xf32>
    %60 = arith.addf %58, %59 : vector<17x1xf32>
    %cst_20 = arith.constant 0.000000e+00 : f32
    %61 = vector.broadcast %cst_20 : f32 to vector<18x1xf32>
    %62 = arith.cmpf ogt, %55, %61 : vector<18x1xf32>
    %cst_21 = arith.constant 1.000000e+00 : f32
    %63 = vector.broadcast %cst_21 : f32 to vector<18x1xf32>
    %64 = arith.select %62, %55, %63 : vector<18x1xi1>, vector<18x1xf32>
    %65 = tpu.reciprocal %64 : vector<18x1xf32> -> vector<18x1xf32>
    %cst_22 = arith.constant 0.000000e+00 : f32
    %66 = vector.broadcast %cst_22 : f32 to vector<18x1xf32>
    %67 = arith.select %62, %65, %66 : vector<18x1xi1>, vector<18x1xf32>
    %68 = arith.extui %62 : vector<18x1xi1> to vector<18x1xi32>
    %69 = arith.sitofp %68 : vector<18x1xi32> to vector<18x1xf32>
    %cst_23 = arith.constant 0.000000e+00 : f32
    %70 = vector.broadcast %cst_23 : f32 to vector<17x1xf32>
    %71 = arith.cmpf ogt, %60, %70 : vector<17x1xf32>
    %cst_24 = arith.constant 1.000000e+00 : f32
    %72 = vector.broadcast %cst_24 : f32 to vector<17x1xf32>
    %73 = arith.select %71, %60, %72 : vector<17x1xi1>, vector<17x1xf32>
    %74 = tpu.reciprocal %73 : vector<17x1xf32> -> vector<17x1xf32>
    %cst_25 = arith.constant 0.000000e+00 : f32
    %75 = vector.broadcast %cst_25 : f32 to vector<17x1xf32>
    %76 = arith.select %71, %74, %75 : vector<17x1xi1>, vector<17x1xf32>
    %77 = arith.extui %71 : vector<17x1xi1> to vector<17x1xi32>
    %78 = arith.sitofp %77 : vector<17x1xi32> to vector<17x1xf32>
    %79 = vector.extract_strided_slice %69 {offsets = [0, 0], sizes = [17, 1], strides = [1, 1]} : vector<18x1xf32> to vector<17x1xf32>
    %80 = arith.addf %79, %78 : vector<17x1xf32>
    %81 = vector.extract_strided_slice %69 {offsets = [1, 0], sizes = [17, 1], strides = [1, 1]} : vector<18x1xf32> to vector<17x1xf32>
    %82 = arith.addf %80, %81 : vector<17x1xf32>
    %cst_26 = arith.constant 6.400000e+01 : f32
    %83 = vector.broadcast %cst_26 : f32 to vector<17x1xf32>
    %84 = arith.mulf %83, %82 : vector<17x1xf32>
    %cst_27 = arith.constant 0.000000e+00 : f32
    %85 = vector.broadcast %cst_27 : f32 to vector<17x1xf32>
    %86 = arith.cmpf ogt, %84, %85 : vector<17x1xf32>
    %cst_28 = arith.constant 1.000000e+00 : f32
    %87 = vector.broadcast %cst_28 : f32 to vector<17x1xf32>
    %88 = arith.select %86, %84, %87 : vector<17x1xi1>, vector<17x1xf32>
    %89 = tpu.reciprocal %88 : vector<17x1xf32> -> vector<17x1xf32>
    %cst_29 = arith.constant 0.000000e+00 : f32
    %90 = vector.broadcast %cst_29 : f32 to vector<17x1xf32>
    %91 = arith.select %86, %89, %90 : vector<17x1xi1>, vector<17x1xf32>
    %92 = arith.extui %86 : vector<17x1xi1> to vector<17x1xi32>
    %93 = arith.sitofp %92 : vector<17x1xi32> to vector<17x1xf32>
    %94 = vector.extract_strided_slice %0 {offsets = [0, 0], sizes = [18, 1], strides = [1, 1]} : vector<18x24xf32> to vector<18x1xf32>
    %95 = vector.extract_strided_slice %0 {offsets = [0, 1], sizes = [18, 1], strides = [1, 1]} : vector<18x24xf32> to vector<18x1xf32>
    %96 = vector.extract_strided_slice %0 {offsets = [0, 2], sizes = [18, 1], strides = [1, 1]} : vector<18x24xf32> to vector<18x1xf32>
    %97 = vector.extract_strided_slice %0 {offsets = [0, 3], sizes = [18, 1], strides = [1, 1]} : vector<18x24xf32> to vector<18x1xf32>
    %98 = arith.mulf %94, %6 : vector<18x1xf32>
    %99 = vector.extract_strided_slice %2 {offsets = [0, 0], sizes = [1, 64], strides = [1, 1]} : vector<3x64xf32> to vector<1x64xf32>
    %100 = vector.broadcast %98 : vector<18x1xf32> to vector<18x64xf32>
    %101 = vector.broadcast %99 : vector<1x64xf32> to vector<18x64xf32>
    %102 = arith.mulf %100, %101 : vector<18x64xf32>
    %103 = arith.mulf %95, %7 : vector<18x1xf32>
    %104 = vector.extract_strided_slice %2 {offsets = [1, 0], sizes = [1, 64], strides = [1, 1]} : vector<3x64xf32> to vector<1x64xf32>
    %105 = vector.broadcast %103 : vector<18x1xf32> to vector<18x64xf32>
    %106 = vector.broadcast %104 : vector<1x64xf32> to vector<18x64xf32>
    %107 = arith.mulf %105, %106 : vector<18x64xf32>
    %108 = arith.addf %102, %107 : vector<18x64xf32>
    %109 = arith.mulf %96, %8 : vector<18x1xf32>
    %110 = vector.extract_strided_slice %2 {offsets = [2, 0], sizes = [1, 64], strides = [1, 1]} : vector<3x64xf32> to vector<1x64xf32>
    %111 = vector.broadcast %109 : vector<18x1xf32> to vector<18x64xf32>
    %112 = vector.broadcast %110 : vector<1x64xf32> to vector<18x64xf32>
    %113 = arith.mulf %111, %112 : vector<18x64xf32>
    %114 = arith.addf %108, %113 : vector<18x64xf32>
    %115 = vector.broadcast %23 : vector<18x1xf32> to vector<18x64xf32>
    %116 = arith.mulf %114, %115 : vector<18x64xf32>
    %117 = vector.broadcast %3 : vector<1x64xf32> to vector<18x64xf32>
    %118 = vector.broadcast %25 : vector<18x1xf32> to vector<18x64xf32>
    %119 = arith.mulf %117, %118 : vector<18x64xf32>
    %120 = arith.addf %116, %119 : vector<18x64xf32>
    %cst_30 = arith.constant 0.000000e+00 : f32
    %121 = vector.broadcast %cst_30 : f32 to vector<18x64xf32>
    %122 = arith.maximumf %120, %121 : vector<18x64xf32>
    %123 = vector.extract_strided_slice %96 {offsets = [0, 0], sizes = [17, 1], strides = [1, 1]} : vector<18x1xf32> to vector<17x1xf32>
    %124 = vector.extract_strided_slice %8 {offsets = [0, 0], sizes = [17, 1], strides = [1, 1]} : vector<18x1xf32> to vector<17x1xf32>
    %125 = arith.mulf %123, %124 : vector<17x1xf32>
    %126 = vector.extract_strided_slice %2 {offsets = [0, 0], sizes = [1, 64], strides = [1, 1]} : vector<3x64xf32> to vector<1x64xf32>
    %127 = vector.broadcast %125 : vector<17x1xf32> to vector<17x64xf32>
    %128 = vector.broadcast %126 : vector<1x64xf32> to vector<17x64xf32>
    %129 = arith.mulf %127, %128 : vector<17x64xf32>
    %130 = vector.extract_strided_slice %97 {offsets = [0, 0], sizes = [17, 1], strides = [1, 1]} : vector<18x1xf32> to vector<17x1xf32>
    %131 = vector.extract_strided_slice %9 {offsets = [0, 0], sizes = [17, 1], strides = [1, 1]} : vector<18x1xf32> to vector<17x1xf32>
    %132 = arith.mulf %130, %131 : vector<17x1xf32>
    %133 = vector.extract_strided_slice %2 {offsets = [1, 0], sizes = [1, 64], strides = [1, 1]} : vector<3x64xf32> to vector<1x64xf32>
    %134 = vector.broadcast %132 : vector<17x1xf32> to vector<17x64xf32>
    %135 = vector.broadcast %133 : vector<1x64xf32> to vector<17x64xf32>
    %136 = arith.mulf %134, %135 : vector<17x64xf32>
    %137 = arith.addf %129, %136 : vector<17x64xf32>
    %138 = vector.extract_strided_slice %94 {offsets = [1, 0], sizes = [17, 1], strides = [1, 1]} : vector<18x1xf32> to vector<17x1xf32>
    %139 = vector.extract_strided_slice %6 {offsets = [1, 0], sizes = [17, 1], strides = [1, 1]} : vector<18x1xf32> to vector<17x1xf32>
    %140 = arith.mulf %138, %139 : vector<17x1xf32>
    %141 = vector.extract_strided_slice %2 {offsets = [2, 0], sizes = [1, 64], strides = [1, 1]} : vector<3x64xf32> to vector<1x64xf32>
    %142 = vector.broadcast %140 : vector<17x1xf32> to vector<17x64xf32>
    %143 = vector.broadcast %141 : vector<1x64xf32> to vector<17x64xf32>
    %144 = arith.mulf %142, %143 : vector<17x64xf32>
    %145 = arith.addf %137, %144 : vector<17x64xf32>
    %146 = vector.broadcast %32 : vector<17x1xf32> to vector<17x64xf32>
    %147 = arith.mulf %145, %146 : vector<17x64xf32>
    %148 = vector.broadcast %3 : vector<1x64xf32> to vector<17x64xf32>
    %149 = vector.broadcast %34 : vector<17x1xf32> to vector<17x64xf32>
    %150 = arith.mulf %148, %149 : vector<17x64xf32>
    %151 = arith.addf %147, %150 : vector<17x64xf32>
    %cst_31 = arith.constant 0.000000e+00 : f32
    %152 = vector.broadcast %cst_31 : f32 to vector<17x64xf32>
    %153 = arith.maximumf %151, %152 : vector<17x64xf32>
    %154 = vector.extract_strided_slice %122 {offsets = [0, 0], sizes = [17, 64], strides = [1, 1]} : vector<18x64xf32> to vector<17x64xf32>
    %155 = vector.extract_strided_slice %122 {offsets = [1, 0], sizes = [17, 64], strides = [1, 1]} : vector<18x64xf32> to vector<17x64xf32>
    %156 = tpu.concatenate %154, %153, %155 in 1 : vector<17x64xf32>, vector<17x64xf32>, vector<17x64xf32> -> vector<17x192xf32>
    %cst_32 = arith.constant dense<0.000000e+00> : vector<17x32xf32>
    %157 = tpu.matmul %156, %4, %cst_32 {dimension_numbers = #tpu.dot_dimension_numbers<[1], [1], [0], [0], [0, 0, 1, 0], [], []>} : vector<17x192xf32>, vector<32x192xf32>, vector<17x32xf32> -> vector<17x32xf32>
    %158 = vector.broadcast %47 : vector<17x1xf32> to vector<17x32xf32>
    %159 = arith.mulf %157, %158 : vector<17x32xf32>
    %160 = vector.broadcast %5 : vector<1x32xf32> to vector<17x32xf32>
    %161 = vector.broadcast %49 : vector<17x1xf32> to vector<17x32xf32>
    %162 = arith.mulf %160, %161 : vector<17x32xf32>
    %163 = arith.addf %159, %162 : vector<17x32xf32>
    %cst_33 = arith.constant 0.000000e+00 : f32
    %164 = vector.broadcast %cst_33 : f32 to vector<17x32xf32>
    %165 = arith.maximumf %163, %164 : vector<17x32xf32>
    %166 = vector.extract_strided_slice %165 {offsets = [0, 0], sizes = [1, 32], strides = [1, 1]} : vector<17x32xf32> to vector<1x32xf32>
    %c0_34 = arith.constant 0 : index
    %c0_35 = arith.constant 0 : index
    %167 = vector.load %arg11[%c0_34, %c0_35] : memref<2x1632xf32, #tpu.memory_space<vmem>>, vector<1x32xf32>
    tpu.vector_store %arg11[%c0_34, %c0_35], %166 {strides = array<i32>} : memref<2x1632xf32, #tpu.memory_space<vmem>>, vector<1x32xf32>,
    %168 = vector.extract_strided_slice %165 {offsets = [1, 0], sizes = [1, 32], strides = [1, 1]} : vector<17x32xf32> to vector<1x32xf32>
    %c0_36 = arith.constant 0 : index
    %c32 = arith.constant 32 : index
    %169 = vector.load %arg11[%c0_36, %c32] : memref<2x1632xf32, #tpu.memory_space<vmem>>, vector<1x32xf32>
    tpu.vector_store %arg11[%c0_36, %c32], %168 {strides = array<i32>} : memref<2x1632xf32, #tpu.memory_space<vmem>>, vector<1x32xf32>,
    %170 = vector.extract_strided_slice %165 {offsets = [2, 0], sizes = [1, 32], strides = [1, 1]} : vector<17x32xf32> to vector<1x32xf32>
    %c0_37 = arith.constant 0 : index
    %c64 = arith.constant 64 : index
    %171 = vector.load %arg11[%c0_37, %c64] : memref<2x1632xf32, #tpu.memory_space<vmem>>, vector<1x32xf32>
    tpu.vector_store %arg11[%c0_37, %c64], %170 {strides = array<i32>} : memref<2x1632xf32, #tpu.memory_space<vmem>>, vector<1x32xf32>,
    %172 = vector.extract_strided_slice %165 {offsets = [3, 0], sizes = [1, 32], strides = [1, 1]} : vector<17x32xf32> to vector<1x32xf32>
    %c0_38 = arith.constant 0 : index
    %c96 = arith.constant 96 : index
    %173 = vector.load %arg11[%c0_38, %c96] : memref<2x1632xf32, #tpu.memory_space<vmem>>, vector<1x32xf32>
    tpu.vector_store %arg11[%c0_38, %c96], %172 {strides = array<i32>} : memref<2x1632xf32, #tpu.memory_space<vmem>>, vector<1x32xf32>,
    %174 = vector.extract_strided_slice %165 {offsets = [4, 0], sizes = [1, 32], strides = [1, 1]} : vector<17x32xf32> to vector<1x32xf32>
    %c0_39 = arith.constant 0 : index
    %c128 = arith.constant 128 : index
    %175 = vector.load %arg11[%c0_39, %c128] : memref<2x1632xf32, #tpu.memory_space<vmem>>, vector<1x32xf32>
    tpu.vector_store %arg11[%c0_39, %c128], %174 {strides = array<i32>} : memref<2x1632xf32, #tpu.memory_space<vmem>>, vector<1x32xf32>,
    %176 = vector.extract_strided_slice %165 {offsets = [5, 0], sizes = [1, 32], strides = [1, 1]} : vector<17x32xf32> to vector<1x32xf32>
    %c0_40 = arith.constant 0 : index
    %c160 = arith.constant 160 : index
    %177 = vector.load %arg11[%c0_40, %c160] : memref<2x1632xf32, #tpu.memory_space<vmem>>, vector<1x32xf32>
    tpu.vector_store %arg11[%c0_40, %c160], %176 {strides = array<i32>} : memref<2x1632xf32, #tpu.memory_space<vmem>>, vector<1x32xf32>,
    %178 = vector.extract_strided_slice %165 {offsets = [6, 0], sizes = [1, 32], strides = [1, 1]} : vector<17x32xf32> to vector<1x32xf32>
    %c0_41 = arith.constant 0 : index
    %c192 = arith.constant 192 : index
    %179 = vector.load %arg11[%c0_41, %c192] : memref<2x1632xf32, #tpu.memory_space<vmem>>, vector<1x32xf32>
    tpu.vector_store %arg11[%c0_41, %c192], %178 {strides = array<i32>} : memref<2x1632xf32, #tpu.memory_space<vmem>>, vector<1x32xf32>,
    %180 = vector.extract_strided_slice %165 {offsets = [7, 0], sizes = [1, 32], strides = [1, 1]} : vector<17x32xf32> to vector<1x32xf32>
    %c0_42 = arith.constant 0 : index
    %c224 = arith.constant 224 : index
    %181 = vector.load %arg11[%c0_42, %c224] : memref<2x1632xf32, #tpu.memory_space<vmem>>, vector<1x32xf32>
    tpu.vector_store %arg11[%c0_42, %c224], %180 {strides = array<i32>} : memref<2x1632xf32, #tpu.memory_space<vmem>>, vector<1x32xf32>,
    %182 = vector.extract_strided_slice %165 {offsets = [8, 0], sizes = [1, 32], strides = [1, 1]} : vector<17x32xf32> to vector<1x32xf32>
    %c0_43 = arith.constant 0 : index
    %c256 = arith.constant 256 : index
    %183 = vector.load %arg11[%c0_43, %c256] : memref<2x1632xf32, #tpu.memory_space<vmem>>, vector<1x32xf32>
    tpu.vector_store %arg11[%c0_43, %c256], %182 {strides = array<i32>} : memref<2x1632xf32, #tpu.memory_space<vmem>>, vector<1x32xf32>,
    %184 = vector.extract_strided_slice %165 {offsets = [9, 0], sizes = [1, 32], strides = [1, 1]} : vector<17x32xf32> to vector<1x32xf32>
    %c0_44 = arith.constant 0 : index
    %c288 = arith.constant 288 : index
    %185 = vector.load %arg11[%c0_44, %c288] : memref<2x1632xf32, #tpu.memory_space<vmem>>, vector<1x32xf32>
    tpu.vector_store %arg11[%c0_44, %c288], %184 {strides = array<i32>} : memref<2x1632xf32, #tpu.memory_space<vmem>>, vector<1x32xf32>,
    %186 = vector.extract_strided_slice %165 {offsets = [10, 0], sizes = [1, 32], strides = [1, 1]} : vector<17x32xf32> to vector<1x32xf32>
    %c0_45 = arith.constant 0 : index
    %c320 = arith.constant 320 : index
    %187 = vector.load %arg11[%c0_45, %c320] : memref<2x1632xf32, #tpu.memory_space<vmem>>, vector<1x32xf32>
    tpu.vector_store %arg11[%c0_45, %c320], %186 {strides = array<i32>} : memref<2x1632xf32, #tpu.memory_space<vmem>>, vector<1x32xf32>,
    %188 = vector.extract_strided_slice %165 {offsets = [11, 0], sizes = [1, 32], strides = [1, 1]} : vector<17x32xf32> to vector<1x32xf32>
    %c0_46 = arith.constant 0 : index
    %c352 = arith.constant 352 : index
    %189 = vector.load %arg11[%c0_46, %c352] : memref<2x1632xf32, #tpu.memory_space<vmem>>, vector<1x32xf32>
    tpu.vector_store %arg11[%c0_46, %c352], %188 {strides = array<i32>} : memref<2x1632xf32, #tpu.memory_space<vmem>>, vector<1x32xf32>,
    %190 = vector.extract_strided_slice %165 {offsets = [12, 0], sizes = [1, 32], strides = [1, 1]} : vector<17x32xf32> to vector<1x32xf32>
    %c0_47 = arith.constant 0 : index
    %c384 = arith.constant 384 : index
    %191 = vector.load %arg11[%c0_47, %c384] : memref<2x1632xf32, #tpu.memory_space<vmem>>, vector<1x32xf32>
    tpu.vector_store %arg11[%c0_47, %c384], %190 {strides = array<i32>} : memref<2x1632xf32, #tpu.memory_space<vmem>>, vector<1x32xf32>,
    %192 = vector.extract_strided_slice %165 {offsets = [13, 0], sizes = [1, 32], strides = [1, 1]} : vector<17x32xf32> to vector<1x32xf32>
    %c0_48 = arith.constant 0 : index
    %c416 = arith.constant 416 : index
    %193 = vector.load %arg11[%c0_48, %c416] : memref<2x1632xf32, #tpu.memory_space<vmem>>, vector<1x32xf32>
    tpu.vector_store %arg11[%c0_48, %c416], %192 {strides = array<i32>} : memref<2x1632xf32, #tpu.memory_space<vmem>>, vector<1x32xf32>,
    %194 = vector.extract_strided_slice %165 {offsets = [14, 0], sizes = [1, 32], strides = [1, 1]} : vector<17x32xf32> to vector<1x32xf32>
    %c0_49 = arith.constant 0 : index
    %c448 = arith.constant 448 : index
    %195 = vector.load %arg11[%c0_49, %c448] : memref<2x1632xf32, #tpu.memory_space<vmem>>, vector<1x32xf32>
    tpu.vector_store %arg11[%c0_49, %c448], %194 {strides = array<i32>} : memref<2x1632xf32, #tpu.memory_space<vmem>>, vector<1x32xf32>,
    %196 = vector.extract_strided_slice %165 {offsets = [15, 0], sizes = [1, 32], strides = [1, 1]} : vector<17x32xf32> to vector<1x32xf32>
    %c0_50 = arith.constant 0 : index
    %c480 = arith.constant 480 : index
    %197 = vector.load %arg11[%c0_50, %c480] : memref<2x1632xf32, #tpu.memory_space<vmem>>, vector<1x32xf32>
    tpu.vector_store %arg11[%c0_50, %c480], %196 {strides = array<i32>} : memref<2x1632xf32, #tpu.memory_space<vmem>>, vector<1x32xf32>,
    %198 = vector.extract_strided_slice %165 {offsets = [16, 0], sizes = [1, 32], strides = [1, 1]} : vector<17x32xf32> to vector<1x32xf32>
    %c0_51 = arith.constant 0 : index
    %c512 = arith.constant 512 : index
    %199 = vector.load %arg11[%c0_51, %c512] : memref<2x1632xf32, #tpu.memory_space<vmem>>, vector<1x32xf32>
    tpu.vector_store %arg11[%c0_51, %c512], %198 {strides = array<i32>} : memref<2x1632xf32, #tpu.memory_space<vmem>>, vector<1x32xf32>,
    %200 = vector.extract_strided_slice %0 {offsets = [0, 4], sizes = [18, 1], strides = [1, 1]} : vector<18x24xf32> to vector<18x1xf32>
    %201 = vector.extract_strided_slice %0 {offsets = [0, 5], sizes = [18, 1], strides = [1, 1]} : vector<18x24xf32> to vector<18x1xf32>
    %202 = vector.extract_strided_slice %0 {offsets = [0, 6], sizes = [18, 1], strides = [1, 1]} : vector<18x24xf32> to vector<18x1xf32>
    %203 = vector.extract_strided_slice %0 {offsets = [0, 7], sizes = [18, 1], strides = [1, 1]} : vector<18x24xf32> to vector<18x1xf32>
    %204 = arith.mulf %200, %50 : vector<18x1xf32>
    %205 = vector.extract_strided_slice %2 {offsets = [0, 0], sizes = [1, 64], strides = [1, 1]} : vector<3x64xf32> to vector<1x64xf32>
    %206 = vector.broadcast %204 : vector<18x1xf32> to vector<18x64xf32>
    %207 = vector.broadcast %205 : vector<1x64xf32> to vector<18x64xf32>
    %208 = arith.mulf %206, %207 : vector<18x64xf32>
    %209 = arith.mulf %201, %51 : vector<18x1xf32>
    %210 = vector.extract_strided_slice %2 {offsets = [1, 0], sizes = [1, 64], strides = [1, 1]} : vector<3x64xf32> to vector<1x64xf32>
    %211 = vector.broadcast %209 : vector<18x1xf32> to vector<18x64xf32>
    %212 = vector.broadcast %210 : vector<1x64xf32> to vector<18x64xf32>
    %213 = arith.mulf %211, %212 : vector<18x64xf32>
    %214 = arith.addf %208, %213 : vector<18x64xf32>
    %215 = arith.mulf %202, %52 : vector<18x1xf32>
    %216 = vector.extract_strided_slice %2 {offsets = [2, 0], sizes = [1, 64], strides = [1, 1]} : vector<3x64xf32> to vector<1x64xf32>
    %217 = vector.broadcast %215 : vector<18x1xf32> to vector<18x64xf32>
    %218 = vector.broadcast %216 : vector<1x64xf32> to vector<18x64xf32>
    %219 = arith.mulf %217, %218 : vector<18x64xf32>
    %220 = arith.addf %214, %219 : vector<18x64xf32>
    %221 = vector.broadcast %67 : vector<18x1xf32> to vector<18x64xf32>
    %222 = arith.mulf %220, %221 : vector<18x64xf32>
    %223 = vector.broadcast %3 : vector<1x64xf32> to vector<18x64xf32>
    %224 = vector.broadcast %69 : vector<18x1xf32> to vector<18x64xf32>
    %225 = arith.mulf %223, %224 : vector<18x64xf32>
    %226 = arith.addf %222, %225 : vector<18x64xf32>
    %cst_52 = arith.constant 0.000000e+00 : f32
    %227 = vector.broadcast %cst_52 : f32 to vector<18x64xf32>
    %228 = arith.maximumf %226, %227 : vector<18x64xf32>
    %229 = vector.extract_strided_slice %202 {offsets = [0, 0], sizes = [17, 1], strides = [1, 1]} : vector<18x1xf32> to vector<17x1xf32>
    %230 = vector.extract_strided_slice %52 {offsets = [0, 0], sizes = [17, 1], strides = [1, 1]} : vector<18x1xf32> to vector<17x1xf32>
    %231 = arith.mulf %229, %230 : vector<17x1xf32>
    %232 = vector.extract_strided_slice %2 {offsets = [0, 0], sizes = [1, 64], strides = [1, 1]} : vector<3x64xf32> to vector<1x64xf32>
    %233 = vector.broadcast %231 : vector<17x1xf32> to vector<17x64xf32>
    %234 = vector.broadcast %232 : vector<1x64xf32> to vector<17x64xf32>
    %235 = arith.mulf %233, %234 : vector<17x64xf32>
    %236 = vector.extract_strided_slice %203 {offsets = [0, 0], sizes = [17, 1], strides = [1, 1]} : vector<18x1xf32> to vector<17x1xf32>
    %237 = vector.extract_strided_slice %53 {offsets = [0, 0], sizes = [17, 1], strides = [1, 1]} : vector<18x1xf32> to vector<17x1xf32>
    %238 = arith.mulf %236, %237 : vector<17x1xf32>
    %239 = vector.extract_strided_slice %2 {offsets = [1, 0], sizes = [1, 64], strides = [1, 1]} : vector<3x64xf32> to vector<1x64xf32>
    %240 = vector.broadcast %238 : vector<17x1xf32> to vector<17x64xf32>
    %241 = vector.broadcast %239 : vector<1x64xf32> to vector<17x64xf32>
    %242 = arith.mulf %240, %241 : vector<17x64xf32>
    %243 = arith.addf %235, %242 : vector<17x64xf32>
    %244 = vector.extract_strided_slice %200 {offsets = [1, 0], sizes = [17, 1], strides = [1, 1]} : vector<18x1xf32> to vector<17x1xf32>
    %245 = vector.extract_strided_slice %50 {offsets = [1, 0], sizes = [17, 1], strides = [1, 1]} : vector<18x1xf32> to vector<17x1xf32>
    %246 = arith.mulf %244, %245 : vector<17x1xf32>
    %247 = vector.extract_strided_slice %2 {offsets = [2, 0], sizes = [1, 64], strides = [1, 1]} : vector<3x64xf32> to vector<1x64xf32>
    %248 = vector.broadcast %246 : vector<17x1xf32> to vector<17x64xf32>
    %249 = vector.broadcast %247 : vector<1x64xf32> to vector<17x64xf32>
    %250 = arith.mulf %248, %249 : vector<17x64xf32>
    %251 = arith.addf %243, %250 : vector<17x64xf32>
    %252 = vector.broadcast %76 : vector<17x1xf32> to vector<17x64xf32>
    %253 = arith.mulf %251, %252 : vector<17x64xf32>
    %254 = vector.broadcast %3 : vector<1x64xf32> to vector<17x64xf32>
    %255 = vector.broadcast %78 : vector<17x1xf32> to vector<17x64xf32>
    %256 = arith.mulf %254, %255 : vector<17x64xf32>
    %257 = arith.addf %253, %256 : vector<17x64xf32>
    %cst_53 = arith.constant 0.000000e+00 : f32
    %258 = vector.broadcast %cst_53 : f32 to vector<17x64xf32>
    %259 = arith.maximumf %257, %258 : vector<17x64xf32>
    %260 = vector.extract_strided_slice %228 {offsets = [0, 0], sizes = [17, 64], strides = [1, 1]} : vector<18x64xf32> to vector<17x64xf32>
    %261 = vector.extract_strided_slice %228 {offsets = [1, 0], sizes = [17, 64], strides = [1, 1]} : vector<18x64xf32> to vector<17x64xf32>
    %262 = tpu.concatenate %260, %259, %261 in 1 : vector<17x64xf32>, vector<17x64xf32>, vector<17x64xf32> -> vector<17x192xf32>
    %cst_54 = arith.constant dense<0.000000e+00> : vector<17x32xf32>
    %263 = tpu.matmul %262, %4, %cst_54 {dimension_numbers = #tpu.dot_dimension_numbers<[1], [1], [0], [0], [0, 0, 1, 0], [], []>} : vector<17x192xf32>, vector<32x192xf32>, vector<17x32xf32> -> vector<17x32xf32>
    %264 = vector.broadcast %91 : vector<17x1xf32> to vector<17x32xf32>
    %265 = arith.mulf %263, %264 : vector<17x32xf32>
    %266 = vector.broadcast %5 : vector<1x32xf32> to vector<17x32xf32>
    %267 = vector.broadcast %93 : vector<17x1xf32> to vector<17x32xf32>
    %268 = arith.mulf %266, %267 : vector<17x32xf32>
    %269 = arith.addf %265, %268 : vector<17x32xf32>
    %cst_55 = arith.constant 0.000000e+00 : f32
    %270 = vector.broadcast %cst_55 : f32 to vector<17x32xf32>
    %271 = arith.maximumf %269, %270 : vector<17x32xf32>
    %272 = vector.extract_strided_slice %271 {offsets = [0, 0], sizes = [1, 32], strides = [1, 1]} : vector<17x32xf32> to vector<1x32xf32>
    %c1 = arith.constant 1 : index
    %c0_56 = arith.constant 0 : index
    %273 = vector.load %arg11[%c1, %c0_56] : memref<2x1632xf32, #tpu.memory_space<vmem>>, vector<1x32xf32>
    tpu.vector_store %arg11[%c1, %c0_56], %272 {strides = array<i32>} : memref<2x1632xf32, #tpu.memory_space<vmem>>, vector<1x32xf32>,
    %274 = vector.extract_strided_slice %271 {offsets = [1, 0], sizes = [1, 32], strides = [1, 1]} : vector<17x32xf32> to vector<1x32xf32>
    %c1_57 = arith.constant 1 : index
    %c32_58 = arith.constant 32 : index
    %275 = vector.load %arg11[%c1_57, %c32_58] : memref<2x1632xf32, #tpu.memory_space<vmem>>, vector<1x32xf32>
    tpu.vector_store %arg11[%c1_57, %c32_58], %274 {strides = array<i32>} : memref<2x1632xf32, #tpu.memory_space<vmem>>, vector<1x32xf32>,
    %276 = vector.extract_strided_slice %271 {offsets = [2, 0], sizes = [1, 32], strides = [1, 1]} : vector<17x32xf32> to vector<1x32xf32>
    %c1_59 = arith.constant 1 : index
    %c64_60 = arith.constant 64 : index
    %277 = vector.load %arg11[%c1_59, %c64_60] : memref<2x1632xf32, #tpu.memory_space<vmem>>, vector<1x32xf32>
    tpu.vector_store %arg11[%c1_59, %c64_60], %276 {strides = array<i32>} : memref<2x1632xf32, #tpu.memory_space<vmem>>, vector<1x32xf32>,
    %278 = vector.extract_strided_slice %271 {offsets = [3, 0], sizes = [1, 32], strides = [1, 1]} : vector<17x32xf32> to vector<1x32xf32>
    %c1_61 = arith.constant 1 : index
    %c96_62 = arith.constant 96 : index
    %279 = vector.load %arg11[%c1_61, %c96_62] : memref<2x1632xf32, #tpu.memory_space<vmem>>, vector<1x32xf32>
    tpu.vector_store %arg11[%c1_61, %c96_62], %278 {strides = array<i32>} : memref<2x1632xf32, #tpu.memory_space<vmem>>, vector<1x32xf32>,
    %280 = vector.extract_strided_slice %271 {offsets = [4, 0], sizes = [1, 32], strides = [1, 1]} : vector<17x32xf32> to vector<1x32xf32>
    %c1_63 = arith.constant 1 : index
    %c128_64 = arith.constant 128 : index
    %281 = vector.load %arg11[%c1_63, %c128_64] : memref<2x1632xf32, #tpu.memory_space<vmem>>, vector<1x32xf32>
    tpu.vector_store %arg11[%c1_63, %c128_64], %280 {strides = array<i32>} : memref<2x1632xf32, #tpu.memory_space<vmem>>, vector<1x32xf32>,
    %282 = vector.extract_strided_slice %271 {offsets = [5, 0], sizes = [1, 32], strides = [1, 1]} : vector<17x32xf32> to vector<1x32xf32>
    %c1_65 = arith.constant 1 : index
    %c160_66 = arith.constant 160 : index
    %283 = vector.load %arg11[%c1_65, %c160_66] : memref<2x1632xf32, #tpu.memory_space<vmem>>, vector<1x32xf32>
    tpu.vector_store %arg11[%c1_65, %c160_66], %282 {strides = array<i32>} : memref<2x1632xf32, #tpu.memory_space<vmem>>, vector<1x32xf32>,
    %284 = vector.extract_strided_slice %271 {offsets = [6, 0], sizes = [1, 32], strides = [1, 1]} : vector<17x32xf32> to vector<1x32xf32>
    %c1_67 = arith.constant 1 : index
    %c192_68 = arith.constant 192 : index
    %285 = vector.load %arg11[%c1_67, %c192_68] : memref<2x1632xf32, #tpu.memory_space<vmem>>, vector<1x32xf32>
    tpu.vector_store %arg11[%c1_67, %c192_68], %284 {strides = array<i32>} : memref<2x1632xf32, #tpu.memory_space<vmem>>, vector<1x32xf32>,
    %286 = vector.extract_strided_slice %271 {offsets = [7, 0], sizes = [1, 32], strides = [1, 1]} : vector<17x32xf32> to vector<1x32xf32>
    %c1_69 = arith.constant 1 : index
    %c224_70 = arith.constant 224 : index
    %287 = vector.load %arg11[%c1_69, %c224_70] : memref<2x1632xf32, #tpu.memory_space<vmem>>, vector<1x32xf32>
    tpu.vector_store %arg11[%c1_69, %c224_70], %286 {strides = array<i32>} : memref<2x1632xf32, #tpu.memory_space<vmem>>, vector<1x32xf32>,
    %288 = vector.extract_strided_slice %271 {offsets = [8, 0], sizes = [1, 32], strides = [1, 1]} : vector<17x32xf32> to vector<1x32xf32>
    %c1_71 = arith.constant 1 : index
    %c256_72 = arith.constant 256 : index
    %289 = vector.load %arg11[%c1_71, %c256_72] : memref<2x1632xf32, #tpu.memory_space<vmem>>, vector<1x32xf32>
    tpu.vector_store %arg11[%c1_71, %c256_72], %288 {strides = array<i32>} : memref<2x1632xf32, #tpu.memory_space<vmem>>, vector<1x32xf32>,
    %290 = vector.extract_strided_slice %271 {offsets = [9, 0], sizes = [1, 32], strides = [1, 1]} : vector<17x32xf32> to vector<1x32xf32>
    %c1_73 = arith.constant 1 : index
    %c288_74 = arith.constant 288 : index
    %291 = vector.load %arg11[%c1_73, %c288_74] : memref<2x1632xf32, #tpu.memory_space<vmem>>, vector<1x32xf32>
    tpu.vector_store %arg11[%c1_73, %c288_74], %290 {strides = array<i32>} : memref<2x1632xf32, #tpu.memory_space<vmem>>, vector<1x32xf32>,
    %292 = vector.extract_strided_slice %271 {offsets = [10, 0], sizes = [1, 32], strides = [1, 1]} : vector<17x32xf32> to vector<1x32xf32>
    %c1_75 = arith.constant 1 : index
    %c320_76 = arith.constant 320 : index
    %293 = vector.load %arg11[%c1_75, %c320_76] : memref<2x1632xf32, #tpu.memory_space<vmem>>, vector<1x32xf32>
    tpu.vector_store %arg11[%c1_75, %c320_76], %292 {strides = array<i32>} : memref<2x1632xf32, #tpu.memory_space<vmem>>, vector<1x32xf32>,
    %294 = vector.extract_strided_slice %271 {offsets = [11, 0], sizes = [1, 32], strides = [1, 1]} : vector<17x32xf32> to vector<1x32xf32>
    %c1_77 = arith.constant 1 : index
    %c352_78 = arith.constant 352 : index
    %295 = vector.load %arg11[%c1_77, %c352_78] : memref<2x1632xf32, #tpu.memory_space<vmem>>, vector<1x32xf32>
    tpu.vector_store %arg11[%c1_77, %c352_78], %294 {strides = array<i32>} : memref<2x1632xf32, #tpu.memory_space<vmem>>, vector<1x32xf32>,
    %296 = vector.extract_strided_slice %271 {offsets = [12, 0], sizes = [1, 32], strides = [1, 1]} : vector<17x32xf32> to vector<1x32xf32>
    %c1_79 = arith.constant 1 : index
    %c384_80 = arith.constant 384 : index
    %297 = vector.load %arg11[%c1_79, %c384_80] : memref<2x1632xf32, #tpu.memory_space<vmem>>, vector<1x32xf32>
    tpu.vector_store %arg11[%c1_79, %c384_80], %296 {strides = array<i32>} : memref<2x1632xf32, #tpu.memory_space<vmem>>, vector<1x32xf32>,
    %298 = vector.extract_strided_slice %271 {offsets = [13, 0], sizes = [1, 32], strides = [1, 1]} : vector<17x32xf32> to vector<1x32xf32>
    %c1_81 = arith.constant 1 : index
    %c416_82 = arith.constant 416 : index
    %299 = vector.load %arg11[%c1_81, %c416_82] : memref<2x1632xf32, #tpu.memory_space<vmem>>, vector<1x32xf32>
    tpu.vector_store %arg11[%c1_81, %c416_82], %298 {strides = array<i32>} : memref<2x1632xf32, #tpu.memory_space<vmem>>, vector<1x32xf32>,
    %300 = vector.extract_strided_slice %271 {offsets = [14, 0], sizes = [1, 32], strides = [1, 1]} : vector<17x32xf32> to vector<1x32xf32>
    %c1_83 = arith.constant 1 : index
    %c448_84 = arith.constant 448 : index
    %301 = vector.load %arg11[%c1_83, %c448_84] : memref<2x1632xf32, #tpu.memory_space<vmem>>, vector<1x32xf32>
    tpu.vector_store %arg11[%c1_83, %c448_84], %300 {strides = array<i32>} : memref<2x1632xf32, #tpu.memory_space<vmem>>, vector<1x32xf32>,
    %302 = vector.extract_strided_slice %271 {offsets = [15, 0], sizes = [1, 32], strides = [1, 1]} : vector<17x32xf32> to vector<1x32xf32>
    %c1_85 = arith.constant 1 : index
    %c480_86 = arith.constant 480 : index
    %303 = vector.load %arg11[%c1_85, %c480_86] : memref<2x1632xf32, #tpu.memory_space<vmem>>, vector<1x32xf32>
    tpu.vector_store %arg11[%c1_85, %c480_86], %302 {strides = array<i32>} : memref<2x1632xf32, #tpu.memory_space<vmem>>, vector<1x32xf32>,
    %304 = vector.extract_strided_slice %271 {offsets = [16, 0], sizes = [1, 32], strides = [1, 1]} : vector<17x32xf32> to vector<1x32xf32>
    %c1_87 = arith.constant 1 : index
    %c512_88 = arith.constant 512 : index
    %305 = vector.load %arg11[%c1_87, %c512_88] : memref<2x1632xf32, #tpu.memory_space<vmem>>, vector<1x32xf32>
    tpu.vector_store %arg11[%c1_87, %c512_88], %304 {strides = array<i32>} : memref<2x1632xf32, #tpu.memory_space<vmem>>, vector<1x32xf32>,
    %306 = vector.extract_strided_slice %0 {offsets = [0, 8], sizes = [18, 1], strides = [1, 1]} : vector<18x24xf32> to vector<18x1xf32>
    %307 = vector.extract_strided_slice %0 {offsets = [0, 9], sizes = [18, 1], strides = [1, 1]} : vector<18x24xf32> to vector<18x1xf32>
    %308 = vector.extract_strided_slice %0 {offsets = [0, 10], sizes = [18, 1], strides = [1, 1]} : vector<18x24xf32> to vector<18x1xf32>
    %309 = vector.extract_strided_slice %0 {offsets = [0, 11], sizes = [18, 1], strides = [1, 1]} : vector<18x24xf32> to vector<18x1xf32>
    %310 = arith.mulf %306, %6 : vector<18x1xf32>
    %311 = vector.extract_strided_slice %2 {offsets = [0, 0], sizes = [1, 64], strides = [1, 1]} : vector<3x64xf32> to vector<1x64xf32>
    %312 = vector.broadcast %310 : vector<18x1xf32> to vector<18x64xf32>
    %313 = vector.broadcast %311 : vector<1x64xf32> to vector<18x64xf32>
    %314 = arith.mulf %312, %313 : vector<18x64xf32>
    %315 = arith.mulf %307, %7 : vector<18x1xf32>
    %316 = vector.extract_strided_slice %2 {offsets = [1, 0], sizes = [1, 64], strides = [1, 1]} : vector<3x64xf32> to vector<1x64xf32>
    %317 = vector.broadcast %315 : vector<18x1xf32> to vector<18x64xf32>
    %318 = vector.broadcast %316 : vector<1x64xf32> to vector<18x64xf32>
    %319 = arith.mulf %317, %318 : vector<18x64xf32>
    %320 = arith.addf %314, %319 : vector<18x64xf32>
    %321 = arith.mulf %308, %8 : vector<18x1xf32>
    %322 = vector.extract_strided_slice %2 {offsets = [2, 0], sizes = [1, 64], strides = [1, 1]} : vector<3x64xf32> to vector<1x64xf32>
    %323 = vector.broadcast %321 : vector<18x1xf32> to vector<18x64xf32>
    %324 = vector.broadcast %322 : vector<1x64xf32> to vector<18x64xf32>
    %325 = arith.mulf %323, %324 : vector<18x64xf32>
    %326 = arith.addf %320, %325 : vector<18x64xf32>
    %327 = vector.broadcast %23 : vector<18x1xf32> to vector<18x64xf32>
    %328 = arith.mulf %326, %327 : vector<18x64xf32>
    %329 = vector.broadcast %3 : vector<1x64xf32> to vector<18x64xf32>
    %330 = vector.broadcast %25 : vector<18x1xf32> to vector<18x64xf32>
    %331 = arith.mulf %329, %330 : vector<18x64xf32>
    %332 = arith.addf %328, %331 : vector<18x64xf32>
    %cst_89 = arith.constant 0.000000e+00 : f32
    %333 = vector.broadcast %cst_89 : f32 to vector<18x64xf32>
    %334 = arith.maximumf %332, %333 : vector<18x64xf32>
    %335 = vector.extract_strided_slice %308 {offsets = [0, 0], sizes = [17, 1], strides = [1, 1]} : vector<18x1xf32> to vector<17x1xf32>
    %336 = vector.extract_strided_slice %8 {offsets = [0, 0], sizes = [17, 1], strides = [1, 1]} : vector<18x1xf32> to vector<17x1xf32>
    %337 = arith.mulf %335, %336 : vector<17x1xf32>
    %338 = vector.extract_strided_slice %2 {offsets = [0, 0], sizes = [1, 64], strides = [1, 1]} : vector<3x64xf32> to vector<1x64xf32>
    %339 = vector.broadcast %337 : vector<17x1xf32> to vector<17x64xf32>
    %340 = vector.broadcast %338 : vector<1x64xf32> to vector<17x64xf32>
    %341 = arith.mulf %339, %340 : vector<17x64xf32>
    %342 = vector.extract_strided_slice %309 {offsets = [0, 0], sizes = [17, 1], strides = [1, 1]} : vector<18x1xf32> to vector<17x1xf32>
    %343 = vector.extract_strided_slice %9 {offsets = [0, 0], sizes = [17, 1], strides = [1, 1]} : vector<18x1xf32> to vector<17x1xf32>
    %344 = arith.mulf %342, %343 : vector<17x1xf32>
    %345 = vector.extract_strided_slice %2 {offsets = [1, 0], sizes = [1, 64], strides = [1, 1]} : vector<3x64xf32> to vector<1x64xf32>
    %346 = vector.broadcast %344 : vector<17x1xf32> to vector<17x64xf32>
    %347 = vector.broadcast %345 : vector<1x64xf32> to vector<17x64xf32>
    %348 = arith.mulf %346, %347 : vector<17x64xf32>
    %349 = arith.addf %341, %348 : vector<17x64xf32>
    %350 = vector.extract_strided_slice %306 {offsets = [1, 0], sizes = [17, 1], strides = [1, 1]} : vector<18x1xf32> to vector<17x1xf32>
    %351 = vector.extract_strided_slice %6 {offsets = [1, 0], sizes = [17, 1], strides = [1, 1]} : vector<18x1xf32> to vector<17x1xf32>
    %352 = arith.mulf %350, %351 : vector<17x1xf32>
    %353 = vector.extract_strided_slice %2 {offsets = [2, 0], sizes = [1, 64], strides = [1, 1]} : vector<3x64xf32> to vector<1x64xf32>
    %354 = vector.broadcast %352 : vector<17x1xf32> to vector<17x64xf32>
    %355 = vector.broadcast %353 : vector<1x64xf32> to vector<17x64xf32>
    %356 = arith.mulf %354, %355 : vector<17x64xf32>
    %357 = arith.addf %349, %356 : vector<17x64xf32>
    %358 = vector.broadcast %32 : vector<17x1xf32> to vector<17x64xf32>
    %359 = arith.mulf %357, %358 : vector<17x64xf32>
    %360 = vector.broadcast %3 : vector<1x64xf32> to vector<17x64xf32>
    %361 = vector.broadcast %34 : vector<17x1xf32> to vector<17x64xf32>
    %362 = arith.mulf %360, %361 : vector<17x64xf32>
    %363 = arith.addf %359, %362 : vector<17x64xf32>
    %cst_90 = arith.constant 0.000000e+00 : f32
    %364 = vector.broadcast %cst_90 : f32 to vector<17x64xf32>
    %365 = arith.maximumf %363, %364 : vector<17x64xf32>
    %366 = vector.extract_strided_slice %334 {offsets = [0, 0], sizes = [17, 64], strides = [1, 1]} : vector<18x64xf32> to vector<17x64xf32>
    %367 = vector.extract_strided_slice %334 {offsets = [1, 0], sizes = [17, 64], strides = [1, 1]} : vector<18x64xf32> to vector<17x64xf32>
    %368 = tpu.concatenate %366, %365, %367 in 1 : vector<17x64xf32>, vector<17x64xf32>, vector<17x64xf32> -> vector<17x192xf32>
    %cst_91 = arith.constant dense<0.000000e+00> : vector<17x32xf32>
    %369 = tpu.matmul %368, %4, %cst_91 {dimension_numbers = #tpu.dot_dimension_numbers<[1], [1], [0], [0], [0, 0, 1, 0], [], []>} : vector<17x192xf32>, vector<32x192xf32>, vector<17x32xf32> -> vector<17x32xf32>
    %370 = vector.broadcast %47 : vector<17x1xf32> to vector<17x32xf32>
    %371 = arith.mulf %369, %370 : vector<17x32xf32>
    %372 = vector.broadcast %5 : vector<1x32xf32> to vector<17x32xf32>
    %373 = vector.broadcast %49 : vector<17x1xf32> to vector<17x32xf32>
    %374 = arith.mulf %372, %373 : vector<17x32xf32>
    %375 = arith.addf %371, %374 : vector<17x32xf32>
    %cst_92 = arith.constant 0.000000e+00 : f32
    %376 = vector.broadcast %cst_92 : f32 to vector<17x32xf32>
    %377 = arith.maximumf %375, %376 : vector<17x32xf32>
    %378 = vector.extract_strided_slice %377 {offsets = [0, 0], sizes = [1, 32], strides = [1, 1]} : vector<17x32xf32> to vector<1x32xf32>
    %c0_93 = arith.constant 0 : index
    %c544 = arith.constant 544 : index
    %379 = vector.load %arg11[%c0_93, %c544] : memref<2x1632xf32, #tpu.memory_space<vmem>>, vector<1x32xf32>
    tpu.vector_store %arg11[%c0_93, %c544], %378 {strides = array<i32>} : memref<2x1632xf32, #tpu.memory_space<vmem>>, vector<1x32xf32>,
    %380 = vector.extract_strided_slice %377 {offsets = [1, 0], sizes = [1, 32], strides = [1, 1]} : vector<17x32xf32> to vector<1x32xf32>
    %c0_94 = arith.constant 0 : index
    %c576 = arith.constant 576 : index
    %381 = vector.load %arg11[%c0_94, %c576] : memref<2x1632xf32, #tpu.memory_space<vmem>>, vector<1x32xf32>
    tpu.vector_store %arg11[%c0_94, %c576], %380 {strides = array<i32>} : memref<2x1632xf32, #tpu.memory_space<vmem>>, vector<1x32xf32>,
    %382 = vector.extract_strided_slice %377 {offsets = [2, 0], sizes = [1, 32], strides = [1, 1]} : vector<17x32xf32> to vector<1x32xf32>
    %c0_95 = arith.constant 0 : index
    %c608 = arith.constant 608 : index
    %383 = vector.load %arg11[%c0_95, %c608] : memref<2x1632xf32, #tpu.memory_space<vmem>>, vector<1x32xf32>
    tpu.vector_store %arg11[%c0_95, %c608], %382 {strides = array<i32>} : memref<2x1632xf32, #tpu.memory_space<vmem>>, vector<1x32xf32>,
    %384 = vector.extract_strided_slice %377 {offsets = [3, 0], sizes = [1, 32], strides = [1, 1]} : vector<17x32xf32> to vector<1x32xf32>
    %c0_96 = arith.constant 0 : index
    %c640 = arith.constant 640 : index
    %385 = vector.load %arg11[%c0_96, %c640] : memref<2x1632xf32, #tpu.memory_space<vmem>>, vector<1x32xf32>
    tpu.vector_store %arg11[%c0_96, %c640], %384 {strides = array<i32>} : memref<2x1632xf32, #tpu.memory_space<vmem>>, vector<1x32xf32>,
    %386 = vector.extract_strided_slice %377 {offsets = [4, 0], sizes = [1, 32], strides = [1, 1]} : vector<17x32xf32> to vector<1x32xf32>
    %c0_97 = arith.constant 0 : index
    %c672 = arith.constant 672 : index
    %387 = vector.load %arg11[%c0_97, %c672] : memref<2x1632xf32, #tpu.memory_space<vmem>>, vector<1x32xf32>
    tpu.vector_store %arg11[%c0_97, %c672], %386 {strides = array<i32>} : memref<2x1632xf32, #tpu.memory_space<vmem>>, vector<1x32xf32>,
    %388 = vector.extract_strided_slice %377 {offsets = [5, 0], sizes = [1, 32], strides = [1, 1]} : vector<17x32xf32> to vector<1x32xf32>
    %c0_98 = arith.constant 0 : index
    %c704 = arith.constant 704 : index
    %389 = vector.load %arg11[%c0_98, %c704] : memref<2x1632xf32, #tpu.memory_space<vmem>>, vector<1x32xf32>
    tpu.vector_store %arg11[%c0_98, %c704], %388 {strides = array<i32>} : memref<2x1632xf32, #tpu.memory_space<vmem>>, vector<1x32xf32>,
    %390 = vector.extract_strided_slice %377 {offsets = [6, 0], sizes = [1, 32], strides = [1, 1]} : vector<17x32xf32> to vector<1x32xf32>
    %c0_99 = arith.constant 0 : index
    %c736 = arith.constant 736 : index
    %391 = vector.load %arg11[%c0_99, %c736] : memref<2x1632xf32, #tpu.memory_space<vmem>>, vector<1x32xf32>
    tpu.vector_store %arg11[%c0_99, %c736], %390 {strides = array<i32>} : memref<2x1632xf32, #tpu.memory_space<vmem>>, vector<1x32xf32>,
    %392 = vector.extract_strided_slice %377 {offsets = [7, 0], sizes = [1, 32], strides = [1, 1]} : vector<17x32xf32> to vector<1x32xf32>
    %c0_100 = arith.constant 0 : index
    %c768 = arith.constant 768 : index
    %393 = vector.load %arg11[%c0_100, %c768] : memref<2x1632xf32, #tpu.memory_space<vmem>>, vector<1x32xf32>
    tpu.vector_store %arg11[%c0_100, %c768], %392 {strides = array<i32>} : memref<2x1632xf32, #tpu.memory_space<vmem>>, vector<1x32xf32>,
    %394 = vector.extract_strided_slice %377 {offsets = [8, 0], sizes = [1, 32], strides = [1, 1]} : vector<17x32xf32> to vector<1x32xf32>
    %c0_101 = arith.constant 0 : index
    %c800 = arith.constant 800 : index
    %395 = vector.load %arg11[%c0_101, %c800] : memref<2x1632xf32, #tpu.memory_space<vmem>>, vector<1x32xf32>
    tpu.vector_store %arg11[%c0_101, %c800], %394 {strides = array<i32>} : memref<2x1632xf32, #tpu.memory_space<vmem>>, vector<1x32xf32>,
    %396 = vector.extract_strided_slice %377 {offsets = [9, 0], sizes = [1, 32], strides = [1, 1]} : vector<17x32xf32> to vector<1x32xf32>
    %c0_102 = arith.constant 0 : index
    %c832 = arith.constant 832 : index
    %397 = vector.load %arg11[%c0_102, %c832] : memref<2x1632xf32, #tpu.memory_space<vmem>>, vector<1x32xf32>
    tpu.vector_store %arg11[%c0_102, %c832], %396 {strides = array<i32>} : memref<2x1632xf32, #tpu.memory_space<vmem>>, vector<1x32xf32>,
    %398 = vector.extract_strided_slice %377 {offsets = [10, 0], sizes = [1, 32], strides = [1, 1]} : vector<17x32xf32> to vector<1x32xf32>
    %c0_103 = arith.constant 0 : index
    %c864 = arith.constant 864 : index
    %399 = vector.load %arg11[%c0_103, %c864] : memref<2x1632xf32, #tpu.memory_space<vmem>>, vector<1x32xf32>
    tpu.vector_store %arg11[%c0_103, %c864], %398 {strides = array<i32>} : memref<2x1632xf32, #tpu.memory_space<vmem>>, vector<1x32xf32>,
    %400 = vector.extract_strided_slice %377 {offsets = [11, 0], sizes = [1, 32], strides = [1, 1]} : vector<17x32xf32> to vector<1x32xf32>
    %c0_104 = arith.constant 0 : index
    %c896 = arith.constant 896 : index
    %401 = vector.load %arg11[%c0_104, %c896] : memref<2x1632xf32, #tpu.memory_space<vmem>>, vector<1x32xf32>
    tpu.vector_store %arg11[%c0_104, %c896], %400 {strides = array<i32>} : memref<2x1632xf32, #tpu.memory_space<vmem>>, vector<1x32xf32>,
    %402 = vector.extract_strided_slice %377 {offsets = [12, 0], sizes = [1, 32], strides = [1, 1]} : vector<17x32xf32> to vector<1x32xf32>
    %c0_105 = arith.constant 0 : index
    %c928 = arith.constant 928 : index
    %403 = vector.load %arg11[%c0_105, %c928] : memref<2x1632xf32, #tpu.memory_space<vmem>>, vector<1x32xf32>
    tpu.vector_store %arg11[%c0_105, %c928], %402 {strides = array<i32>} : memref<2x1632xf32, #tpu.memory_space<vmem>>, vector<1x32xf32>,
    %404 = vector.extract_strided_slice %377 {offsets = [13, 0], sizes = [1, 32], strides = [1, 1]} : vector<17x32xf32> to vector<1x32xf32>
    %c0_106 = arith.constant 0 : index
    %c960 = arith.constant 960 : index
    %405 = vector.load %arg11[%c0_106, %c960] : memref<2x1632xf32, #tpu.memory_space<vmem>>, vector<1x32xf32>
    tpu.vector_store %arg11[%c0_106, %c960], %404 {strides = array<i32>} : memref<2x1632xf32, #tpu.memory_space<vmem>>, vector<1x32xf32>,
    %406 = vector.extract_strided_slice %377 {offsets = [14, 0], sizes = [1, 32], strides = [1, 1]} : vector<17x32xf32> to vector<1x32xf32>
    %c0_107 = arith.constant 0 : index
    %c992 = arith.constant 992 : index
    %407 = vector.load %arg11[%c0_107, %c992] : memref<2x1632xf32, #tpu.memory_space<vmem>>, vector<1x32xf32>
    tpu.vector_store %arg11[%c0_107, %c992], %406 {strides = array<i32>} : memref<2x1632xf32, #tpu.memory_space<vmem>>, vector<1x32xf32>,
    %408 = vector.extract_strided_slice %377 {offsets = [15, 0], sizes = [1, 32], strides = [1, 1]} : vector<17x32xf32> to vector<1x32xf32>
    %c0_108 = arith.constant 0 : index
    %c1024 = arith.constant 1024 : index
    %409 = vector.load %arg11[%c0_108, %c1024] : memref<2x1632xf32, #tpu.memory_space<vmem>>, vector<1x32xf32>
    tpu.vector_store %arg11[%c0_108, %c1024], %408 {strides = array<i32>} : memref<2x1632xf32, #tpu.memory_space<vmem>>, vector<1x32xf32>,
    %410 = vector.extract_strided_slice %377 {offsets = [16, 0], sizes = [1, 32], strides = [1, 1]} : vector<17x32xf32> to vector<1x32xf32>
    %c0_109 = arith.constant 0 : index
    %c1056 = arith.constant 1056 : index
    %411 = vector.load %arg11[%c0_109, %c1056] : memref<2x1632xf32, #tpu.memory_space<vmem>>, vector<1x32xf32>
    tpu.vector_store %arg11[%c0_109, %c1056], %410 {strides = array<i32>} : memref<2x1632xf32, #tpu.memory_space<vmem>>, vector<1x32xf32>,
    %412 = vector.extract_strided_slice %0 {offsets = [0, 12], sizes = [18, 1], strides = [1, 1]} : vector<18x24xf32> to vector<18x1xf32>
    %413 = vector.extract_strided_slice %0 {offsets = [0, 13], sizes = [18, 1], strides = [1, 1]} : vector<18x24xf32> to vector<18x1xf32>
    %414 = vector.extract_strided_slice %0 {offsets = [0, 14], sizes = [18, 1], strides = [1, 1]} : vector<18x24xf32> to vector<18x1xf32>
    %415 = vector.extract_strided_slice %0 {offsets = [0, 15], sizes = [18, 1], strides = [1, 1]} : vector<18x24xf32> to vector<18x1xf32>
    %416 = arith.mulf %412, %50 : vector<18x1xf32>
    %417 = vector.extract_strided_slice %2 {offsets = [0, 0], sizes = [1, 64], strides = [1, 1]} : vector<3x64xf32> to vector<1x64xf32>
    %418 = vector.broadcast %416 : vector<18x1xf32> to vector<18x64xf32>
    %419 = vector.broadcast %417 : vector<1x64xf32> to vector<18x64xf32>
    %420 = arith.mulf %418, %419 : vector<18x64xf32>
    %421 = arith.mulf %413, %51 : vector<18x1xf32>
    %422 = vector.extract_strided_slice %2 {offsets = [1, 0], sizes = [1, 64], strides = [1, 1]} : vector<3x64xf32> to vector<1x64xf32>
    %423 = vector.broadcast %421 : vector<18x1xf32> to vector<18x64xf32>
    %424 = vector.broadcast %422 : vector<1x64xf32> to vector<18x64xf32>
    %425 = arith.mulf %423, %424 : vector<18x64xf32>
    %426 = arith.addf %420, %425 : vector<18x64xf32>
    %427 = arith.mulf %414, %52 : vector<18x1xf32>
    %428 = vector.extract_strided_slice %2 {offsets = [2, 0], sizes = [1, 64], strides = [1, 1]} : vector<3x64xf32> to vector<1x64xf32>
    %429 = vector.broadcast %427 : vector<18x1xf32> to vector<18x64xf32>
    %430 = vector.broadcast %428 : vector<1x64xf32> to vector<18x64xf32>
    %431 = arith.mulf %429, %430 : vector<18x64xf32>
    %432 = arith.addf %426, %431 : vector<18x64xf32>
    %433 = vector.broadcast %67 : vector<18x1xf32> to vector<18x64xf32>
    %434 = arith.mulf %432, %433 : vector<18x64xf32>
    %435 = vector.broadcast %3 : vector<1x64xf32> to vector<18x64xf32>
    %436 = vector.broadcast %69 : vector<18x1xf32> to vector<18x64xf32>
    %437 = arith.mulf %435, %436 : vector<18x64xf32>
    %438 = arith.addf %434, %437 : vector<18x64xf32>
    %cst_110 = arith.constant 0.000000e+00 : f32
    %439 = vector.broadcast %cst_110 : f32 to vector<18x64xf32>
    %440 = arith.maximumf %438, %439 : vector<18x64xf32>
    %441 = vector.extract_strided_slice %414 {offsets = [0, 0], sizes = [17, 1], strides = [1, 1]} : vector<18x1xf32> to vector<17x1xf32>
    %442 = vector.extract_strided_slice %52 {offsets = [0, 0], sizes = [17, 1], strides = [1, 1]} : vector<18x1xf32> to vector<17x1xf32>
    %443 = arith.mulf %441, %442 : vector<17x1xf32>
    %444 = vector.extract_strided_slice %2 {offsets = [0, 0], sizes = [1, 64], strides = [1, 1]} : vector<3x64xf32> to vector<1x64xf32>
    %445 = vector.broadcast %443 : vector<17x1xf32> to vector<17x64xf32>
    %446 = vector.broadcast %444 : vector<1x64xf32> to vector<17x64xf32>
    %447 = arith.mulf %445, %446 : vector<17x64xf32>
    %448 = vector.extract_strided_slice %415 {offsets = [0, 0], sizes = [17, 1], strides = [1, 1]} : vector<18x1xf32> to vector<17x1xf32>
    %449 = vector.extract_strided_slice %53 {offsets = [0, 0], sizes = [17, 1], strides = [1, 1]} : vector<18x1xf32> to vector<17x1xf32>
    %450 = arith.mulf %448, %449 : vector<17x1xf32>
    %451 = vector.extract_strided_slice %2 {offsets = [1, 0], sizes = [1, 64], strides = [1, 1]} : vector<3x64xf32> to vector<1x64xf32>
    %452 = vector.broadcast %450 : vector<17x1xf32> to vector<17x64xf32>
    %453 = vector.broadcast %451 : vector<1x64xf32> to vector<17x64xf32>
    %454 = arith.mulf %452, %453 : vector<17x64xf32>
    %455 = arith.addf %447, %454 : vector<17x64xf32>
    %456 = vector.extract_strided_slice %412 {offsets = [1, 0], sizes = [17, 1], strides = [1, 1]} : vector<18x1xf32> to vector<17x1xf32>
    %457 = vector.extract_strided_slice %50 {offsets = [1, 0], sizes = [17, 1], strides = [1, 1]} : vector<18x1xf32> to vector<17x1xf32>
    %458 = arith.mulf %456, %457 : vector<17x1xf32>
    %459 = vector.extract_strided_slice %2 {offsets = [2, 0], sizes = [1, 64], strides = [1, 1]} : vector<3x64xf32> to vector<1x64xf32>
    %460 = vector.broadcast %458 : vector<17x1xf32> to vector<17x64xf32>
    %461 = vector.broadcast %459 : vector<1x64xf32> to vector<17x64xf32>
    %462 = arith.mulf %460, %461 : vector<17x64xf32>
    %463 = arith.addf %455, %462 : vector<17x64xf32>
    %464 = vector.broadcast %76 : vector<17x1xf32> to vector<17x64xf32>
    %465 = arith.mulf %463, %464 : vector<17x64xf32>
    %466 = vector.broadcast %3 : vector<1x64xf32> to vector<17x64xf32>
    %467 = vector.broadcast %78 : vector<17x1xf32> to vector<17x64xf32>
    %468 = arith.mulf %466, %467 : vector<17x64xf32>
    %469 = arith.addf %465, %468 : vector<17x64xf32>
    %cst_111 = arith.constant 0.000000e+00 : f32
    %470 = vector.broadcast %cst_111 : f32 to vector<17x64xf32>
    %471 = arith.maximumf %469, %470 : vector<17x64xf32>
    %472 = vector.extract_strided_slice %440 {offsets = [0, 0], sizes = [17, 64], strides = [1, 1]} : vector<18x64xf32> to vector<17x64xf32>
    %473 = vector.extract_strided_slice %440 {offsets = [1, 0], sizes = [17, 64], strides = [1, 1]} : vector<18x64xf32> to vector<17x64xf32>
    %474 = tpu.concatenate %472, %471, %473 in 1 : vector<17x64xf32>, vector<17x64xf32>, vector<17x64xf32> -> vector<17x192xf32>
    %cst_112 = arith.constant dense<0.000000e+00> : vector<17x32xf32>
    %475 = tpu.matmul %474, %4, %cst_112 {dimension_numbers = #tpu.dot_dimension_numbers<[1], [1], [0], [0], [0, 0, 1, 0], [], []>} : vector<17x192xf32>, vector<32x192xf32>, vector<17x32xf32> -> vector<17x32xf32>
    %476 = vector.broadcast %91 : vector<17x1xf32> to vector<17x32xf32>
    %477 = arith.mulf %475, %476 : vector<17x32xf32>
    %478 = vector.broadcast %5 : vector<1x32xf32> to vector<17x32xf32>
    %479 = vector.broadcast %93 : vector<17x1xf32> to vector<17x32xf32>
    %480 = arith.mulf %478, %479 : vector<17x32xf32>
    %481 = arith.addf %477, %480 : vector<17x32xf32>
    %cst_113 = arith.constant 0.000000e+00 : f32
    %482 = vector.broadcast %cst_113 : f32 to vector<17x32xf32>
    %483 = arith.maximumf %481, %482 : vector<17x32xf32>
    %484 = vector.extract_strided_slice %483 {offsets = [0, 0], sizes = [1, 32], strides = [1, 1]} : vector<17x32xf32> to vector<1x32xf32>
    %c1_114 = arith.constant 1 : index
    %c544_115 = arith.constant 544 : index
    %485 = vector.load %arg11[%c1_114, %c544_115] : memref<2x1632xf32, #tpu.memory_space<vmem>>, vector<1x32xf32>
    tpu.vector_store %arg11[%c1_114, %c544_115], %484 {strides = array<i32>} : memref<2x1632xf32, #tpu.memory_space<vmem>>, vector<1x32xf32>,
    %486 = vector.extract_strided_slice %483 {offsets = [1, 0], sizes = [1, 32], strides = [1, 1]} : vector<17x32xf32> to vector<1x32xf32>
    %c1_116 = arith.constant 1 : index
    %c576_117 = arith.constant 576 : index
    %487 = vector.load %arg11[%c1_116, %c576_117] : memref<2x1632xf32, #tpu.memory_space<vmem>>, vector<1x32xf32>
    tpu.vector_store %arg11[%c1_116, %c576_117], %486 {strides = array<i32>} : memref<2x1632xf32, #tpu.memory_space<vmem>>, vector<1x32xf32>,
    %488 = vector.extract_strided_slice %483 {offsets = [2, 0], sizes = [1, 32], strides = [1, 1]} : vector<17x32xf32> to vector<1x32xf32>
    %c1_118 = arith.constant 1 : index
    %c608_119 = arith.constant 608 : index
    %489 = vector.load %arg11[%c1_118, %c608_119] : memref<2x1632xf32, #tpu.memory_space<vmem>>, vector<1x32xf32>
    tpu.vector_store %arg11[%c1_118, %c608_119], %488 {strides = array<i32>} : memref<2x1632xf32, #tpu.memory_space<vmem>>, vector<1x32xf32>,
    %490 = vector.extract_strided_slice %483 {offsets = [3, 0], sizes = [1, 32], strides = [1, 1]} : vector<17x32xf32> to vector<1x32xf32>
    %c1_120 = arith.constant 1 : index
    %c640_121 = arith.constant 640 : index
    %491 = vector.load %arg11[%c1_120, %c640_121] : memref<2x1632xf32, #tpu.memory_space<vmem>>, vector<1x32xf32>
    tpu.vector_store %arg11[%c1_120, %c640_121], %490 {strides = array<i32>} : memref<2x1632xf32, #tpu.memory_space<vmem>>, vector<1x32xf32>,
    %492 = vector.extract_strided_slice %483 {offsets = [4, 0], sizes = [1, 32], strides = [1, 1]} : vector<17x32xf32> to vector<1x32xf32>
    %c1_122 = arith.constant 1 : index
    %c672_123 = arith.constant 672 : index
    %493 = vector.load %arg11[%c1_122, %c672_123] : memref<2x1632xf32, #tpu.memory_space<vmem>>, vector<1x32xf32>
    tpu.vector_store %arg11[%c1_122, %c672_123], %492 {strides = array<i32>} : memref<2x1632xf32, #tpu.memory_space<vmem>>, vector<1x32xf32>,
    %494 = vector.extract_strided_slice %483 {offsets = [5, 0], sizes = [1, 32], strides = [1, 1]} : vector<17x32xf32> to vector<1x32xf32>
    %c1_124 = arith.constant 1 : index
    %c704_125 = arith.constant 704 : index
    %495 = vector.load %arg11[%c1_124, %c704_125] : memref<2x1632xf32, #tpu.memory_space<vmem>>, vector<1x32xf32>
    tpu.vector_store %arg11[%c1_124, %c704_125], %494 {strides = array<i32>} : memref<2x1632xf32, #tpu.memory_space<vmem>>, vector<1x32xf32>,
    %496 = vector.extract_strided_slice %483 {offsets = [6, 0], sizes = [1, 32], strides = [1, 1]} : vector<17x32xf32> to vector<1x32xf32>
    %c1_126 = arith.constant 1 : index
    %c736_127 = arith.constant 736 : index
    %497 = vector.load %arg11[%c1_126, %c736_127] : memref<2x1632xf32, #tpu.memory_space<vmem>>, vector<1x32xf32>
    tpu.vector_store %arg11[%c1_126, %c736_127], %496 {strides = array<i32>} : memref<2x1632xf32, #tpu.memory_space<vmem>>, vector<1x32xf32>,
    %498 = vector.extract_strided_slice %483 {offsets = [7, 0], sizes = [1, 32], strides = [1, 1]} : vector<17x32xf32> to vector<1x32xf32>
    %c1_128 = arith.constant 1 : index
    %c768_129 = arith.constant 768 : index
    %499 = vector.load %arg11[%c1_128, %c768_129] : memref<2x1632xf32, #tpu.memory_space<vmem>>, vector<1x32xf32>
    tpu.vector_store %arg11[%c1_128, %c768_129], %498 {strides = array<i32>} : memref<2x1632xf32, #tpu.memory_space<vmem>>, vector<1x32xf32>,
    %500 = vector.extract_strided_slice %483 {offsets = [8, 0], sizes = [1, 32], strides = [1, 1]} : vector<17x32xf32> to vector<1x32xf32>
    %c1_130 = arith.constant 1 : index
    %c800_131 = arith.constant 800 : index
    %501 = vector.load %arg11[%c1_130, %c800_131] : memref<2x1632xf32, #tpu.memory_space<vmem>>, vector<1x32xf32>
    tpu.vector_store %arg11[%c1_130, %c800_131], %500 {strides = array<i32>} : memref<2x1632xf32, #tpu.memory_space<vmem>>, vector<1x32xf32>,
    %502 = vector.extract_strided_slice %483 {offsets = [9, 0], sizes = [1, 32], strides = [1, 1]} : vector<17x32xf32> to vector<1x32xf32>
    %c1_132 = arith.constant 1 : index
    %c832_133 = arith.constant 832 : index
    %503 = vector.load %arg11[%c1_132, %c832_133] : memref<2x1632xf32, #tpu.memory_space<vmem>>, vector<1x32xf32>
    tpu.vector_store %arg11[%c1_132, %c832_133], %502 {strides = array<i32>} : memref<2x1632xf32, #tpu.memory_space<vmem>>, vector<1x32xf32>,
    %504 = vector.extract_strided_slice %483 {offsets = [10, 0], sizes = [1, 32], strides = [1, 1]} : vector<17x32xf32> to vector<1x32xf32>
    %c1_134 = arith.constant 1 : index
    %c864_135 = arith.constant 864 : index
    %505 = vector.load %arg11[%c1_134, %c864_135] : memref<2x1632xf32, #tpu.memory_space<vmem>>, vector<1x32xf32>
    tpu.vector_store %arg11[%c1_134, %c864_135], %504 {strides = array<i32>} : memref<2x1632xf32, #tpu.memory_space<vmem>>, vector<1x32xf32>,
    %506 = vector.extract_strided_slice %483 {offsets = [11, 0], sizes = [1, 32], strides = [1, 1]} : vector<17x32xf32> to vector<1x32xf32>
    %c1_136 = arith.constant 1 : index
    %c896_137 = arith.constant 896 : index
    %507 = vector.load %arg11[%c1_136, %c896_137] : memref<2x1632xf32, #tpu.memory_space<vmem>>, vector<1x32xf32>
    tpu.vector_store %arg11[%c1_136, %c896_137], %506 {strides = array<i32>} : memref<2x1632xf32, #tpu.memory_space<vmem>>, vector<1x32xf32>,
    %508 = vector.extract_strided_slice %483 {offsets = [12, 0], sizes = [1, 32], strides = [1, 1]} : vector<17x32xf32> to vector<1x32xf32>
    %c1_138 = arith.constant 1 : index
    %c928_139 = arith.constant 928 : index
    %509 = vector.load %arg11[%c1_138, %c928_139] : memref<2x1632xf32, #tpu.memory_space<vmem>>, vector<1x32xf32>
    tpu.vector_store %arg11[%c1_138, %c928_139], %508 {strides = array<i32>} : memref<2x1632xf32, #tpu.memory_space<vmem>>, vector<1x32xf32>,
    %510 = vector.extract_strided_slice %483 {offsets = [13, 0], sizes = [1, 32], strides = [1, 1]} : vector<17x32xf32> to vector<1x32xf32>
    %c1_140 = arith.constant 1 : index
    %c960_141 = arith.constant 960 : index
    %511 = vector.load %arg11[%c1_140, %c960_141] : memref<2x1632xf32, #tpu.memory_space<vmem>>, vector<1x32xf32>
    tpu.vector_store %arg11[%c1_140, %c960_141], %510 {strides = array<i32>} : memref<2x1632xf32, #tpu.memory_space<vmem>>, vector<1x32xf32>,
    %512 = vector.extract_strided_slice %483 {offsets = [14, 0], sizes = [1, 32], strides = [1, 1]} : vector<17x32xf32> to vector<1x32xf32>
    %c1_142 = arith.constant 1 : index
    %c992_143 = arith.constant 992 : index
    %513 = vector.load %arg11[%c1_142, %c992_143] : memref<2x1632xf32, #tpu.memory_space<vmem>>, vector<1x32xf32>
    tpu.vector_store %arg11[%c1_142, %c992_143], %512 {strides = array<i32>} : memref<2x1632xf32, #tpu.memory_space<vmem>>, vector<1x32xf32>,
    %514 = vector.extract_strided_slice %483 {offsets = [15, 0], sizes = [1, 32], strides = [1, 1]} : vector<17x32xf32> to vector<1x32xf32>
    %c1_144 = arith.constant 1 : index
    %c1024_145 = arith.constant 1024 : index
    %515 = vector.load %arg11[%c1_144, %c1024_145] : memref<2x1632xf32, #tpu.memory_space<vmem>>, vector<1x32xf32>
    tpu.vector_store %arg11[%c1_144, %c1024_145], %514 {strides = array<i32>} : memref<2x1632xf32, #tpu.memory_space<vmem>>, vector<1x32xf32>,
    %516 = vector.extract_strided_slice %483 {offsets = [16, 0], sizes = [1, 32], strides = [1, 1]} : vector<17x32xf32> to vector<1x32xf32>
    %c1_146 = arith.constant 1 : index
    %c1056_147 = arith.constant 1056 : index
    %517 = vector.load %arg11[%c1_146, %c1056_147] : memref<2x1632xf32, #tpu.memory_space<vmem>>, vector<1x32xf32>
    tpu.vector_store %arg11[%c1_146, %c1056_147], %516 {strides = array<i32>} : memref<2x1632xf32, #tpu.memory_space<vmem>>, vector<1x32xf32>,
    %518 = vector.extract_strided_slice %0 {offsets = [0, 16], sizes = [18, 1], strides = [1, 1]} : vector<18x24xf32> to vector<18x1xf32>
    %519 = vector.extract_strided_slice %0 {offsets = [0, 17], sizes = [18, 1], strides = [1, 1]} : vector<18x24xf32> to vector<18x1xf32>
    %520 = vector.extract_strided_slice %0 {offsets = [0, 18], sizes = [18, 1], strides = [1, 1]} : vector<18x24xf32> to vector<18x1xf32>
    %521 = vector.extract_strided_slice %0 {offsets = [0, 19], sizes = [18, 1], strides = [1, 1]} : vector<18x24xf32> to vector<18x1xf32>
    %522 = arith.mulf %518, %6 : vector<18x1xf32>
    %523 = vector.extract_strided_slice %2 {offsets = [0, 0], sizes = [1, 64], strides = [1, 1]} : vector<3x64xf32> to vector<1x64xf32>
    %524 = vector.broadcast %522 : vector<18x1xf32> to vector<18x64xf32>
    %525 = vector.broadcast %523 : vector<1x64xf32> to vector<18x64xf32>
    %526 = arith.mulf %524, %525 : vector<18x64xf32>
    %527 = arith.mulf %519, %7 : vector<18x1xf32>
    %528 = vector.extract_strided_slice %2 {offsets = [1, 0], sizes = [1, 64], strides = [1, 1]} : vector<3x64xf32> to vector<1x64xf32>
    %529 = vector.broadcast %527 : vector<18x1xf32> to vector<18x64xf32>
    %530 = vector.broadcast %528 : vector<1x64xf32> to vector<18x64xf32>
    %531 = arith.mulf %529, %530 : vector<18x64xf32>
    %532 = arith.addf %526, %531 : vector<18x64xf32>
    %533 = arith.mulf %520, %8 : vector<18x1xf32>
    %534 = vector.extract_strided_slice %2 {offsets = [2, 0], sizes = [1, 64], strides = [1, 1]} : vector<3x64xf32> to vector<1x64xf32>
    %535 = vector.broadcast %533 : vector<18x1xf32> to vector<18x64xf32>
    %536 = vector.broadcast %534 : vector<1x64xf32> to vector<18x64xf32>
    %537 = arith.mulf %535, %536 : vector<18x64xf32>
    %538 = arith.addf %532, %537 : vector<18x64xf32>
    %539 = vector.broadcast %23 : vector<18x1xf32> to vector<18x64xf32>
    %540 = arith.mulf %538, %539 : vector<18x64xf32>
    %541 = vector.broadcast %3 : vector<1x64xf32> to vector<18x64xf32>
    %542 = vector.broadcast %25 : vector<18x1xf32> to vector<18x64xf32>
    %543 = arith.mulf %541, %542 : vector<18x64xf32>
    %544 = arith.addf %540, %543 : vector<18x64xf32>
    %cst_148 = arith.constant 0.000000e+00 : f32
    %545 = vector.broadcast %cst_148 : f32 to vector<18x64xf32>
    %546 = arith.maximumf %544, %545 : vector<18x64xf32>
    %547 = vector.extract_strided_slice %520 {offsets = [0, 0], sizes = [17, 1], strides = [1, 1]} : vector<18x1xf32> to vector<17x1xf32>
    %548 = vector.extract_strided_slice %8 {offsets = [0, 0], sizes = [17, 1], strides = [1, 1]} : vector<18x1xf32> to vector<17x1xf32>
    %549 = arith.mulf %547, %548 : vector<17x1xf32>
    %550 = vector.extract_strided_slice %2 {offsets = [0, 0], sizes = [1, 64], strides = [1, 1]} : vector<3x64xf32> to vector<1x64xf32>
    %551 = vector.broadcast %549 : vector<17x1xf32> to vector<17x64xf32>
    %552 = vector.broadcast %550 : vector<1x64xf32> to vector<17x64xf32>
    %553 = arith.mulf %551, %552 : vector<17x64xf32>
    %554 = vector.extract_strided_slice %521 {offsets = [0, 0], sizes = [17, 1], strides = [1, 1]} : vector<18x1xf32> to vector<17x1xf32>
    %555 = vector.extract_strided_slice %9 {offsets = [0, 0], sizes = [17, 1], strides = [1, 1]} : vector<18x1xf32> to vector<17x1xf32>
    %556 = arith.mulf %554, %555 : vector<17x1xf32>
    %557 = vector.extract_strided_slice %2 {offsets = [1, 0], sizes = [1, 64], strides = [1, 1]} : vector<3x64xf32> to vector<1x64xf32>
    %558 = vector.broadcast %556 : vector<17x1xf32> to vector<17x64xf32>
    %559 = vector.broadcast %557 : vector<1x64xf32> to vector<17x64xf32>
    %560 = arith.mulf %558, %559 : vector<17x64xf32>
    %561 = arith.addf %553, %560 : vector<17x64xf32>
    %562 = vector.extract_strided_slice %518 {offsets = [1, 0], sizes = [17, 1], strides = [1, 1]} : vector<18x1xf32> to vector<17x1xf32>
    %563 = vector.extract_strided_slice %6 {offsets = [1, 0], sizes = [17, 1], strides = [1, 1]} : vector<18x1xf32> to vector<17x1xf32>
    %564 = arith.mulf %562, %563 : vector<17x1xf32>
    %565 = vector.extract_strided_slice %2 {offsets = [2, 0], sizes = [1, 64], strides = [1, 1]} : vector<3x64xf32> to vector<1x64xf32>
    %566 = vector.broadcast %564 : vector<17x1xf32> to vector<17x64xf32>
    %567 = vector.broadcast %565 : vector<1x64xf32> to vector<17x64xf32>
    %568 = arith.mulf %566, %567 : vector<17x64xf32>
    %569 = arith.addf %561, %568 : vector<17x64xf32>
    %570 = vector.broadcast %32 : vector<17x1xf32> to vector<17x64xf32>
    %571 = arith.mulf %569, %570 : vector<17x64xf32>
    %572 = vector.broadcast %3 : vector<1x64xf32> to vector<17x64xf32>
    %573 = vector.broadcast %34 : vector<17x1xf32> to vector<17x64xf32>
    %574 = arith.mulf %572, %573 : vector<17x64xf32>
    %575 = arith.addf %571, %574 : vector<17x64xf32>
    %cst_149 = arith.constant 0.000000e+00 : f32
    %576 = vector.broadcast %cst_149 : f32 to vector<17x64xf32>
    %577 = arith.maximumf %575, %576 : vector<17x64xf32>
    %578 = vector.extract_strided_slice %546 {offsets = [0, 0], sizes = [17, 64], strides = [1, 1]} : vector<18x64xf32> to vector<17x64xf32>
    %579 = vector.extract_strided_slice %546 {offsets = [1, 0], sizes = [17, 64], strides = [1, 1]} : vector<18x64xf32> to vector<17x64xf32>
    %580 = tpu.concatenate %578, %577, %579 in 1 : vector<17x64xf32>, vector<17x64xf32>, vector<17x64xf32> -> vector<17x192xf32>
    %cst_150 = arith.constant dense<0.000000e+00> : vector<17x32xf32>
    %581 = tpu.matmul %580, %4, %cst_150 {dimension_numbers = #tpu.dot_dimension_numbers<[1], [1], [0], [0], [0, 0, 1, 0], [], []>} : vector<17x192xf32>, vector<32x192xf32>, vector<17x32xf32> -> vector<17x32xf32>
    %582 = vector.broadcast %47 : vector<17x1xf32> to vector<17x32xf32>
    %583 = arith.mulf %581, %582 : vector<17x32xf32>
    %584 = vector.broadcast %5 : vector<1x32xf32> to vector<17x32xf32>
    %585 = vector.broadcast %49 : vector<17x1xf32> to vector<17x32xf32>
    %586 = arith.mulf %584, %585 : vector<17x32xf32>
    %587 = arith.addf %583, %586 : vector<17x32xf32>
    %cst_151 = arith.constant 0.000000e+00 : f32
    %588 = vector.broadcast %cst_151 : f32 to vector<17x32xf32>
    %589 = arith.maximumf %587, %588 : vector<17x32xf32>
    %590 = vector.extract_strided_slice %589 {offsets = [0, 0], sizes = [1, 32], strides = [1, 1]} : vector<17x32xf32> to vector<1x32xf32>
    %c0_152 = arith.constant 0 : index
    %c1088 = arith.constant 1088 : index
    %591 = vector.load %arg11[%c0_152, %c1088] : memref<2x1632xf32, #tpu.memory_space<vmem>>, vector<1x32xf32>
    tpu.vector_store %arg11[%c0_152, %c1088], %590 {strides = array<i32>} : memref<2x1632xf32, #tpu.memory_space<vmem>>, vector<1x32xf32>,
    %592 = vector.extract_strided_slice %589 {offsets = [1, 0], sizes = [1, 32], strides = [1, 1]} : vector<17x32xf32> to vector<1x32xf32>
    %c0_153 = arith.constant 0 : index
    %c1120 = arith.constant 1120 : index
    %593 = vector.load %arg11[%c0_153, %c1120] : memref<2x1632xf32, #tpu.memory_space<vmem>>, vector<1x32xf32>
    tpu.vector_store %arg11[%c0_153, %c1120], %592 {strides = array<i32>} : memref<2x1632xf32, #tpu.memory_space<vmem>>, vector<1x32xf32>,
    %594 = vector.extract_strided_slice %589 {offsets = [2, 0], sizes = [1, 32], strides = [1, 1]} : vector<17x32xf32> to vector<1x32xf32>
    %c0_154 = arith.constant 0 : index
    %c1152 = arith.constant 1152 : index
    %595 = vector.load %arg11[%c0_154, %c1152] : memref<2x1632xf32, #tpu.memory_space<vmem>>, vector<1x32xf32>
    tpu.vector_store %arg11[%c0_154, %c1152], %594 {strides = array<i32>} : memref<2x1632xf32, #tpu.memory_space<vmem>>, vector<1x32xf32>,
    %596 = vector.extract_strided_slice %589 {offsets = [3, 0], sizes = [1, 32], strides = [1, 1]} : vector<17x32xf32> to vector<1x32xf32>
    %c0_155 = arith.constant 0 : index
    %c1184 = arith.constant 1184 : index
    %597 = vector.load %arg11[%c0_155, %c1184] : memref<2x1632xf32, #tpu.memory_space<vmem>>, vector<1x32xf32>
    tpu.vector_store %arg11[%c0_155, %c1184], %596 {strides = array<i32>} : memref<2x1632xf32, #tpu.memory_space<vmem>>, vector<1x32xf32>,
    %598 = vector.extract_strided_slice %589 {offsets = [4, 0], sizes = [1, 32], strides = [1, 1]} : vector<17x32xf32> to vector<1x32xf32>
    %c0_156 = arith.constant 0 : index
    %c1216 = arith.constant 1216 : index
    %599 = vector.load %arg11[%c0_156, %c1216] : memref<2x1632xf32, #tpu.memory_space<vmem>>, vector<1x32xf32>
    tpu.vector_store %arg11[%c0_156, %c1216], %598 {strides = array<i32>} : memref<2x1632xf32, #tpu.memory_space<vmem>>, vector<1x32xf32>,
    %600 = vector.extract_strided_slice %589 {offsets = [5, 0], sizes = [1, 32], strides = [1, 1]} : vector<17x32xf32> to vector<1x32xf32>
    %c0_157 = arith.constant 0 : index
    %c1248 = arith.constant 1248 : index
    %601 = vector.load %arg11[%c0_157, %c1248] : memref<2x1632xf32, #tpu.memory_space<vmem>>, vector<1x32xf32>
    tpu.vector_store %arg11[%c0_157, %c1248], %600 {strides = array<i32>} : memref<2x1632xf32, #tpu.memory_space<vmem>>, vector<1x32xf32>,
    %602 = vector.extract_strided_slice %589 {offsets = [6, 0], sizes = [1, 32], strides = [1, 1]} : vector<17x32xf32> to vector<1x32xf32>
    %c0_158 = arith.constant 0 : index
    %c1280 = arith.constant 1280 : index
    %603 = vector.load %arg11[%c0_158, %c1280] : memref<2x1632xf32, #tpu.memory_space<vmem>>, vector<1x32xf32>
    tpu.vector_store %arg11[%c0_158, %c1280], %602 {strides = array<i32>} : memref<2x1632xf32, #tpu.memory_space<vmem>>, vector<1x32xf32>,
    %604 = vector.extract_strided_slice %589 {offsets = [7, 0], sizes = [1, 32], strides = [1, 1]} : vector<17x32xf32> to vector<1x32xf32>
    %c0_159 = arith.constant 0 : index
    %c1312 = arith.constant 1312 : index
    %605 = vector.load %arg11[%c0_159, %c1312] : memref<2x1632xf32, #tpu.memory_space<vmem>>, vector<1x32xf32>
    tpu.vector_store %arg11[%c0_159, %c1312], %604 {strides = array<i32>} : memref<2x1632xf32, #tpu.memory_space<vmem>>, vector<1x32xf32>,
    %606 = vector.extract_strided_slice %589 {offsets = [8, 0], sizes = [1, 32], strides = [1, 1]} : vector<17x32xf32> to vector<1x32xf32>
    %c0_160 = arith.constant 0 : index
    %c1344 = arith.constant 1344 : index
    %607 = vector.load %arg11[%c0_160, %c1344] : memref<2x1632xf32, #tpu.memory_space<vmem>>, vector<1x32xf32>
    tpu.vector_store %arg11[%c0_160, %c1344], %606 {strides = array<i32>} : memref<2x1632xf32, #tpu.memory_space<vmem>>, vector<1x32xf32>,
    %608 = vector.extract_strided_slice %589 {offsets = [9, 0], sizes = [1, 32], strides = [1, 1]} : vector<17x32xf32> to vector<1x32xf32>
    %c0_161 = arith.constant 0 : index
    %c1376 = arith.constant 1376 : index
    %609 = vector.load %arg11[%c0_161, %c1376] : memref<2x1632xf32, #tpu.memory_space<vmem>>, vector<1x32xf32>
    tpu.vector_store %arg11[%c0_161, %c1376], %608 {strides = array<i32>} : memref<2x1632xf32, #tpu.memory_space<vmem>>, vector<1x32xf32>,
    %610 = vector.extract_strided_slice %589 {offsets = [10, 0], sizes = [1, 32], strides = [1, 1]} : vector<17x32xf32> to vector<1x32xf32>
    %c0_162 = arith.constant 0 : index
    %c1408 = arith.constant 1408 : index
    %611 = vector.load %arg11[%c0_162, %c1408] : memref<2x1632xf32, #tpu.memory_space<vmem>>, vector<1x32xf32>
    tpu.vector_store %arg11[%c0_162, %c1408], %610 {strides = array<i32>} : memref<2x1632xf32, #tpu.memory_space<vmem>>, vector<1x32xf32>,
    %612 = vector.extract_strided_slice %589 {offsets = [11, 0], sizes = [1, 32], strides = [1, 1]} : vector<17x32xf32> to vector<1x32xf32>
    %c0_163 = arith.constant 0 : index
    %c1440 = arith.constant 1440 : index
    %613 = vector.load %arg11[%c0_163, %c1440] : memref<2x1632xf32, #tpu.memory_space<vmem>>, vector<1x32xf32>
    tpu.vector_store %arg11[%c0_163, %c1440], %612 {strides = array<i32>} : memref<2x1632xf32, #tpu.memory_space<vmem>>, vector<1x32xf32>,
    %614 = vector.extract_strided_slice %589 {offsets = [12, 0], sizes = [1, 32], strides = [1, 1]} : vector<17x32xf32> to vector<1x32xf32>
    %c0_164 = arith.constant 0 : index
    %c1472 = arith.constant 1472 : index
    %615 = vector.load %arg11[%c0_164, %c1472] : memref<2x1632xf32, #tpu.memory_space<vmem>>, vector<1x32xf32>
    tpu.vector_store %arg11[%c0_164, %c1472], %614 {strides = array<i32>} : memref<2x1632xf32, #tpu.memory_space<vmem>>, vector<1x32xf32>,
    %616 = vector.extract_strided_slice %589 {offsets = [13, 0], sizes = [1, 32], strides = [1, 1]} : vector<17x32xf32> to vector<1x32xf32>
    %c0_165 = arith.constant 0 : index
    %c1504 = arith.constant 1504 : index
    %617 = vector.load %arg11[%c0_165, %c1504] : memref<2x1632xf32, #tpu.memory_space<vmem>>, vector<1x32xf32>
    tpu.vector_store %arg11[%c0_165, %c1504], %616 {strides = array<i32>} : memref<2x1632xf32, #tpu.memory_space<vmem>>, vector<1x32xf32>,
    %618 = vector.extract_strided_slice %589 {offsets = [14, 0], sizes = [1, 32], strides = [1, 1]} : vector<17x32xf32> to vector<1x32xf32>
    %c0_166 = arith.constant 0 : index
    %c1536 = arith.constant 1536 : index
    %619 = vector.load %arg11[%c0_166, %c1536] : memref<2x1632xf32, #tpu.memory_space<vmem>>, vector<1x32xf32>
    tpu.vector_store %arg11[%c0_166, %c1536], %618 {strides = array<i32>} : memref<2x1632xf32, #tpu.memory_space<vmem>>, vector<1x32xf32>,
    %620 = vector.extract_strided_slice %589 {offsets = [15, 0], sizes = [1, 32], strides = [1, 1]} : vector<17x32xf32> to vector<1x32xf32>
    %c0_167 = arith.constant 0 : index
    %c1568 = arith.constant 1568 : index
    %621 = vector.load %arg11[%c0_167, %c1568] : memref<2x1632xf32, #tpu.memory_space<vmem>>, vector<1x32xf32>
    tpu.vector_store %arg11[%c0_167, %c1568], %620 {strides = array<i32>} : memref<2x1632xf32, #tpu.memory_space<vmem>>, vector<1x32xf32>,
    %622 = vector.extract_strided_slice %589 {offsets = [16, 0], sizes = [1, 32], strides = [1, 1]} : vector<17x32xf32> to vector<1x32xf32>
    %c0_168 = arith.constant 0 : index
    %c1600 = arith.constant 1600 : index
    %623 = vector.load %arg11[%c0_168, %c1600] : memref<2x1632xf32, #tpu.memory_space<vmem>>, vector<1x32xf32>
    tpu.vector_store %arg11[%c0_168, %c1600], %622 {strides = array<i32>} : memref<2x1632xf32, #tpu.memory_space<vmem>>, vector<1x32xf32>,
    %624 = vector.extract_strided_slice %0 {offsets = [0, 20], sizes = [18, 1], strides = [1, 1]} : vector<18x24xf32> to vector<18x1xf32>
    %625 = vector.extract_strided_slice %0 {offsets = [0, 21], sizes = [18, 1], strides = [1, 1]} : vector<18x24xf32> to vector<18x1xf32>
    %626 = vector.extract_strided_slice %0 {offsets = [0, 22], sizes = [18, 1], strides = [1, 1]} : vector<18x24xf32> to vector<18x1xf32>
    %627 = vector.extract_strided_slice %0 {offsets = [0, 23], sizes = [18, 1], strides = [1, 1]} : vector<18x24xf32> to vector<18x1xf32>
    %628 = arith.mulf %624, %50 : vector<18x1xf32>
    %629 = vector.extract_strided_slice %2 {offsets = [0, 0], sizes = [1, 64], strides = [1, 1]} : vector<3x64xf32> to vector<1x64xf32>
    %630 = vector.broadcast %628 : vector<18x1xf32> to vector<18x64xf32>
    %631 = vector.broadcast %629 : vector<1x64xf32> to vector<18x64xf32>
    %632 = arith.mulf %630, %631 : vector<18x64xf32>
    %633 = arith.mulf %625, %51 : vector<18x1xf32>
    %634 = vector.extract_strided_slice %2 {offsets = [1, 0], sizes = [1, 64], strides = [1, 1]} : vector<3x64xf32> to vector<1x64xf32>
    %635 = vector.broadcast %633 : vector<18x1xf32> to vector<18x64xf32>
    %636 = vector.broadcast %634 : vector<1x64xf32> to vector<18x64xf32>
    %637 = arith.mulf %635, %636 : vector<18x64xf32>
    %638 = arith.addf %632, %637 : vector<18x64xf32>
    %639 = arith.mulf %626, %52 : vector<18x1xf32>
    %640 = vector.extract_strided_slice %2 {offsets = [2, 0], sizes = [1, 64], strides = [1, 1]} : vector<3x64xf32> to vector<1x64xf32>
    %641 = vector.broadcast %639 : vector<18x1xf32> to vector<18x64xf32>
    %642 = vector.broadcast %640 : vector<1x64xf32> to vector<18x64xf32>
    %643 = arith.mulf %641, %642 : vector<18x64xf32>
    %644 = arith.addf %638, %643 : vector<18x64xf32>
    %645 = vector.broadcast %67 : vector<18x1xf32> to vector<18x64xf32>
    %646 = arith.mulf %644, %645 : vector<18x64xf32>
    %647 = vector.broadcast %3 : vector<1x64xf32> to vector<18x64xf32>
    %648 = vector.broadcast %69 : vector<18x1xf32> to vector<18x64xf32>
    %649 = arith.mulf %647, %648 : vector<18x64xf32>
    %650 = arith.addf %646, %649 : vector<18x64xf32>
    %cst_169 = arith.constant 0.000000e+00 : f32
    %651 = vector.broadcast %cst_169 : f32 to vector<18x64xf32>
    %652 = arith.maximumf %650, %651 : vector<18x64xf32>
    %653 = vector.extract_strided_slice %626 {offsets = [0, 0], sizes = [17, 1], strides = [1, 1]} : vector<18x1xf32> to vector<17x1xf32>
    %654 = vector.extract_strided_slice %52 {offsets = [0, 0], sizes = [17, 1], strides = [1, 1]} : vector<18x1xf32> to vector<17x1xf32>
    %655 = arith.mulf %653, %654 : vector<17x1xf32>
    %656 = vector.extract_strided_slice %2 {offsets = [0, 0], sizes = [1, 64], strides = [1, 1]} : vector<3x64xf32> to vector<1x64xf32>
    %657 = vector.broadcast %655 : vector<17x1xf32> to vector<17x64xf32>
    %658 = vector.broadcast %656 : vector<1x64xf32> to vector<17x64xf32>
    %659 = arith.mulf %657, %658 : vector<17x64xf32>
    %660 = vector.extract_strided_slice %627 {offsets = [0, 0], sizes = [17, 1], strides = [1, 1]} : vector<18x1xf32> to vector<17x1xf32>
    %661 = vector.extract_strided_slice %53 {offsets = [0, 0], sizes = [17, 1], strides = [1, 1]} : vector<18x1xf32> to vector<17x1xf32>
    %662 = arith.mulf %660, %661 : vector<17x1xf32>
    %663 = vector.extract_strided_slice %2 {offsets = [1, 0], sizes = [1, 64], strides = [1, 1]} : vector<3x64xf32> to vector<1x64xf32>
    %664 = vector.broadcast %662 : vector<17x1xf32> to vector<17x64xf32>
    %665 = vector.broadcast %663 : vector<1x64xf32> to vector<17x64xf32>
    %666 = arith.mulf %664, %665 : vector<17x64xf32>
    %667 = arith.addf %659, %666 : vector<17x64xf32>
    %668 = vector.extract_strided_slice %624 {offsets = [1, 0], sizes = [17, 1], strides = [1, 1]} : vector<18x1xf32> to vector<17x1xf32>
    %669 = vector.extract_strided_slice %50 {offsets = [1, 0], sizes = [17, 1], strides = [1, 1]} : vector<18x1xf32> to vector<17x1xf32>
    %670 = arith.mulf %668, %669 : vector<17x1xf32>
    %671 = vector.extract_strided_slice %2 {offsets = [2, 0], sizes = [1, 64], strides = [1, 1]} : vector<3x64xf32> to vector<1x64xf32>
    %672 = vector.broadcast %670 : vector<17x1xf32> to vector<17x64xf32>
    %673 = vector.broadcast %671 : vector<1x64xf32> to vector<17x64xf32>
    %674 = arith.mulf %672, %673 : vector<17x64xf32>
    %675 = arith.addf %667, %674 : vector<17x64xf32>
    %676 = vector.broadcast %76 : vector<17x1xf32> to vector<17x64xf32>
    %677 = arith.mulf %675, %676 : vector<17x64xf32>
    %678 = vector.broadcast %3 : vector<1x64xf32> to vector<17x64xf32>
    %679 = vector.broadcast %78 : vector<17x1xf32> to vector<17x64xf32>
    %680 = arith.mulf %678, %679 : vector<17x64xf32>
    %681 = arith.addf %677, %680 : vector<17x64xf32>
    %cst_170 = arith.constant 0.000000e+00 : f32
    %682 = vector.broadcast %cst_170 : f32 to vector<17x64xf32>
    %683 = arith.maximumf %681, %682 : vector<17x64xf32>
    %684 = vector.extract_strided_slice %652 {offsets = [0, 0], sizes = [17, 64], strides = [1, 1]} : vector<18x64xf32> to vector<17x64xf32>
    %685 = vector.extract_strided_slice %652 {offsets = [1, 0], sizes = [17, 64], strides = [1, 1]} : vector<18x64xf32> to vector<17x64xf32>
    %686 = tpu.concatenate %684, %683, %685 in 1 : vector<17x64xf32>, vector<17x64xf32>, vector<17x64xf32> -> vector<17x192xf32>
    %cst_171 = arith.constant dense<0.000000e+00> : vector<17x32xf32>
    %687 = tpu.matmul %686, %4, %cst_171 {dimension_numbers = #tpu.dot_dimension_numbers<[1], [1], [0], [0], [0, 0, 1, 0], [], []>} : vector<17x192xf32>, vector<32x192xf32>, vector<17x32xf32> -> vector<17x32xf32>
    %688 = vector.broadcast %91 : vector<17x1xf32> to vector<17x32xf32>
    %689 = arith.mulf %687, %688 : vector<17x32xf32>
    %690 = vector.broadcast %5 : vector<1x32xf32> to vector<17x32xf32>
    %691 = vector.broadcast %93 : vector<17x1xf32> to vector<17x32xf32>
    %692 = arith.mulf %690, %691 : vector<17x32xf32>
    %693 = arith.addf %689, %692 : vector<17x32xf32>
    %cst_172 = arith.constant 0.000000e+00 : f32
    %694 = vector.broadcast %cst_172 : f32 to vector<17x32xf32>
    %695 = arith.maximumf %693, %694 : vector<17x32xf32>
    %696 = vector.extract_strided_slice %695 {offsets = [0, 0], sizes = [1, 32], strides = [1, 1]} : vector<17x32xf32> to vector<1x32xf32>
    %c1_173 = arith.constant 1 : index
    %c1088_174 = arith.constant 1088 : index
    %697 = vector.load %arg11[%c1_173, %c1088_174] : memref<2x1632xf32, #tpu.memory_space<vmem>>, vector<1x32xf32>
    tpu.vector_store %arg11[%c1_173, %c1088_174], %696 {strides = array<i32>} : memref<2x1632xf32, #tpu.memory_space<vmem>>, vector<1x32xf32>,
    %698 = vector.extract_strided_slice %695 {offsets = [1, 0], sizes = [1, 32], strides = [1, 1]} : vector<17x32xf32> to vector<1x32xf32>
    %c1_175 = arith.constant 1 : index
    %c1120_176 = arith.constant 1120 : index
    %699 = vector.load %arg11[%c1_175, %c1120_176] : memref<2x1632xf32, #tpu.memory_space<vmem>>, vector<1x32xf32>
    tpu.vector_store %arg11[%c1_175, %c1120_176], %698 {strides = array<i32>} : memref<2x1632xf32, #tpu.memory_space<vmem>>, vector<1x32xf32>,
    %700 = vector.extract_strided_slice %695 {offsets = [2, 0], sizes = [1, 32], strides = [1, 1]} : vector<17x32xf32> to vector<1x32xf32>
    %c1_177 = arith.constant 1 : index
    %c1152_178 = arith.constant 1152 : index
    %701 = vector.load %arg11[%c1_177, %c1152_178] : memref<2x1632xf32, #tpu.memory_space<vmem>>, vector<1x32xf32>
    tpu.vector_store %arg11[%c1_177, %c1152_178], %700 {strides = array<i32>} : memref<2x1632xf32, #tpu.memory_space<vmem>>, vector<1x32xf32>,
    %702 = vector.extract_strided_slice %695 {offsets = [3, 0], sizes = [1, 32], strides = [1, 1]} : vector<17x32xf32> to vector<1x32xf32>
    %c1_179 = arith.constant 1 : index
    %c1184_180 = arith.constant 1184 : index
    %703 = vector.load %arg11[%c1_179, %c1184_180] : memref<2x1632xf32, #tpu.memory_space<vmem>>, vector<1x32xf32>
    tpu.vector_store %arg11[%c1_179, %c1184_180], %702 {strides = array<i32>} : memref<2x1632xf32, #tpu.memory_space<vmem>>, vector<1x32xf32>,
    %704 = vector.extract_strided_slice %695 {offsets = [4, 0], sizes = [1, 32], strides = [1, 1]} : vector<17x32xf32> to vector<1x32xf32>
    %c1_181 = arith.constant 1 : index
    %c1216_182 = arith.constant 1216 : index
    %705 = vector.load %arg11[%c1_181, %c1216_182] : memref<2x1632xf32, #tpu.memory_space<vmem>>, vector<1x32xf32>
    tpu.vector_store %arg11[%c1_181, %c1216_182], %704 {strides = array<i32>} : memref<2x1632xf32, #tpu.memory_space<vmem>>, vector<1x32xf32>,
    %706 = vector.extract_strided_slice %695 {offsets = [5, 0], sizes = [1, 32], strides = [1, 1]} : vector<17x32xf32> to vector<1x32xf32>
    %c1_183 = arith.constant 1 : index
    %c1248_184 = arith.constant 1248 : index
    %707 = vector.load %arg11[%c1_183, %c1248_184] : memref<2x1632xf32, #tpu.memory_space<vmem>>, vector<1x32xf32>
    tpu.vector_store %arg11[%c1_183, %c1248_184], %706 {strides = array<i32>} : memref<2x1632xf32, #tpu.memory_space<vmem>>, vector<1x32xf32>,
    %708 = vector.extract_strided_slice %695 {offsets = [6, 0], sizes = [1, 32], strides = [1, 1]} : vector<17x32xf32> to vector<1x32xf32>
    %c1_185 = arith.constant 1 : index
    %c1280_186 = arith.constant 1280 : index
    %709 = vector.load %arg11[%c1_185, %c1280_186] : memref<2x1632xf32, #tpu.memory_space<vmem>>, vector<1x32xf32>
    tpu.vector_store %arg11[%c1_185, %c1280_186], %708 {strides = array<i32>} : memref<2x1632xf32, #tpu.memory_space<vmem>>, vector<1x32xf32>,
    %710 = vector.extract_strided_slice %695 {offsets = [7, 0], sizes = [1, 32], strides = [1, 1]} : vector<17x32xf32> to vector<1x32xf32>
    %c1_187 = arith.constant 1 : index
    %c1312_188 = arith.constant 1312 : index
    %711 = vector.load %arg11[%c1_187, %c1312_188] : memref<2x1632xf32, #tpu.memory_space<vmem>>, vector<1x32xf32>
    tpu.vector_store %arg11[%c1_187, %c1312_188], %710 {strides = array<i32>} : memref<2x1632xf32, #tpu.memory_space<vmem>>, vector<1x32xf32>,
    %712 = vector.extract_strided_slice %695 {offsets = [8, 0], sizes = [1, 32], strides = [1, 1]} : vector<17x32xf32> to vector<1x32xf32>
    %c1_189 = arith.constant 1 : index
    %c1344_190 = arith.constant 1344 : index
    %713 = vector.load %arg11[%c1_189, %c1344_190] : memref<2x1632xf32, #tpu.memory_space<vmem>>, vector<1x32xf32>
    tpu.vector_store %arg11[%c1_189, %c1344_190], %712 {strides = array<i32>} : memref<2x1632xf32, #tpu.memory_space<vmem>>, vector<1x32xf32>,
    %714 = vector.extract_strided_slice %695 {offsets = [9, 0], sizes = [1, 32], strides = [1, 1]} : vector<17x32xf32> to vector<1x32xf32>
    %c1_191 = arith.constant 1 : index
    %c1376_192 = arith.constant 1376 : index
    %715 = vector.load %arg11[%c1_191, %c1376_192] : memref<2x1632xf32, #tpu.memory_space<vmem>>, vector<1x32xf32>
    tpu.vector_store %arg11[%c1_191, %c1376_192], %714 {strides = array<i32>} : memref<2x1632xf32, #tpu.memory_space<vmem>>, vector<1x32xf32>,
    %716 = vector.extract_strided_slice %695 {offsets = [10, 0], sizes = [1, 32], strides = [1, 1]} : vector<17x32xf32> to vector<1x32xf32>
    %c1_193 = arith.constant 1 : index
    %c1408_194 = arith.constant 1408 : index
    %717 = vector.load %arg11[%c1_193, %c1408_194] : memref<2x1632xf32, #tpu.memory_space<vmem>>, vector<1x32xf32>
    tpu.vector_store %arg11[%c1_193, %c1408_194], %716 {strides = array<i32>} : memref<2x1632xf32, #tpu.memory_space<vmem>>, vector<1x32xf32>,
    %718 = vector.extract_strided_slice %695 {offsets = [11, 0], sizes = [1, 32], strides = [1, 1]} : vector<17x32xf32> to vector<1x32xf32>
    %c1_195 = arith.constant 1 : index
    %c1440_196 = arith.constant 1440 : index
    %719 = vector.load %arg11[%c1_195, %c1440_196] : memref<2x1632xf32, #tpu.memory_space<vmem>>, vector<1x32xf32>
    tpu.vector_store %arg11[%c1_195, %c1440_196], %718 {strides = array<i32>} : memref<2x1632xf32, #tpu.memory_space<vmem>>, vector<1x32xf32>,
    %720 = vector.extract_strided_slice %695 {offsets = [12, 0], sizes = [1, 32], strides = [1, 1]} : vector<17x32xf32> to vector<1x32xf32>
    %c1_197 = arith.constant 1 : index
    %c1472_198 = arith.constant 1472 : index
    %721 = vector.load %arg11[%c1_197, %c1472_198] : memref<2x1632xf32, #tpu.memory_space<vmem>>, vector<1x32xf32>
    tpu.vector_store %arg11[%c1_197, %c1472_198], %720 {strides = array<i32>} : memref<2x1632xf32, #tpu.memory_space<vmem>>, vector<1x32xf32>,
    %722 = vector.extract_strided_slice %695 {offsets = [13, 0], sizes = [1, 32], strides = [1, 1]} : vector<17x32xf32> to vector<1x32xf32>
    %c1_199 = arith.constant 1 : index
    %c1504_200 = arith.constant 1504 : index
    %723 = vector.load %arg11[%c1_199, %c1504_200] : memref<2x1632xf32, #tpu.memory_space<vmem>>, vector<1x32xf32>
    tpu.vector_store %arg11[%c1_199, %c1504_200], %722 {strides = array<i32>} : memref<2x1632xf32, #tpu.memory_space<vmem>>, vector<1x32xf32>,
    %724 = vector.extract_strided_slice %695 {offsets = [14, 0], sizes = [1, 32], strides = [1, 1]} : vector<17x32xf32> to vector<1x32xf32>
    %c1_201 = arith.constant 1 : index
    %c1536_202 = arith.constant 1536 : index
    %725 = vector.load %arg11[%c1_201, %c1536_202] : memref<2x1632xf32, #tpu.memory_space<vmem>>, vector<1x32xf32>
    tpu.vector_store %arg11[%c1_201, %c1536_202], %724 {strides = array<i32>} : memref<2x1632xf32, #tpu.memory_space<vmem>>, vector<1x32xf32>,
    %726 = vector.extract_strided_slice %695 {offsets = [15, 0], sizes = [1, 32], strides = [1, 1]} : vector<17x32xf32> to vector<1x32xf32>
    %c1_203 = arith.constant 1 : index
    %c1568_204 = arith.constant 1568 : index
    %727 = vector.load %arg11[%c1_203, %c1568_204] : memref<2x1632xf32, #tpu.memory_space<vmem>>, vector<1x32xf32>
    tpu.vector_store %arg11[%c1_203, %c1568_204], %726 {strides = array<i32>} : memref<2x1632xf32, #tpu.memory_space<vmem>>, vector<1x32xf32>,
    %728 = vector.extract_strided_slice %695 {offsets = [16, 0], sizes = [1, 32], strides = [1, 1]} : vector<17x32xf32> to vector<1x32xf32>
    %c1_205 = arith.constant 1 : index
    %c1600_206 = arith.constant 1600 : index
    %729 = vector.load %arg11[%c1_205, %c1600_206] : memref<2x1632xf32, #tpu.memory_space<vmem>>, vector<1x32xf32>
    tpu.vector_store %arg11[%c1_205, %c1600_206], %728 {strides = array<i32>} : memref<2x1632xf32, #tpu.memory_space<vmem>>, vector<1x32xf32>,
    %c0_207 = arith.constant 0 : index
    %c0_208 = arith.constant 0 : index
    %730 = vector.load %arg11[%c0_207, %c0_208] : memref<2x1632xf32, #tpu.memory_space<vmem>>, vector<2x1632xf32>
    %c0_209 = arith.constant 0 : index
    %c0_210 = arith.constant 0 : index
    %731 = vector.load %arg6[%c0_209, %c0_210] : memref<32x1632xf32, #tpu.memory_space<vmem>>, vector<32x1632xf32>
    %cst_211 = arith.constant dense<0.000000e+00> : vector<2x32xf32>
    %732 = tpu.matmul %730, %731, %cst_211 {dimension_numbers = #tpu.dot_dimension_numbers<[1], [1], [0], [0], [0, 0, 1, 0], [], []>} : vector<2x1632xf32>, vector<32x1632xf32>, vector<2x32xf32> -> vector<2x32xf32>
    %c0_212 = arith.constant 0 : index
    %c0_213 = arith.constant 0 : index
    %733 = vector.load %arg7[%c0_212, %c0_213] : memref<1x32xf32, #tpu.memory_space<vmem>>, vector<1x32xf32>
    %734 = vector.broadcast %733 : vector<1x32xf32> to vector<2x32xf32>
    %735 = arith.addf %732, %734 : vector<2x32xf32>
    %736 = math.tanh %735 : vector<2x32xf32>
    %c0_214 = arith.constant 0 : index
    %c0_215 = arith.constant 0 : index
    %737 = vector.load %arg8[%c0_214, %c0_215] : memref<32x16xf32, #tpu.memory_space<vmem>>, vector<32x16xf32>
    %cst_216 = arith.constant dense<0.000000e+00> : vector<2x16xf32>
    %738 = tpu.matmul %736, %737, %cst_216 {dimension_numbers = #tpu.dot_dimension_numbers<[1], [0], [0], [1], [0, 0, 1, 1], [], []>} : vector<2x32xf32>, vector<32x16xf32>, vector<2x16xf32> -> vector<2x16xf32>
    %c0_217 = arith.constant 0 : index
    %c0_218 = arith.constant 0 : index
    %739 = vector.load %arg9[%c0_217, %c0_218] : memref<1x16xf32, #tpu.memory_space<vmem>>, vector<1x16xf32>
    %740 = vector.broadcast %739 : vector<1x16xf32> to vector<2x16xf32>
    %741 = arith.addf %738, %740 : vector<2x16xf32>
    %c0_219 = arith.constant 0 : index
    %c0_220 = arith.constant 0 : index
    %742 = vector.load %arg10[%c0_219, %c0_220] : memref<2x16xf32, #tpu.memory_space<vmem>>, vector<2x16xf32>
    tpu.vector_store %arg10[%c0_219, %c0_220], %741 {strides = array<i32>} : memref<2x16xf32, #tpu.memory_space<vmem>>, vector<2x16xf32>,
    return
  }
}

</mosaic_0001>

<bundles_post_ra>
// kernel: squeeze.1
= control target key start
LH: loop header
LB: loop body
LE: loop exit
PB: predicated region body
PF: predicated region fallthrough
CT: control target
= control target key end

     0   :  { %s166_s8 = smov 124   ;;  %s167_s9 = smov 108   ;;  %vm7_vm0 = vcmask 31744   ;;  %s267_s0 = inlined_call_operand.vmem [shape: f32[2,72], index: 0, kind: input, shape index: {}]   ;;  %s268_s1 = inlined_call_operand.vmem [shape: f32[2,18,4], index: 1, kind: output, shape index: {}]  }
   0x1   :  { %v4_v0 = vld [vmem:[%s267_s0] sm:$0x3]  ;;  %s165_s0 = smov 116   ;;  %s168_s10 = smov 112  }
   0x2   :  { %5 = vst [vmem:[#allocation0] sm:$0x3] %v4_v0  ;;  %s169_s11 = smov 120   ;;  %s52_s12 = smov 3 }
   0x3   :  { %s170_s13 = smov 104   ;;  %s60_s14 = smov 3 }
   0x4   :  { %s171_s15 = smov 96   ;;  %s172_s16 = smov 100  }
   0x5   :  { %s76_s17 = smov 3  ;;  %s68_s18 = smov 3 }
   0x6   :  { %s173_s19 = smov 92   ;;  %s84_s20 = smov 3 }
   0x7   :  { %s174_s21 = smov 84   ;;  %s175_s22 = smov 88  }
   0x8   :  { %s100_s23 = smov 3  ;;  %s92_s24 = smov 3 }
   0x9   :  { %v21_v1 = vld [vmem:[#allocation0] sm:$0x3]   ;;  %s176_s25 = smov 80   ;;  %s108_s26 = smov 3 }
   0xa   :  { %v9_v2 = vld [vmem:[#allocation0] sm:$0x3]   ;;  %22 = vrot.lane.b32.xlu1 %v21_v1, %s165_s0  ;;  %s177_s27 = smov 72   ;;  %s178_s28 = smov 76  }
   0xb   :  { %10 = vrot.lane.b32.xlu0 %v9_v2, %s166_s8  ;;  %v33_v3 = vld [vmem:[#allocation0] sm:$0x3]   ;;  %s124_s29 = smov 3  ;;  %s116_s30 = smov 3 }
   0xc   :  { %34 = vrot.lane.b32.xlu2 %v33_v3, %s167_s9  ;;  %v27_v4 = vld [vmem:[#allocation0] sm:$0x3]   ;;  %s179_s2 = smov 68   ;;  %s180_s3 = smov 60  }
   0xd   :  { %v15_v5 = vld [vmem:[#allocation0] sm:$0x3]   ;;  %s181_s4 = smov 64  }
   0xe   :  { %v39_v6 = vld [vmem:[#allocation0] sm:$0x3]  }
   0xf   :  { %v53_v7 = vld [vmem:[#allocation0 + $0x1] ss:$-1 sm:%s52_s12]  }
  0x10   :  { %v45_v8 = vld [vmem:[#allocation0] sm:$0x3]  }
  0x11   :  { %v61_v9 = vld [vmem:[#allocation0 + $0x1] ss:$-1 sm:%s60_s14]  }
  0x12   :  { %28 = vrot.lane.b32.xlu1 %v27_v4, %s168_s10  ;;  %v77_v10 = vld [vmem:[#allocation0 + $0x1] ss:$-1 sm:%s76_s17]  }
  0x13   :  { %16 = vrot.lane.b32.xlu0 %v15_v5, %s169_s11  ;;  %v69_v11 = vld [vmem:[#allocation0 + $0x1] ss:$-1 sm:%s68_s18]  }
  0x14   :  { %40 = vrot.lane.b32.xlu2 %v39_v6, %s170_s13  ;;  %v85_v12 = vld [vmem:[#allocation0 + $0x1] ss:$-1 sm:%s84_s20]  }
  0x15   :  { %v101_v13 = vld [vmem:[#allocation0 + $0x1] ss:$-1 sm:%s100_s23]  }
  0x16   :  { %v93_v14 = vld [vmem:[#allocation0 + $0x1] ss:$-1 sm:%s92_s24]  }
  0x17   :  { %v109_v15 = vld [vmem:[#allocation0 + $0x1] ss:$-1 sm:%s108_s26]  }
  0x18   :  { %v125_v16 = vld [vmem:[#allocation0 + $0x1] ss:$-1 sm:%s124_s29]  }
  0x19   :  { %v117_v17 = vld [vmem:[#allocation0 + $0x1] ss:$-1 sm:%s116_s30]  }
  0x1a   :  { %54 = vrot.lane.b32.xlu1 %v53_v7, %s171_s15  ;;  %v6_v26 = vld [vmem:[#allocation0] sm:$0x3]  }
  0x1b   :  { %46 = vrot.lane.b32.xlu0 %v45_v8, %s172_s16  ;;  %8 = vst.msk [vmem:[%s268_s1] ss:$24 sm:$0x3] %vm7_vm0, %v6_v26  }
  0x1c   :  { %62 = vrot.lane.b32.xlu2 %v61_v9, %s173_s19 }
  0x22   :  { %78 = vrot.lane.b32.xlu1 %v77_v10, %s174_s21 }
  0x23   :  { %70 = vrot.lane.b32.xlu0 %v69_v11, %s175_s22 }
  0x24   :  { %86 = vrot.lane.b32.xlu2 %v85_v12, %s176_s25 }
  0x2a   :  { %102 = vrot.lane.b32.xlu1 %v101_v13, %s177_s27 }
  0x2b   :  { %94 = vrot.lane.b32.xlu0 %v93_v14, %s178_s28 }
  0x2c   :  { %110 = vrot.lane.b32.xlu2 %v109_v15, %s179_s2 }
  0x32   :  { %126 = vrot.lane.b32.xlu1 %v125_v16, %s180_s3 }
  0x33   :  { %118 = vrot.lane.b32.xlu0 %v117_v17, %s181_s4 }
  0x66   :  { %v35_v18 = vpop.permute.xlu2 %34  }
  0x67   :  { %135 = vst.msk [vmem:[%s268_s1 + $0x5] ss:$24 sm:$0x3] %vm7_vm0, %v35_v18  }
  0x6e   :  { %v41_v19 = vpop.permute.xlu2 %40  }
  0x6f   :  { %136 = vst.msk [vmem:[%s268_s1 + $0x6] ss:$24 sm:$0x3] %vm7_vm0, %v41_v19  }
  0x76   :  { %v63_v20 = vpop.permute.xlu2 %62  }
  0x77   :  { %139 = vst.msk [vmem:[%s268_s1 + $0x21] ss:$-24 sm:$0x3] %vm7_vm0, %v63_v20  }
  0x7c   :  { %v23_v21 = vpop.permute.xlu1 %22  }
  0x7d   :  { %v11_v22 = vpop.permute.xlu0 %10   ;;  %133 = vst.msk [vmem:[%s268_s1 + $0x3] ss:$24 sm:$0x3] %vm7_vm0, %v23_v21  }
  0x7e   :  { %131 = vst.msk [vmem:[%s268_s1 + $0x1] ss:$24 sm:$0x3] %vm7_vm0, %v11_v22   ;;  %v87_v23 = vpop.permute.xlu2 %86  }
  0x7f   :  { %142 = vst.msk [vmem:[%s268_s1 + $0x24] ss:$-24 sm:$0x3] %vm7_vm0, %v87_v23  }
  0x84   :  { %v29_v24 = vpop.permute.xlu1 %28  }
  0x85   :  { %v17_v25 = vpop.permute.xlu0 %16   ;;  %134 = vst.msk [vmem:[%s268_s1 + $0x4] ss:$24 sm:$0x3] %vm7_vm0, %v29_v24  }
  0x86   :  { %132 = vst.msk [vmem:[%s268_s1 + $0x2] ss:$24 sm:$0x3] %vm7_vm0, %v17_v25   ;;  %v111_v27 = vpop.permute.xlu2 %110  }
  0x87   :  { %145 = vst.msk [vmem:[%s268_s1 + $0x27] ss:$-24 sm:$0x3] %vm7_vm0, %v111_v27  }
  0x8c   :  { %v55_v28 = vpop.permute.xlu1 %54  }
  0x8d   :  { %v47_v29 = vpop.permute.xlu0 %46   ;;  %138 = vst.msk [vmem:[%s268_s1 + $0x20] ss:$-24 sm:$0x3] %vm7_vm0, %v55_v28  }
  0x8e   :  { %137 = vst.msk [vmem:[%s268_s1 + $0x7] ss:$24 sm:$0x3] %vm7_vm0, %v47_v29  }
  0x94   :  { %v79_v30 = vpop.permute.xlu1 %78  }
  0x95   :  { %v71_v31 = vpop.permute.xlu0 %70   ;;  %141 = vst.msk [vmem:[%s268_s1 + $0x23] ss:$-24 sm:$0x3] %vm7_vm0, %v79_v30  }
  0x96   :  { %140 = vst.msk [vmem:[%s268_s1 + $0x22] ss:$-24 sm:$0x3] %vm7_vm0, %v71_v31  }
  0x9c   :  { %v103_v32 = vpop.permute.xlu1 %102  }
  0x9d   :  { %v95_v33 = vpop.permute.xlu0 %94   ;;  %144 = vst.msk [vmem:[%s268_s1 + $0x26] ss:$-24 sm:$0x3] %vm7_vm0, %v103_v32  }
  0x9e   :  { %143 = vst.msk [vmem:[%s268_s1 + $0x25] ss:$-24 sm:$0x3] %vm7_vm0, %v95_v33  }
  0xa4   :  { %v127_v34 = vpop.permute.xlu1 %126  }
  0xa5   :  { %v119_v35 = vpop.permute.xlu0 %118   ;;  %147 = vst.msk [vmem:[%s268_s1 + $0x29] ss:$-24 sm:$0x3] %vm7_vm0, %v127_v34  }
  0xa6   :  { %146 = vst.msk [vmem:[%s268_s1 + $0x28] ss:$-24 sm:$0x3] %vm7_vm0, %v119_v35  }

// kernel: encoder_forward.1
= control target key start
LH: loop header
LB: loop body
LE: loop exit
PB: predicated region body
PF: predicated region fallthrough
CT: control target
= control target key end

     0   :  { %v5070_v2 = vmov 0   ;;  %s3110_s17 = smov 127   ;;  %s3111_s20 = smov 126   ;;  %vm79_vm0 = vcmask 1046528   ;;  %v5075_v13 = vmov 3   ;;  %v3114_v14 = vmov 1   ;;  %s5055_s1 = inlined_call_operand.vmem [shape: f32[18,8], index: 1, kind: input, shape index: {}]   ;;  %s5056_s0 = inlined_call_operand.vmem [shape: f32[18,24], index: 0, kind: input, shape index: {}]   ;;  %s5057_s3 = inlined_call_operand.vmem [shape: f32[1,64], index: 3, kind: input, shape index: {}]   ;;  %s5058_s2 = inlined_call_operand.vmem [shape: f32[3,64], index: 2, kind: input, shape index: {}]   ;;  %s5059_s4 = inlined_call_operand.vmem [shape: f32[32,192], index: 4, kind: input, shape index: {}]   ;;  %s5060_s5 = inlined_call_operand.vmem [shape: f32[1,32], index: 5, kind: input, shape index: {}]   ;;  %s5061_s6 = inlined_call_operand.vmem [shape: f32[32,1632], index: 6, kind: input, shape index: {}]   ;;  %s5062_s7 = inlined_call_operand.vmem [shape: f32[1,32], index: 7, kind: input, shape index: {}]   ;;  %s5063_s9 = inlined_call_operand.vmem [shape: f32[1,16], index: 9, kind: input, shape index: {}]   ;;  %s5064_s8 = inlined_call_operand.vmem [shape: f32[32,16], index: 8, kind: input, shape index: {}]   ;;  %s5065_s10 = inlined_call_operand.vmem [shape: f32[2,16], index: 10, kind: output, shape index: {}]  }
   0x1   :  { %v3200_v0 = vld [vmem:[%s5055_s1 + $0x8] sm:$0xff]  ;;  %v3205_v1 = vld [vmem:[%s5055_s1 + $0x10] sm:$0x3]  ;;  %2943 = vset.pattern.permute.xlu1 %v5070_v2  ;;  %2942 = vset.pattern.permute.xlu0 %v5070_v2  ;;  %v3213_v3 = vld [vmem:[%s5055_s1] sm:$0xff]  ;;  %s3112_s23 = smov 2   ;;  %v5079_v15 = vmov 2  }
   0x2   :  { %57 = vrot.lane.b32.xlu1 %v3200_v0, %s3110_s17  ;;  %55 = vrot.lane.b32.xlu0 %v3213_v3, %s3110_s17  ;;  %v80_v4 = vrot.slane %v3213_v3, 1  ;;  %v81_v5 = vrot.slane %v3200_v0, 1  ;;  %v83_v6 = vrot.slane %v3205_v1, 1  ;;  %v3230_v9 = vld [vmem:[%s5056_s0 + $0x8] sm:$0xff]  ;;  %v35_v11 = vld [vmem:[%s5056_s0] sm:$0xff]  ;;  %v5073_v27 = vmov 0.0  }
   0x3   :  { %69 = vrot.lane.b32.xlu2 %v3200_v0, %s3111_s20  ;;  %v3236_v10 = vmul.f32 %v3200_v0, %v3230_v9  ;;  %v3242_v12 = vmul.f32 %v3213_v3, %v35_v11  ;;  %v37_v61 = vld [vmem:[%s5056_s0 + $0x10] sm:$0x3]  ;;  %s3121_s19 = smov 64   ;;  %s3122_s29 = smov 8  }
   0x4   :  { %v82_v7 = vsel %vm79_vm0, %v80_v4, %v81_v5  ;;  %v84_v8 = vsel %vm79_vm0, %v81_v5, %v83_v6  ;;  %2944 = vset.pattern.permute.xlu2 %v5079_v15  ;;  %v3310_v63 = vmul.f32 %v3205_v1, %v37_v61  ;;  %s3131_s21 = smov 16  }
   0xa   :  { %67 = vrot.lane.b32.xlu1 %v3213_v3, %s3111_s20  ;;  %85 = vrot.lane.b32.xlu0 %v82_v7, %s3112_s23 }
   0xb   :  { %87 = vrot.lane.b32.xlu2 %v84_v8, %s3112_s23 }
  0x12   :  { %310 = vperm.xlu1 %2943, %v3236_v10   ;;  %305 = vperm.xlu0 %2942, %v3242_v12  }
  0x13   :  { %342 = vperm.xlu2 %2944, %v3242_v12  }
  0x1a   :  { %2945 = vset.pattern.permute.xlu1 %v5075_v13  ;;  %2946 = vset.pattern.permute.xlu0 %v5079_v15 }
  0x1b   :  { %406 = vperm.xlu1 %2945, %v3242_v12  }
  0x23   :  { %59 = vrot.lane.b32.xlu1 %v3205_v1, %s3110_s17 }
  0x24   :  { %2952 = vset.pattern.permute.xlu1 %v3114_v14 }
  0x2b   :  { %323 = vperm.xlu1 %2952, %v3242_v12  }
  0x33   :  { %2954 = vset.pattern.permute.xlu1 %v5070_v2 }
  0x5d   :  { %v70_v16 = vpop.permute.xlu2 %69 }
  0x65   :  { %v88_v20 = vpop.permute.xlu2 %87 }
  0x74   :  { %v58_v17 = vpop.permute.xlu1 %57  ;;  %v56_v18 = vpop.permute.xlu0 %55 }
  0x75   :  { %v65_v19 = vadd.f32 %v58_v17, %v3200_v0  ;;  %v64_v22 = vadd.f32 %v56_v18, %v3213_v3 }
  0x77   :  { %v3256_v21 = vadd.f32 %v88_v20, %v65_v19  ;;  %v3275_v33 = vadd.f32 %v70_v16, %v65_v19 }
  0x79   :  { %vm155_vm1 = vcmp.gt.f32.partialorder %v3256_v21, 0.0  ;;  %vm98_vm4 = vcmp.gt.f32.partialorder %v3275_v33, 0.0 }
  0x7a   :  { %v3263_v28 = vsel %vm155_vm1, 1.0, %v5073_v27  ;;  %v101_v38 = vsel %vm98_vm4, %v3275_v33, 1.0  ;;  %v3293_v57 = vsel %vm98_vm4, 1.0, %v5073_v27  ;;  %v158_v5 = vsel %vm155_vm1, %v3256_v21, 1.0  ;;  %v41_v21 = vld [vmem:[%s5058_s2] sm:$0x7] }
  0x7b   :  { %v128_v11 = vand.u32 2147483648, %v101_v38  ;;  %vm122_vm14 = vweird.f32 %v101_v38  ;;  %v126_v16 = vand.u32 2147483647, %v101_v38 }
  0x7c   :  { %v68_v23 = vpop.permute.xlu1 %67  ;;  %v86_v25 = vpop.permute.xlu0 %85 }
  0x7d   :  { %v76_v24 = vadd.f32 %v68_v23, %v64_v22  ;;  %v94_v26 = vadd.f32 %v86_v25, %v64_v22  ;;  %v129_v19 = vor.u32 1.1754944e-38, %v128_v11  ;;  %v3417_v11 = vld [vmem:[%s5057_s3] ss:$0 sm:$0xff] }
  0x7f   :  { %vm97_vm2 = vcmp.gt.f32.partialorder %v76_v24, 0.0  ;;  %vm154_vm3 = vcmp.gt.f32.partialorder %v94_v26, 0.0 }
  0x80   :  { %v100_v29 = vsel %vm97_vm2, %v76_v24, 1.0  ;;  %v157_v30 = vsel %vm154_vm3, %v94_v26, 1.0  ;;  %v3269_v31 = vsel %vm154_vm3, 1.0, %v5073_v27  ;;  %v3285_v50 = vsel %vm97_vm2, 1.0, %v5073_v27 }
  0x81   :  { %3081 = vrcp.f32 %v100_v29  ;;  %v3273_v32 = vpack.i.bf16 %v3263_v28, %v3269_v31  ;;  %v114_v41 = vand.u32 2147483648, %v100_v29  ;;  %v112_v43 = vand.u32 2147483647, %v100_v29 }
  0x82   :  { %3083 = vrcp.f32 %v157_v30  ;;  %v171_v44 = vand.u32 2147483648, %v157_v30  ;;  %v169_v46 = vand.u32 2147483647, %v157_v30  ;;  %vm108_vm7 = vweird.f32 %v100_v29 }
  0x83   :  { %2948 = vperm.xlu0 %2946, %v3273_v32   ;;  %3085 = vrcp.f32 %v101_v38  ;;  %v115_v48 = vor.u32 1.1754944e-38, %v114_v41  ;;  %vm165_vm9 = vweird.f32 %v157_v30  ;;  %vm113_vm10 = vcmp.eq.f32.partialorder %v112_v43, 8.507059e+37 }
  0x84   :  { %v172_v52 = vor.u32 1.1754944e-38, %v171_v44  ;;  %vm170_vm12 = vcmp.eq.f32.partialorder %v169_v46, 8.507059e+37  ;;  %v3301_v60 = vpack.i.bf16 %v3293_v57, %v3285_v50  ;;  %3087 = vrcp.f32 %v158_v5 }
  0x85   :  { %v185_v26 = vand.u32 2147483648, %v158_v5  ;;  %v3358_v41 = vperm.slane %v41_v21, 2  ;;  %v3360_v44 = vperm.slane %v41_v21, 0 }
  0x87   :  { %v3082_v34 = vpop.eup %3081 }
  0x88   :  { %v3084_v35 = vpop.eup %3083  ;;  %v104_v36 = vmul.f32 %v3082_v34, %v100_v29  ;;  %vm109_vm5 = vweird.f32 %v3082_v34  ;;  %v183_v29 = vand.u32 2147483647, %v158_v5 }
  0x89   :  { %v161_v37 = vmul.f32 %v3084_v35, %v157_v30  ;;  %vm166_vm6 = vweird.f32 %v3084_v35  ;;  %vm110_vm8 = vmor %vm108_vm7, %vm109_vm5  ;;  %v3086_v58 = vpop.eup %3085  ;;  %vm179_vm5 = vweird.f32 %v158_v5 }
  0x8a   :  { %v105_v39 = vsub.f32 1.0, %v104_v36  ;;  %vm167_vm11 = vmor %vm165_vm9, %vm166_vm6  ;;  %v118_v62 = vmul.f32 %v3086_v58, %v101_v38  ;;  %vm123_vm13 = vweird.f32 %v3086_v58  ;;  %v3088_v17 = vpop.eup %3087  ;;  %vm184_vm7 = vcmp.eq.f32.partialorder %v183_v29, 8.507059e+37  ;;  %v3342_v38 = vpop.permute.xlu1 %310 }
  0x8b   :  { %v162_v40 = vsub.f32 1.0, %v161_v37  ;;  %346 = vperm.xlu0 %2946, %v3236_v10   ;;  %vm124_vm15 = vmor %vm122_vm14, %vm123_vm13  ;;  %v175_v20 = vmul.f32 %v3088_v17, %v158_v5  ;;  %v5077_v36 = vmov 4   ;;  %v5081_v37 = vmov 6  }
  0x8c   :  { %v106_v42 = vmul.f32 %v3082_v34, %v105_v39  ;;  %v119_v4 = vsub.f32 1.0, %v118_v62  ;;  %v3347_v39 = vpop.permute.xlu2 %342  ;;  %v3366_v46 = vmul.f32 %v3358_v41, %v3342_v38  ;;  %v5066_v62 = vmov 7  }
  0x8d   :  { %v163_v45 = vmul.f32 %v3084_v35, %v162_v40  ;;  %v176_v22 = vsub.f32 1.0, %v175_v20  ;;  %v3352_v40 = vld [vmem:[%s5059_s4 + $0x38] sm:$0xff] }
  0x8e   :  { %v107_v47 = vadd.f32 %v3082_v34, %v106_v42  ;;  %v120_v7 = vmul.f32 %v3086_v58, %v119_v4  ;;  %v306_v42 = vpop.permute.xlu0 %305 }
  0x8f   :  { %v164_v49 = vadd.f32 %v3084_v35, %v163_v45  ;;  %v177_v24 = vmul.f32 %v3088_v17, %v176_v22  ;;  %v3362_v45 = vperm.slane %v41_v21, 1  ;;  %v319_v21 = vmul.f32 %v3360_v44, %v306_v42 }
  0x90   :  { %v111_v51 = vsel %vm110_vm8, %v3082_v34, %v107_v47  ;;  %v121_v8 = vadd.f32 %v3086_v58, %v120_v7  ;;  %v186_v34 = vor.u32 1.1754944e-38, %v185_v26  ;;  %v423_v47 = vmul.f32 %v3358_v41, %v306_v42 }
  0x91   :  { %v116_v53 = vsel %vm113_vm10, %v115_v48, %v111_v51  ;;  %v168_v54 = vsel %vm167_vm11, %v3084_v35, %v164_v49  ;;  %v178_v25 = vadd.f32 %v3088_v17, %v177_v24  ;;  %v3372_v48 = vld [vmem:[%s5059_s4 + $0x28] sm:$0xff]  ;;  %v3381_v49 = vld [vmem:[%s5059_s4 + $0x18] sm:$0xff]  ;;  %v354_v42 = vmul.f32 %v3358_v41, %v3347_v39 }
  0x92   :  { %v3288_v55 = vsel %vm97_vm2, %v116_v53, 0.0  ;;  %v173_v56 = vsel %vm170_vm12, %v172_v52, %v168_v54  ;;  %v125_v18 = vsel %vm124_vm15, %v3086_v58, %v121_v8  ;;  %vm127_vm2 = vcmp.eq.f32.partialorder %v126_v16, 8.507059e+37  ;;  %v407_v43 = vpop.permute.xlu1 %406  ;;  %v3396_v58 = vld [vmem:[%s5059_s4 + $0x8] sm:$0xff] }
  0x93   :  { %362 = vperm.xlu1 %2954, %v3288_v55   ;;  %v3297_v59 = vsel %vm154_vm3, %v173_v56, 0.0  ;;  %2956 = vset.pattern.permute.xlu0 %v5070_v2  ;;  %vm180_vm3 = vweird.f32 %v3088_v17  ;;  %v417_v51 = vmul.f32 %v407_v43, %v3362_v45  ;;  %v402_v52 = vmul.f32 %v3347_v39, %v3360_v44 }
  0x94   :  { %442 = vperm.xlu2 %2944, %v3297_v59   ;;  %2958 = vperm.xlu0 %2956, %v3301_v60   ;;  %vm181_vm6 = vmor %vm179_vm5, %vm180_vm3  ;;  %v430_v53 = vrot.slane %v3366_v46, 1  ;;  %v429_v54 = vrot.slane %v423_v47, 1 }
  0x95   :  { %v182_v30 = vsel %vm181_vm6, %v3088_v17, %v178_v25  ;;  %v420_v61 = vadd.f32 %v417_v51, %v402_v52  ;;  %v3120_v25 = vmov 5   ;;  %v320_v52 = vmul.f32 %v3360_v44, %v3342_v38 }
  0x96   :  { %v187_v35 = vsel %vm184_vm7, %v186_v34, %v182_v30  ;;  %v431_v5 = vsel %vm79_vm0, %v429_v54, %v430_v53 }
  0x97   :  { %v3334_v33 = vsel %vm155_vm1, %v187_v35, 0.0  ;;  %vm499_vm1 = vcmask 523264   ;;  %v437_v8 = vadd.f32 %v431_v5, %v420_v61 }
  0x98   :  { %2813 = vmatpush.xpose.msk.msra.mxu1 %vm499_vm1, %v3352_v40  ;;  %2828 = vmatpush.xpose.msk.msra.mxu3 %vm499_vm1, %v3352_v40 }
  0x9a   :  { %v60_v4 = vpop.permute.xlu1 %59 }
  0x9b   :  { %315 = vperm.xlu1 %2954, %v3310_v63   ;;  %v3404_v7 = vadd.f32 %v60_v4, %v3205_v1 }
  0x9c   :  { %71 = vrot.lane.b32.xlu2 %v3205_v1, %s3111_s20  ;;  %2964 = vset.pattern.permute.xlu0 %v3114_v14  ;;  %v3548_v1 = vld [vmem:[%s5059_s4 + $0x20] sm:$0xff] }
  0x9d   :  { %2953 = vset.pattern.permute.xlu2 %v3114_v14  ;;  %331 = vperm.xlu0 %2964, %v3310_v63   ;;  %v130_v14 = vsel %vm127_vm2, %v129_v19, %v125_v18 }
  0x9e   :  { %v3326_v23 = vsel %vm98_vm4, %v130_v14, 0.0  ;;  %2814 = vmatpush.xpose.msk.msra.mxu1 %vm499_vm1, %v3372_v48  ;;  %2829 = vmatpush.xpose.msk.msra.mxu3 %vm499_vm1, %v3372_v48 }
  0xa2   :  { %2815 = vmatpush.xpose.msk.msra.mxu1 %vm499_vm1, %v3381_v49  ;;  %2830 = vmatpush.xpose.msk.msra.mxu3 %vm499_vm1, %v3381_v49  ;;  %v324_v29 = vpop.permute.xlu1 %323 }
  0xa3   :  { %2965 = vset.pattern.permute.xlu1 %v5079_v15  ;;  %v335_v43 = vmul.f32 %v3362_v45, %v324_v29 }
  0xa4   :  { %327 = vperm.xlu2 %2953, %v3236_v10  }
  0xa5   :  { %2969 = vset.pattern.permute.xlu0 %v5066_v62  ;;  %v338_v61 = vadd.f32 %v335_v43, %v319_v21 }
  0xa6   :  { %822 = vperm.xlu0 %2969, %v3242_v12   ;;  %2816 = vmatpush.xpose.msk.msra.mxu1 %vm499_vm1, %v3396_v58 }
  0xa7   :  { %2831 = vmatpush.xpose.msk.msra.mxu3 %vm499_vm1, %v3396_v58 }
  0xaa   :  { %2843 = vmatpush.xpose.msk.msrb.mxu1 %vm499_vm1, %v3352_v40 }
  0xab   :  { %2858 = vmatpush.xpose.msk.msrb.mxu3 %vm499_vm1, %v3352_v40 }
  0xac   :  { %2955 = vset.pattern.permute.xlu2 %v5070_v2 }
  0xad   :  { %367 = vperm.xlu2 %2955, %v3326_v23  }
  0xae   :  { %2844 = vmatpush.xpose.msk.msrb.mxu1 %vm499_vm1, %v3372_v48  ;;  %2985 = vset.pattern.permute.xlu0 %v3120_v25 }
  0xaf   :  { %2859 = vmatpush.xpose.msk.msrb.mxu3 %vm499_vm1, %v3372_v48 }
  0xb2   :  { %2845 = vmatpush.xpose.msk.msrb.mxu1 %vm499_vm1, %v3381_v49 }
  0xb3   :  { %2860 = vmatpush.xpose.msk.msrb.mxu3 %vm499_vm1, %v3381_v49 }
  0xb5   :  { %2962 = vset.pattern.permute.xlu2 %v5075_v13 }
  0xb6   :  { %410 = vperm.xlu2 %2962, %v3236_v10   ;;  %2846 = vmatpush.xpose.msk.msrb.mxu1 %vm499_vm1, %v3396_v58 }
  0xb7   :  { %2861 = vmatpush.xpose.msk.msrb.mxu3 %vm499_vm1, %v3396_v58 }
  0xbe   :  { %2963 = vset.pattern.permute.xlu2 %v5079_v15 }
  0xbf   :  { %447 = vperm.xlu2 %2963, %v3334_v33  }
  0xc7   :  { %2966 = vset.pattern.permute.xlu2 %v5077_v36 }
  0xc8   :  { %732 = vperm.xlu2 %2966, %v3242_v12  }
  0xd0   :  { %2968 = vset.pattern.permute.xlu2 %v5081_v37 }
  0xd1   :  { %765 = vperm.xlu2 %2968, %v3242_v12  }
  0xd9   :  { %2971 = vset.pattern.permute.xlu2 %v5070_v2 }
  0xee   :  { %v3387_v56 = vpop.permute.xlu2 %442 }
  0xef   :  { %v455_v20 = vmul.f32 %v3387_v56, %v437_v8 }
  0xf5   :  { %v3419_v17 = vpop.permute.xlu0 %2948 }
  0xf6   :  { %v72_v16 = vpop.permute.xlu2 %71  ;;  %v2950_v19 = vunpack.i.l.bf16 %v3419_v17 }
  0xf7   :  { %v3422_v18 = vadd.f32 %v72_v16, %v3404_v7 }
  0xf8   :  { %v3432_v14 = vmul.f32 %v3417_v11, %v2950_v19  ;;  %v357_v19 = vadd.f32 %v354_v42, %v338_v61 }
  0xf9   :  { %vm99_vm4 = vcmp.gt.f32.partialorder %v3422_v18, 0.0 }
  0xfa   :  { %v3437_v22 = vsel %vm99_vm4, %v3422_v18, 1.0  ;;  %v3442_v24 = vsel %vm99_vm4, 1.0, %v5073_v27  ;;  %v473_v26 = vadd.f32 %v3432_v14, %v455_v20 }
  0xfb   :  { %5130 = vst [vmem:[#allocation3_spill] sm:$0xff] %v3442_v24  ;;  %3089 = vrcp.f32 %v3437_v22  ;;  %390 = vperm.xlu2 %2971, %v3442_v24   ;;  %vm136_vm8 = vweird.f32 %v3437_v22 }
  0xfc   :  { %v476_v30 = vmax.f32 %v473_v26, 0.0 }
  0xfd   :  { %v3452_v35 = vpop.permute.xlu0 %346 }
  0xfe   :  { %v328_v34 = vpop.permute.xlu2 %327  ;;  %482 = vrot.lane.b32.xlu1 %v476_v30, %s3121_s19  ;;  %v355_v8 = vmul.f32 %v3358_v41, %v3452_v35 }
  0xff   :  { %v336_v47 = vmul.f32 %v3362_v45, %v328_v34 }
 0x101   :  { %v3090_v51 = vpop.eup %3089  ;;  %v339_v4 = vadd.f32 %v336_v47, %v320_v52 }
 0x102   :  { %v132_v54 = vmul.f32 %v3090_v51, %v3437_v22  ;;  %vm137_vm9 = vweird.f32 %v3090_v51 }
 0x103   :  { %2973 = vset.pattern.permute.xlu2 %v5081_v37  ;;  %v358_v26 = vadd.f32 %v355_v8, %v339_v4  ;;  %v140_v8 = vand.u32 2147483647, %v3437_v22  ;;  %vm138_vm10 = vmor %vm136_vm8, %vm137_vm9 }
 0x104   :  { %872 = vperm.xlu2 %2973, %v3269_v31   ;;  %v133_v5 = vsub.f32 1.0, %v132_v54  ;;  %v142_v54 = vand.u32 2147483648, %v3437_v22 }
 0x105   :  { %v3471_v16 = vpop.permute.xlu1 %362  ;;  %vm141_vm11 = vcmp.eq.f32.partialorder %v140_v8, 8.507059e+37 }
 0x106   :  { %v2959_v38 = vpop.permute.xlu0 %2958  ;;  %350 = vperm.xlu1 %2965, %v3310_v63   ;;  %v375_v30 = vmul.f32 %v3471_v16, %v357_v19  ;;  %v134_v43 = vmul.f32 %v3090_v51, %v133_v5  ;;  %v143_v19 = vor.u32 1.1754944e-38, %v142_v54 }
 0x107   :  { %v3473_v20 = vpop.permute.xlu2 %367  ;;  %v2961_v39 = vunpack.i.h.bf16 %v2959_v38  ;;  %v2960_v29 = vunpack.i.l.bf16 %v2959_v38 }
 0x108   :  { %v376_v34 = vmul.f32 %v3473_v20, %v358_v26  ;;  %v135_v4 = vadd.f32 %v3090_v51, %v134_v43 }
 0x109   :  { %v3479_v31 = vmul.f32 %v3417_v11, %v2961_v39  ;;  %v3482_v21 = vmul.f32 %v3417_v11, %v2960_v29 }
 0x10a   :  { %v139_v26 = vsel %vm138_vm10, %v3090_v51, %v135_v4 }
 0x10b   :  { %v3486_v47 = vadd.f32 %v3482_v21, %v375_v30  ;;  %v3489_v52 = vadd.f32 %v3479_v31, %v376_v34  ;;  %v144_v39 = vsel %vm141_vm11, %v143_v19, %v139_v26  ;;  %v403_v26 = vmul.f32 %v3452_v35, %v3360_v44 }
 0x10c   :  { %2984 = vset.pattern.permute.xlu2 %v3120_v25  ;;  %v147_v22 = vsel %vm99_vm4, %v144_v39, 0.0 }
 0x10d   :  { %747 = vperm.xlu2 %2984, %v3242_v12   ;;  %v399_v42 = vmax.f32 %v3486_v47, 0.0  ;;  %v5069_v61 = vmax.f32 %v3489_v52, 0.0 }
 0x10e   :  { %2967 = vset.pattern.permute.xlu1 %v5077_v36 }
 0x10f   :  { %736 = vperm.xlu1 %2967, %v3236_v10   ;;  %v494_v5 = vrot.slane %v399_v42, 1  ;;  %v3502_v12 = vrot.slane %v5069_v61, 1  ;;  %v332_v29 = vpop.permute.xlu0 %331 }
 0x110   :  { %v337_v54 = vmul.f32 %v3362_v45, %v332_v29 }
 0x111   :  { %v496_v38 = vsel %vm79_vm0, %v494_v5, %v3502_v12 }
 0x112   :  { %2817 = vmatmul.msk.f32.vlgmr.msra.gmra.mxu1 %vm499_vm1, %v496_v38 }
 0x113   :  { %2873 = vmatpush.xpose.msk.msra.mxu1 %vm499_vm1, %v3352_v40 }
 0x115   :  { %2986 = vset.pattern.permute.xlu2 %v5081_v37 }
 0x116   :  { %769 = vperm.xlu2 %2986, %v3236_v10  }
 0x117   :  { %2970 = vset.pattern.permute.xlu1 %v5070_v2  ;;  %2874 = vmatpush.xpose.msk.msra.mxu1 %vm499_vm1, %v3372_v48 }
 0x118   :  { %372 = vperm.xlu1 %2970, %v147_v22   ;;  %v823_v19 = vpop.permute.xlu0 %822 }
 0x11b   :  { %2875 = vmatpush.xpose.msk.msra.mxu1 %vm499_vm1, %v3381_v49 }
 0x11e   :  { %2988 = vset.pattern.permute.xlu2 %v5077_v36 }
 0x11f   :  { %787 = vperm.xlu2 %2988, %v3326_v23   ;;  %2876 = vmatpush.xpose.msk.msra.mxu1 %vm499_vm1, %v3396_v58 }
 0x120   :  { %2972 = vset.pattern.permute.xlu1 %v5081_v37 }
 0x121   :  { %857 = vperm.xlu1 %2972, %v3297_v59  }
 0x127   :  { %2995 = vset.pattern.permute.xlu2 %v5066_v62 }
 0x128   :  { %826 = vperm.xlu2 %2995, %v3236_v10  }
 0x129   :  { %2980 = vrot.lane.b32.xlu1 %v3273_v32, %s3111_s20  ;;  %v3541_v32 = vld [vmem:[%s5059_s4 + $0x30] sm:$0xff] }
 0x12a   :  { %2987 = vset.pattern.permute.xlu1 %v5077_v36  ;;  %533 = vmatpush.xpose.msra.mxu0 %v3541_v32 }
 0x12b   :  { %933 = vmatpush.xpose.msra.mxu2 %v3541_v32 }
 0x12e   :  { %534 = vmatpush.xpose.msra.mxu0 %v3548_v1 }
 0x12f   :  { %934 = vmatpush.xpose.msra.mxu2 %v3548_v1 }
 0x130   :  { %2997 = vset.pattern.permute.xlu2 %v5081_v37 }
 0x131   :  { %876 = vperm.xlu2 %2997, %v3263_v28   ;;  %89 = vrot.lane.b32.xlu1 %v83_v6, %s3112_s23  ;;  %v3559_v6 = vld [vmem:[%s5059_s4 + $0x10] sm:$0xff]  ;;  %v3566_v28 = vld [vmem:[%s5059_s4] sm:$0xff] }
 0x132   :  { %535 = vmatpush.xpose.msra.mxu0 %v3559_v6 }
 0x133   :  { %935 = vmatpush.xpose.msra.mxu2 %v3559_v6 }
 0x136   :  { %536 = vmatpush.xpose.msra.mxu0 %v3566_v28 }
 0x137   :  { %936 = vmatpush.xpose.msra.mxu2 %v3566_v28 }
 0x139   :  { %2998 = vset.pattern.permute.xlu2 %v3120_v25  ;;  %783 = vperm.xlu1 %2987, %v3288_v55   ;;  %v411_v55 = vpop.permute.xlu2 %410 }
 0x13a   :  { %755 = vperm.xlu2 %2998, %v3310_v63   ;;  %1281 = vmatpush.xpose.msrb.mxu0 %v3541_v32  ;;  %v418_v4 = vmul.f32 %v411_v55, %v3362_v45  ;;  %v833_v55 = vmul.f32 %v823_v19, %v3362_v45  ;;  %v2951_v19 = vunpack.i.h.bf16 %v3419_v17 }
 0x13b   :  { %1593 = vmatpush.xpose.msrb.mxu2 %v3541_v32 }
 0x13e   :  { %1282 = vmatpush.xpose.msrb.mxu0 %v3548_v1 }
 0x13f   :  { %1594 = vmatpush.xpose.msrb.mxu2 %v3548_v1 }
 0x141   :  { %740 = vperm.xlu1 %2987, %v3310_v63   ;;  %v3582_v59 = vpop.permute.xlu2 %447 }
 0x142   :  { %3000 = vset.pattern.permute.xlu2 %v5070_v2  ;;  %1283 = vmatpush.xpose.msrb.mxu0 %v3559_v6  ;;  %5131 = vst [vmem:[#allocation4_spill] sm:$0xff] %v3582_v59 }
 0x143   :  { %1595 = vmatpush.xpose.msrb.mxu2 %v3559_v6 }
 0x146   :  { %1284 = vmatpush.xpose.msrb.mxu0 %v3566_v28 }
 0x147   :  { %1596 = vmatpush.xpose.msrb.mxu2 %v3566_v28 }
 0x149   :  { %2996 = vset.pattern.permute.xlu1 %v5081_v37  ;;  %v3584_v23 = vpop.permute.xlu2 %732 }
 0x14a   :  { %861 = vperm.xlu1 %2996, %v3334_v33   ;;  %v839_v39 = vmul.f32 %v3584_v23, %v3358_v41 }
 0x151   :  { %v3591_v25 = vpop.permute.xlu2 %765 }
 0x152   :  { %1120 = vrot.lane.b32.xlu1 %v3200_v0, %s3122_s29  ;;  %v316_v0 = vpop.permute.xlu1 %315 }
 0x153   :  { %3001 = vset.pattern.permute.xlu1 %v5077_v36  ;;  %v321_v43 = vmul.f32 %v3360_v44, %v316_v0  ;;  %v3601_v47 = vmul.f32 %v3358_v41, %v316_v0  ;;  %v421_v0 = vadd.f32 %v418_v4, %v403_v26  ;;  %v845_v4 = vrot.slane %v839_v39, 1 }
 0x154   :  { %v3643_v39 = vmul.f32 %v3417_v11, %v2951_v19 }
 0x155   :  { %v5067_v5 = vrot.slane %v3601_v47, 1  ;;  %v340_v8 = vadd.f32 %v337_v54, %v321_v43 }
 0x156   :  { %5134 = vst [vmem:[#allocation7_spill] sm:$0xff] %v3643_v39 }
 0x157   :  { %v433_v29 = vsel %vm79_vm0, %v430_v53, %v5067_v5 }
 0x158   :  { %v438_v26 = vadd.f32 %v433_v29, %v421_v0 }
 0x159   :  { %v391_v34 = vpop.permute.xlu2 %390 }
 0x15a   :  { %791 = vperm.xlu1 %3001, %v147_v22   ;;  %v3627_v35 = vmul.f32 %v3417_v11, %v391_v34  ;;  %v456_v34 = vmul.f32 %v3582_v59, %v438_v26 }
 0x15c   :  { %5133 = vst [vmem:[#allocation6_spill] sm:$0xff] %v3627_v35  ;;  %v474_v29 = vadd.f32 %v3643_v39, %v456_v34  ;;  %v5138_v39 = vmov 2  }
 0x15e   :  { %v477_v19 = vmax.f32 %v474_v29, 0.0 }
 0x162   :  { %3005 = vset.pattern.permute.xlu1 %v5070_v2 }
 0x170   :  { %v483_v33 = vpop.permute.xlu1 %482 }
 0x171   :  { %v500_v18 = vsel %vm499_vm1, %v399_v42, %v483_v33  ;;  %v818_v33 = vmul.f32 %v3591_v25, %v3360_v44 }
 0x172   :  { %537 = vmatmul.f32.vlgmr.msra.gmra.mxu0 %v500_v18 }
 0x173   :  { %1920 = vmatpush.xpose.msra.mxu0 %v3541_v32  ;;  %v836_v62 = vadd.f32 %v833_v55, %v818_v33 }
 0x177   :  { %1921 = vmatpush.xpose.msra.mxu0 %v3548_v1 }
 0x178   :  { %v3593_v51 = vpop.permute.xlu1 %350 }
 0x179   :  { %v356_v42 = vmul.f32 %v3358_v41, %v3593_v51 }
 0x17b   :  { %1922 = vmatpush.xpose.msra.mxu0 %v3559_v6  ;;  %v359_v22 = vadd.f32 %v356_v42, %v340_v8  ;;  %v873_v42 = vpop.permute.xlu2 %872 }
 0x17c   :  { %v3650_v0 = vmul.f32 %v3417_v11, %v873_v42 }
 0x17e   :  { %5136 = vst [vmem:[#allocation9_spill] sm:$0xff] %v3650_v0 }
 0x17f   :  { %1923 = vmatpush.xpose.msra.mxu0 %v3566_v28 }
 0x181   :  { %v3597_v30 = vpop.permute.xlu1 %736 }
 0x182   :  { %v3610_v38 = vmul.f32 %v3597_v30, %v3358_v41 }
 0x183   :  { %v3652_v33 = vpop.permute.xlu2 %747 }
 0x184   :  { %v5076_v43 = vrot.slane %v3610_v38, 1 }
 0x186   :  { %v847_v46 = vsel %vm79_vm0, %v845_v4, %v5076_v43 }
 0x18a   :  { %v3619_v18 = vpop.permute.xlu1 %372 }
 0x18b   :  { %5132 = vst [vmem:[#allocation5_spill] sm:$0xff] %v3619_v18  ;;  %v377_v54 = vmul.f32 %v3619_v18, %v359_v22 }
 0x18d   :  { %v3632_v8 = vadd.f32 %v3627_v35, %v377_v54  ;;  %v853_v54 = vadd.f32 %v847_v46, %v836_v62  ;;  %v229_v46 = vrot.slane %v3285_v50, 1 }
 0x18f   :  { %v5068_v53 = vmax.f32 %v3632_v8, 0.0 }
 0x191   :  { %v497_v22 = vrot.slane %v5068_v53, 1 }
 0x193   :  { %v3645_v5 = vpop.permute.xlu1 %857  ;;  %v498_v17 = vsel %vm79_vm0, %v3502_v12, %v497_v22  ;;  %v5072_v12 = vrot.slane %v3442_v24, 1 }
 0x194   :  { %5135 = vst [vmem:[#allocation8_spill] sm:$0xff] %v3645_v5  ;;  %v868_v55 = vmul.f32 %v3645_v5, %v853_v54  ;;  %2818 = vmatmul.msk.f32.gmra.mxu1 %vm499_vm1, %v498_v17  ;;  %v230_v54 = vrot.slane %v3293_v57, 1  ;;  %v3663_v17 = vpop.permute.xlu2 %769  ;;  %v5137_v5 = vmov 6  }
 0x196   :  { %v886_v4 = vadd.f32 %v3650_v0, %v868_v55  ;;  %v231_v29 = vsel %vm79_vm0, %v229_v46, %v230_v54 }
 0x198   :  { %v889_v62 = vmax.f32 %v886_v4, 0.0  ;;  %v233_v4 = vsel %vm79_vm0, %v230_v54, %v5072_v12 }
 0x19a   :  { %v2974_v26 = vpack.i.bf16 %v889_v62, %v477_v19 }
 0x19b   :  { %v2981_v53 = vpop.permute.xlu1 %2980 }
 0x19c   :  { %v2983_v42 = vunpack.i.h.bf16 %v2981_v53  ;;  %v2982_v61 = vunpack.i.l.bf16 %v2981_v53  ;;  %2819 = vmatmul.msk.f32.gmra.mxu1 %vm499_vm1, %v497_v22  ;;  %2975 = vrot.lane.b32.xlu0 %v2974_v26, %s3121_s19 }
 0x19e   :  { %v224_v34 = vadd.f32 %v2983_v42, %v3293_v57  ;;  %v223_v55 = vadd.f32 %v2982_v61, %v3285_v50 }
 0x1a0   :  { %v237_v19 = vadd.f32 %v231_v29, %v223_v55  ;;  %v238_v53 = vadd.f32 %v233_v4, %v224_v34 }
 0x1a2   :  { %v3671_v62 = vmul.f32 64.0, %v237_v19  ;;  %v3673_v22 = vmul.f32 64.0, %v238_v53  ;;  %v819_v53 = vmul.f32 %v3663_v17, %v3360_v44 }
 0x1a3   :  { %v90_v26 = vpop.permute.xlu1 %89 }
 0x1a4   :  { %v3676_v2 = vadd.f32 %v90_v26, %v3404_v7  ;;  %751 = vperm.xlu0 %2985, %v3236_v10   ;;  %vm243_vm12 = vcmp.gt.f32.partialorder %v3671_v62, 0.0  ;;  %vm244_vm13 = vcmp.gt.f32.partialorder %v3673_v22, 0.0  ;;  %v3694_v7 = vpop.permute.xlu2 %787 }
 0x1a5   :  { %v3684_v50 = vsel %vm243_vm12, 1.0, %v5073_v27  ;;  %v247_v57 = vsel %vm244_vm13, %v3673_v22, 1.0  ;;  %v3699_v61 = vsel %vm243_vm12, %v3671_v62, 1.0  ;;  %v5143_v62 = vmov 0  }
 0x1a6   :  { %vm156_vm14 = vcmp.gt.f32.partialorder %v3676_v2, 0.0  ;;  %596 = vperm.xlu2 %3000, %v3684_v50   ;;  %3091 = vrcp.f32 %v247_v57  ;;  %v274_v12 = vand.u32 2147483648, %v247_v57  ;;  %vm268_vm3 = vweird.f32 %v247_v57 }
 0x1a7   :  { %v159_v10 = vsel %vm156_vm14, %v3676_v2, 1.0  ;;  %vm254_vm10 = vweird.f32 %v3699_v61  ;;  %v5144_v2 = vmax.f32 %v3489_v52, 0.0  ;;  %v743_v22 = vmul.f32 %v3584_v23, %v3360_v44 }
 0x1a8   :  { %3093 = vrcp.f32 %v159_v10  ;;  %v199_v27 = vand.u32 2147483648, %v159_v10  ;;  %v197_v37 = vand.u32 2147483647, %v159_v10  ;;  %vm193_vm5 = vweird.f32 %v159_v10 }
 0x1a9   :  { %3095 = vrcp.f32 %v3699_v61 }
 0x1aa   :  { %v200_v0 = vor.u32 1.1754944e-38, %v199_v27  ;;  %vm198_vm8 = vcmp.eq.f32.partialorder %v197_v37, 8.507059e+37 }
 0x1ab   :  { %v3702_v46 = vpop.permute.xlu1 %783 }
 0x1ac   :  { %2989 = vset.pattern.permute.xlu0 %v5077_v36  ;;  %v3092_v42 = vpop.eup %3091  ;;  %v827_v29 = vpop.permute.xlu2 %826 }
 0x1ad   :  { %2991 = vperm.xlu0 %2989, %v3301_v60   ;;  %v264_v34 = vmul.f32 %v3092_v42, %v247_v57  ;;  %vm269_vm15 = vweird.f32 %v3092_v42  ;;  %v272_v60 = vand.u32 2147483647, %v247_v57  ;;  %v834_v43 = vmul.f32 %v827_v29, %v3362_v45 }
 0x1ae   :  { %v3094_v54 = vpop.eup %3093  ;;  %3002 = vset.pattern.permute.xlu2 %v5077_v36  ;;  %vm270_vm6 = vmor %vm268_vm3, %vm269_vm15  ;;  %v275_v29 = vor.u32 1.1754944e-38, %v274_v12  ;;  %vm626_vm3 = vcmask 516352  }
 0x1af   :  { %v189_v55 = vmul.f32 %v3094_v54, %v159_v10  ;;  %806 = vperm.xlu2 %3002, %v3442_v24   ;;  %v265_v4 = vsub.f32 1.0, %v264_v34  ;;  %v3708_v19 = vpop.eup %3095  ;;  %vm194_vm2 = vweird.f32 %v3094_v54  ;;  %vm273_vm4 = vcmp.eq.f32.partialorder %v272_v60, 8.507059e+37 }
 0x1b0   :  { %v250_v34 = vmul.f32 %v3708_v19, %v3699_v61  ;;  %vm195_vm7 = vmor %vm193_vm5, %vm194_vm2  ;;  %v837_v18 = vadd.f32 %v834_v43, %v819_v53  ;;  %vm255_vm9 = vweird.f32 %v3708_v19  ;;  %vm634_vm5 = vcmask 778752  }
 0x1b1   :  { %v190_v26 = vsub.f32 1.0, %v189_v55  ;;  %v266_v13 = vmul.f32 %v3092_v42, %v265_v4  ;;  %vm256_vm11 = vmor %vm254_vm10, %vm255_vm9 }
 0x1b2   :  { %v251_v59 = vsub.f32 1.0, %v250_v34  ;;  %v3123_v34 = vmov 8  }
 0x1b3   :  { %v3713_v36 = vpop.permute.xlu1 %740  ;;  %v191_v15 = vmul.f32 %v3094_v54, %v190_v26  ;;  %v267_v55 = vadd.f32 %v3092_v42, %v266_v13 }
 0x1b4   :  { %v3719_v24 = vmul.f32 %v3713_v36, %v3358_v41  ;;  %v877_v10 = vpop.permute.xlu2 %876 }
 0x1b5   :  { %1118 = vrot.lane.b32.xlu0 %v3213_v3, %s3122_s29  ;;  %v192_v4 = vadd.f32 %v3094_v54, %v191_v15  ;;  %v271_v35 = vsel %vm270_vm6, %v3092_v42, %v267_v55  ;;  %v5139_v3 = vrot.slane %v3610_v38, 1  ;;  %v252_v42 = vmul.f32 %v3708_v19, %v251_v59 }
 0x1b6   :  { %v5098_v26 = vrot.slane %v3719_v24, 1  ;;  %2999 = vset.pattern.permute.xlu0 %v5137_v5  ;;  %v276_v57 = vsel %vm273_vm4, %v275_v29, %v271_v35  ;;  %v3744_v38 = vmul.f32 %v3417_v11, %v877_v10  ;;  %v258_v59 = vand.u32 2147483647, %v3699_v61 }
 0x1b7   :  { %3004 = vset.pattern.permute.xlu2 %v5138_v39  ;;  %v196_v13 = vsel %vm195_vm7, %v3094_v54, %v192_v4  ;;  %v3733_v27 = vsel %vm244_vm13, %v276_v57, 0.0  ;;  %v253_v53 = vadd.f32 %v3708_v19, %v252_v42  ;;  %v5140_v4 = vmov 3  }
 0x1b8   :  { %v849_v15 = vsel %vm79_vm0, %v5139_v3, %v5098_v26  ;;  %v201_v12 = vsel %vm198_vm8, %v200_v0, %v196_v13  ;;  %vm259_vm15 = vcmp.eq.f32.partialorder %v258_v59, 8.507059e+37  ;;  %v777_v59 = vmul.f32 %v3663_v17, %v3358_v41 }
 0x1b9   :  { %v3737_v43 = vsel %vm156_vm14, %v201_v12, 0.0  ;;  %v854_v37 = vadd.f32 %v849_v15, %v837_v18  ;;  %v260_v18 = vand.u32 2147483648, %v3699_v61  ;;  %v257_v55 = vsel %vm256_vm11, %v3708_v19, %v253_v53 }
 0x1ba   :  { %452 = vperm.xlu2 %3004, %v3737_v43   ;;  %v5141_v19 = vmov 0.0   ;;  %v3124_v12 = vmov 10   ;;  %v744_v53 = vmul.f32 %v3597_v30, %v3360_v44  ;;  %vm644_vm6 = vcmask 1041152  }
 0x1bb   :  { %v261_v29 = vor.u32 1.1754944e-38, %v260_v18  ;;  %v3771_v15 = vsel %vm156_vm14, 1.0, %v5141_v19  ;;  %v776_v18 = vmul.f32 %v3591_v25, %v3358_v41  ;;  %vm2490_vm7 = vcmask 785408  }
 0x1bc   :  { %v3740_v35 = vpop.permute.xlu1 %861  ;;  %5142 = vst [vmem:[#allocation10_spill] sm:$0xff] %v3771_v15  ;;  %vm2774_vm4 = vcmask 261120   ;;  %vm2798_vm8 = vcmask 123904  }
 0x1bd   :  { %v869_v0 = vmul.f32 %v3740_v35, %v854_v37  ;;  %773 = vperm.xlu0 %2999, %v3310_v63   ;;  %v262_v13 = vsel %vm259_vm15, %v261_v29, %v257_v55 }
 0x1be   :  { %v3760_v3 = vsel %vm243_vm12, %v262_v13, 0.0  ;;  %vm618_vm12 = vcmask 253952  }
 0x1bf   :  { %v887_v54 = vadd.f32 %v3744_v38, %v869_v0 }
 0x1c1   :  { %v890_v60 = vmax.f32 %v887_v54, 0.0  ;;  %v758_v54 = vmul.f32 %v3652_v33, %v3362_v45 }
 0x1c2   :  { %3007 = vset.pattern.permute.xlu2 %v3123_v34 }
 0x1c3   :  { %897 = vrot.lane.b32.xlu1 %v890_v60, %s3121_s19  ;;  %v761_v52 = vadd.f32 %v758_v54, %v743_v22  ;;  %v3809_v54 = vld [vmem:[%s5056_s0] sm:$0xff] }
 0x1c4   :  { %v1121_v57 = vpop.permute.xlu1 %1120 }
 0x1c5   :  { %3003 = vset.pattern.permute.xlu0 %v5140_v4  ;;  %v3763_v61 = vmul.f32 %v1121_v57, %v3230_v9  ;;  %v3778_v9 = vsel %vm244_vm13, 1.0, %v5141_v19  ;;  %v779_v29 = vadd.f32 %v776_v18, %v761_v52  ;;  %v5175_v19 = vld [vmem:[#allocation9_spill] sm:$0xff] }
 0x1c6   :  { %414 = vperm.xlu0 %3003, %v3310_v63  }
 0x1c7   :  { %v794_v57 = vmul.f32 %v3702_v46, %v779_v29 }
 0x1cb   :  { %575 = vperm.xlu1 %3005, %v3760_v3  }
 0x1ce   :  { %3008 = vset.pattern.permute.xlu0 %v3123_v34 }
 0x1cf   :  { %1137 = vperm.xlu0 %3008, %v3763_v61  }
 0x1d3   :  { %3006 = vset.pattern.permute.xlu1 %v5138_v39 }
 0x1d4   :  { %467 = vperm.xlu1 %3006, %v3771_v15  }
 0x1d7   :  { %3011 = vset.pattern.permute.xlu0 %v5143_v62 }
 0x1d8   :  { %601 = vperm.xlu0 %3011, %v3778_v9  }
 0x1dc   :  { %3009 = vset.pattern.permute.xlu1 %v3124_v12 }
 0x1e0   :  { %3021 = vset.pattern.permute.xlu0 %v3123_v34  ;;  %v756_v34 = vpop.permute.xlu2 %755 }
 0x20e   :  { %v2976_v39 = vpop.permute.xlu0 %2975 }
 0x20f   :  { %v2977_v10 = vunpack.i.l.bf16 %v2976_v39 }
 0x211   :  { %v501_v37 = vsel %vm499_vm1, %v5144_v2, %v2977_v10  ;;  %v2978_v2 = vunpack.i.h.bf16 %v2976_v39 }
 0x212   :  { %540 = vmatmul.f32.gmra.mxu0 %v501_v37 }
 0x216   :  { %v752_v42 = vpop.permute.xlu0 %751 }
 0x217   :  { %v759_v0 = vmul.f32 %v752_v42, %v3362_v45 }
 0x219   :  { %v762_v60 = vadd.f32 %v759_v0, %v744_v53  ;;  %v597_v0 = vpop.permute.xlu2 %596 }
 0x21b   :  { %v780_v55 = vadd.f32 %v777_v59, %v762_v60  ;;  %v745_v59 = vmul.f32 %v3713_v36, %v3360_v44 }
 0x21d   :  { %v795_v33 = vmul.f32 %v3694_v7, %v780_v55  ;;  %v760_v55 = vmul.f32 %v756_v34, %v3362_v45 }
 0x21f   :  { %v2992_v4 = vpop.permute.xlu0 %2991 }
 0x220   :  { %v2994_v13 = vunpack.i.h.bf16 %v2992_v4  ;;  %v2993_v23 = vunpack.i.l.bf16 %v2992_v4  ;;  %v3825_v4 = vpop.permute.xlu1 %791 }
 0x222   :  { %v3799_v30 = vmul.f32 %v3417_v11, %v2994_v13  ;;  %v3802_v10 = vmul.f32 %v3417_v11, %v2993_v23  ;;  %v763_v13 = vadd.f32 %v760_v55, %v745_v59 }
 0x224   :  { %5145 = vst [vmem:[#allocation11_spill] sm:$0xff] %v3799_v30  ;;  %v813_v25 = vadd.f32 %v3799_v30, %v795_v33  ;;  %v812_v17 = vadd.f32 %v3802_v10, %v794_v57  ;;  %v5099_v57 = vmov 11  }
 0x226   :  { %v815_v37 = vmax.f32 %v812_v17, 0.0  ;;  %v816_v42 = vmax.f32 %v813_v25, 0.0 }
 0x227   :  { %v1119_v22 = vpop.permute.xlu0 %1118 }
 0x228   :  { %v3812_v53 = vmul.f32 %v3809_v54, %v1119_v22  ;;  %v912_v60 = vsel %vm499_vm1, %v815_v37, %v2978_v2  ;;  %v907_v18 = vrot.slane %v815_v37, 1  ;;  %v908_v52 = vrot.slane %v816_v42, 1  ;;  %v538_v37 = vpop.f32.mrf.mxu0 }
 0x229   :  { %937 = vmatmul.f32.vlgmr.msra.gmra.mxu2 %v912_v60 }
 0x22a   :  { %1132 = vperm.xlu2 %3007, %v3812_v53   ;;  %1167 = vperm.xlu1 %3009, %v3812_v53   ;;  %v909_v39 = vsel %vm79_vm0, %v907_v18, %v908_v52 }
 0x22b   :  { %2832 = vmatmul.msk.f32.vlgmr.msra.gmra.mxu3 %vm499_vm1, %v909_v39  ;;  %2232 = vmatpush.xpose.msra.mxu2 %v3541_v32  ;;  %v807_v32 = vpop.permute.xlu2 %806 }
 0x22c   :  { %2888 = vmatpush.xpose.msk.msra.mxu3 %vm499_vm1, %v3352_v40  ;;  %v3838_v40 = vld [vmem:[%s5055_s1 + $0x10] sm:$0x3] }
 0x22f   :  { %v3827_v29 = vpop.permute.xlu0 %773  ;;  %2233 = vmatpush.xpose.msra.mxu2 %v3548_v1  ;;  %v5100_v1 = vmov 9  }
 0x230   :  { %v778_v23 = vmul.f32 %v3827_v29, %v3358_v41  ;;  %2889 = vmatpush.xpose.msk.msra.mxu3 %vm499_vm1, %v3372_v48  ;;  %v3845_v48 = vmul.f32 %v3417_v11, %v807_v32 }
 0x232   :  { %v781_v36 = vadd.f32 %v778_v23, %v763_v13  ;;  %3010 = vset.pattern.permute.xlu2 %v5099_v57  ;;  %1122 = vrot.lane.b32.xlu1 %v3838_v40, %s3122_s29  ;;  %5146 = vst [vmem:[#allocation12_spill] sm:$0xff] %v3845_v48 }
 0x233   :  { %1197 = vperm.xlu2 %3010, %v3812_v53   ;;  %3012 = vset.pattern.permute.xlu1 %v5100_v1 }
 0x234   :  { %v796_v34 = vmul.f32 %v3825_v4, %v781_v36  ;;  %2234 = vmatpush.xpose.msra.mxu2 %v3559_v6  ;;  %2890 = vmatpush.xpose.msk.msra.mxu3 %vm499_vm1, %v3381_v49  ;;  %v3862_v6 = vld [vmem:[%s5060_s5] ss:$0 sm:$0xff]  ;;  %v3906_v36 = vpop.permute.xlu2 %452 }
 0x235   :  { %v898_v33 = vpop.permute.xlu1 %897  ;;  %v3874_v60 = vmul.f32 %v3862_v6, %v597_v0 }
 0x236   :  { %v3852_v25 = vadd.f32 %v3845_v48, %v796_v34  ;;  %v913_v17 = vsel %vm499_vm1, %v816_v42, %v898_v33  ;;  %v564_v42 = vpop.f32.mrf.mxu1 }
 0x237   :  { %940 = vmatmul.f32.gmra.mxu2 %v913_v17  ;;  %v565_v22 = vadd.f32 %v564_v42, %v538_v37 }
 0x238   :  { %v5097_v2 = vmax.f32 %v3852_v25, 0.0  ;;  %2235 = vmatpush.xpose.msra.mxu2 %v3566_v28  ;;  %2891 = vmatpush.xpose.msk.msra.mxu3 %vm499_vm1, %v3396_v58  ;;  %v415_v33 = vpop.permute.xlu0 %414 }
 0x23a   :  { %1149 = vperm.xlu1 %3012, %v3812_v53   ;;  %v910_v49 = vrot.slane %v5097_v2, 1 }
 0x23b   :  { %3013 = vset.pattern.permute.xlu2 %v5100_v1  ;;  %v5153_v1 = vrot.slane %v3601_v47, 1 }
 0x23c   :  { %1153 = vperm.xlu2 %3013, %v3763_v61   ;;  %v911_v28 = vsel %vm79_vm0, %v908_v52, %v910_v49  ;;  %v5149_v52 = vmov 7  }
 0x23d   :  { %2833 = vmatmul.msk.f32.gmra.mxu3 %vm499_vm1, %v911_v28  ;;  %v3871_v58 = vpop.permute.xlu1 %575 }
 0x23e   :  { %v588_v18 = vmul.f32 %v3871_v58, %v565_v22  ;;  %v404_v22 = vmul.f32 %v3593_v51, %v3360_v44 }
 0x240   :  { %v612_v39 = vadd.f32 %v3874_v60, %v588_v18 }
 0x241   :  { %v1138_v37 = vpop.permute.xlu0 %1137 }
 0x242   :  { %v3878_v59 = vmax.f32 %v612_v39, 0.0  ;;  %3014 = vset.pattern.permute.xlu1 %v3124_v12  ;;  %v3912_v28 = vmul.f32 %v1138_v37, %v3358_v41 }
 0x243   :  { %1171 = vperm.xlu1 %3014, %v3763_v61  }
 0x244   :  { %5147 = vst [vmem:[#allocation13_spill] sm:$0xff] %v3878_v59  ;;  %3015 = vset.pattern.permute.xlu2 %v5143_v62 }
 0x245   :  { %628 = vst.sshfl [vmem:[#allocation1] sm:$0xff pattern:$0x73625140] %v3878_v59  ;;  %580 = vperm.xlu2 %3015, %v3733_v27   ;;  %2834 = vmatmul.msk.f32.gmra.mxu3 %vm499_vm1, %v910_v49  ;;  %v419_v49 = vmul.f32 %v415_v33, %v3362_v45 }
 0x246   :  { %619 = vst.msk [vmem:[#allocation2] sm:$0x1] %vm618_vm12, %v3878_v59 }
 0x247   :  { %v422_v39 = vadd.f32 %v419_v49, %v404_v22 }
 0x24a   :  { %v602_v33 = vpop.permute.xlu0 %601 }
 0x24b   :  { %3022 = vset.pattern.permute.xlu1 %v5099_v57  ;;  %v567_v57 = vpop.f32.mrf.mxu1  ;;  %v3926_v22 = vmul.f32 %v3862_v6, %v602_v33 }
 0x24c   :  { %v3888_v0 = vld [vmem:[#allocation1 + $0x1] ss:$4 sm:$0xff]  ;;  %1201 = vperm.xlu1 %3022, %v3763_v61  }
 0x24d   :  { %5148 = vst [vmem:[#allocation14_spill] sm:$0xff] %v3888_v0  ;;  %3023 = vset.pattern.permute.xlu2 %v5149_v52 }
 0x24e   :  { %636 = vst.sshfl [vmem:[#allocation1] sm:$0xff pattern:$0x73625140] %v3878_v59 }
 0x24f   :  { %5155 = vst [vmem:[#allocation19_spill] sm:$0xff] %v3926_v22 }
 0x254   :  { %3026 = vset.pattern.permute.xlu1 %v3124_v12  ;;  %v468_v12 = vpop.permute.xlu1 %467 }
 0x255   :  { %v3894_v55 = vld [vmem:[#allocation1 + $0x1] ss:$4 sm:$0xff] }
 0x256   :  { %5150 = vst [vmem:[#allocation15_spill] sm:$0xff] %v3894_v55 }
 0x257   :  { %646 = vst.sshfl [vmem:[#allocation1] sm:$0xff pattern:$0x73625140] %v3878_v59 }
 0x25e   :  { %v648_v13 = vld [vmem:[#allocation1 + $0x2] ss:$4 sm:$0xff] }
 0x25f   :  { %651 = vst.sshfl [vmem:[#allocation1] sm:$0xff pattern:$0x73625140] %v3878_v59 }
 0x260   :  { %650 = vst.msk [vmem:[#allocation2 + $0x2] sm:$0x1] %vm618_vm12, %v648_v13  ;;  %v1221_v13 = vrot.slane %v3912_v28, 1  ;;  %v3104_v28 = vld [vmem:[%s5057_s3] ss:$0 sm:$0xff] }
 0x266   :  { %v3900_v23 = vld [vmem:[#allocation1 + $0x2] ss:$4 sm:$0xff] }
 0x267   :  { %5151 = vst [vmem:[#allocation16_spill] sm:$0xff] %v3900_v23 }
 0x268   :  { %660 = vst.sshfl [vmem:[#allocation1] sm:$0xff pattern:$0x73625140] %v3878_v59 }
 0x26f   :  { %v3903_v32 = vld [vmem:[#allocation1 + $0x3] ss:$4 sm:$0xff] }
 0x270   :  { %5152 = vst [vmem:[#allocation17_spill] sm:$0xff] %v3903_v32  ;;  %v439_v32 = vadd.f32 %v5153_v1, %v422_v39 }
 0x271   :  { %667 = vst.sshfl [vmem:[#allocation1] sm:$0xff pattern:$0x73625140] %v3878_v59  ;;  %v3921_v59 = vmul.f32 %v3417_v11, %v468_v12 }
 0x284   :  { %v1133_v34 = vpop.permute.xlu2 %1132 }
 0x285   :  { %v1214_v18 = vmul.f32 %v1133_v34, %v3358_v41 }
 0x287   :  { %v1220_v2 = vrot.slane %v1214_v18, 1 }
 0x289   :  { %v1222_v47 = vsel %vm79_vm0, %v1220_v2, %v1221_v13  ;;  %v3943_v2 = vld [vmem:[%s5056_s0 + $0x10] sm:$0x3] }
 0x28d   :  { %v1198_v17 = vpop.permute.xlu2 %1197 }
 0x28e   :  { %v1208_v23 = vmul.f32 %v1198_v17, %v3362_v45  ;;  %v457_v17 = vmul.f32 %v3906_v36, %v439_v32 }
 0x28f   :  { %v541_v52 = vpop.f32.mrf.mxu0 }
 0x290   :  { %v568_v55 = vadd.f32 %v567_v57, %v541_v52  ;;  %v475_v11 = vadd.f32 %v3921_v59, %v457_v17  ;;  %v3938_v52 = vld [vmem:[#allocation1 + $0x3] ss:$4 sm:$0xff] }
 0x291   :  { %5157 = vst [vmem:[#allocation21_spill] sm:$0xff] %v3938_v52 }
 0x292   :  { %v478_v32 = vmax.f32 %v475_v11, 0.0  ;;  %v5159_v11 = vmov 9  }
 0x296   :  { %v1154_v42 = vpop.permute.xlu2 %1153 }
 0x29c   :  { %v1168_v26 = vpop.permute.xlu1 %1167 }
 0x29d   :  { %v1193_v51 = vmul.f32 %v1168_v26, %v3360_v44 }
 0x29f   :  { %v1211_v0 = vadd.f32 %v1208_v23, %v1193_v51  ;;  %v3923_v49 = vpop.permute.xlu2 %580 }
 0x2a0   :  { %5154 = vst [vmem:[#allocation18_spill] sm:$0xff] %v3923_v49  ;;  %v589_v1 = vmul.f32 %v3923_v49, %v568_v55 }
 0x2a1   :  { %v1228_v18 = vadd.f32 %v1222_v47, %v1211_v0 }
 0x2a2   :  { %v613_v57 = vadd.f32 %v3926_v22, %v589_v1  ;;  %v1145_v1 = vmul.f32 %v1133_v34, %v3360_v44 }
 0x2a3   :  { %v1231_v23 = vmul.f32 %v1228_v18, %v3387_v56 }
 0x2a4   :  { %v3936_v12 = vmax.f32 %v613_v57, 0.0  ;;  %v1123_v39 = vpop.permute.xlu1 %1122  ;;  %v1178_v57 = vmul.f32 %v1168_v26, %v3358_v41 }
 0x2a5   :  { %v3946_v55 = vmul.f32 %v3943_v2, %v1123_v39  ;;  %v1234_v0 = vadd.f32 %v1231_v23, %v3432_v14  ;;  %v1146_v39 = vmul.f32 %v1138_v37, %v3360_v44 }
 0x2a6   :  { %5156 = vst [vmem:[#allocation20_spill] sm:$0xff] %v3936_v12 }
 0x2a7   :  { %684 = vst.sshfl [vmem:[#allocation1] sm:$0xff pattern:$0x73625140] %v3936_v12  ;;  %1175 = vperm.xlu1 %3026, %v3946_v55   ;;  %1142 = vperm.xlu0 %3021, %v3946_v55   ;;  %v1237_v33 = vmax.f32 %v1234_v0, 0.0  ;;  %v1161_v0 = vmul.f32 %v1154_v42, %v3362_v45 }
 0x2a8   :  { %676 = vst.msk [vmem:[#allocation2 + $0x4] sm:$0x1] %vm618_vm12, %v3936_v12 }
 0x2a9   :  { %v3016_v51 = vpack.i.bf16 %v1237_v33, %v478_v32  ;;  %v1164_v32 = vadd.f32 %v1161_v0, %v1146_v39 }
 0x2ab   :  { %3017 = vrot.lane.b32.xlu2 %v3016_v51, %s3121_s19 }
 0x2ac   :  { %v1150_v47 = vpop.permute.xlu1 %1149 }
 0x2ad   :  { %v1160_v18 = vmul.f32 %v1150_v47, %v3362_v45 }
 0x2ae   :  { %v3956_v17 = vld [vmem:[#allocation1 + $0x1] ss:$4 sm:$0xff] }
 0x2af   :  { %5158 = vst [vmem:[#allocation22_spill] sm:$0xff] %v3956_v17  ;;  %v1163_v23 = vadd.f32 %v1160_v18, %v1145_v1  ;;  %3028 = vset.pattern.permute.xlu1 %v5137_v5  ;;  %3025 = vset.pattern.permute.xlu0 %v5159_v11  ;;  %v5161_v1 = vmov 4   ;;  %v3127_v18 = vmov 12  }
 0x2b0   :  { %691 = vst.sshfl [vmem:[#allocation1] sm:$0xff pattern:$0x73625140] %v3936_v12  ;;  %880 = vperm.xlu1 %3028, %v3771_v15   ;;  %1157 = vperm.xlu0 %3025, %v3946_v55  }
 0x2b1   :  { %v1181_v34 = vadd.f32 %v1178_v57, %v1163_v23 }
 0x2b3   :  { %830 = vperm.xlu2 %3023, %v3310_v63   ;;  %v1184_v33 = vmul.f32 %v1181_v34, %v3471_v16  ;;  %v5103_v34 = vmov 14  }
 0x2b5   :  { %v1172_v51 = vpop.permute.xlu1 %1171  ;;  %v1187_v37 = vadd.f32 %v1184_v33, %v3482_v21 }
 0x2b6   :  { %v1179_v47 = vmul.f32 %v1172_v51, %v3358_v41 }
 0x2b7   :  { %v3969_v26 = vld [vmem:[#allocation1 + $0x1] ss:$4 sm:$0xff]  ;;  %v1190_v23 = vmax.f32 %v1187_v37, 0.0 }
 0x2b8   :  { %5160 = vst [vmem:[#allocation23_spill] sm:$0xff] %v3969_v26  ;;  %v1182_v42 = vadd.f32 %v1179_v47, %v1164_v32  ;;  %3031 = vset.pattern.permute.xlu1 %v5161_v1  ;;  %3030 = vset.pattern.permute.xlu0 %v3127_v18  ;;  %v3129_v32 = vmov 13  }
 0x2b9   :  { %700 = vst.sshfl [vmem:[#allocation1] sm:$0xff pattern:$0x73625140] %v3936_v12  ;;  %974 = vperm.xlu1 %3031, %v3760_v3   ;;  %1450 = vperm.xlu0 %3030, %v3763_v61   ;;  %v1255_v3 = vrot.slane %v1190_v23, 1 }
 0x2ba   :  { %v1185_v63 = vmul.f32 %v1182_v42, %v3473_v20 }
 0x2bb   :  { %3024 = vset.pattern.permute.xlu2 %v5161_v1 }
 0x2bc   :  { %v3980_v57 = vadd.f32 %v1185_v63, %v3479_v31  ;;  %989 = vperm.xlu2 %3024, %v3684_v50  }
 0x2be   :  { %v5102_v39 = vmax.f32 %v3980_v57, 0.0 }
 0x2c0   :  { %v702_v11 = vld [vmem:[#allocation1 + $0x2] ss:$4 sm:$0xff]  ;;  %v3988_v0 = vrot.slane %v5102_v39, 1  ;;  %v1194_v39 = vmul.f32 %v1172_v51, %v3360_v44 }
 0x2c1   :  { %705 = vst.sshfl [vmem:[#allocation1] sm:$0xff pattern:$0x73625140] %v3936_v12  ;;  %3032 = vset.pattern.permute.xlu1 %v5103_v34  ;;  %3035 = vset.pattern.permute.xlu0 %v3129_v32 }
 0x2c2   :  { %704 = vst.msk [vmem:[#allocation2 + $0x6] sm:$0x1] %vm618_vm12, %v702_v11  ;;  %1479 = vperm.xlu1 %3032, %v3812_v53   ;;  %1465 = vperm.xlu0 %3035, %v3763_v61   ;;  %v1257_v50 = vsel %vm79_vm0, %v1255_v3, %v3988_v0 }
 0x2c3   :  { %2847 = vmatmul.msk.f32.vlgmr.msrb.gmra.mxu1 %vm499_vm1, %v1257_v50 }
 0x2c4   :  { %3027 = vset.pattern.permute.xlu2 %v5137_v5  ;;  %v5104_v5 = vmov 15  }
 0x2c5   :  { %865 = vperm.xlu2 %3027, %v3737_v43   ;;  %v5164_v43 = vmov 11  }
 0x2c8   :  { %v3997_v33 = vld [vmem:[#allocation1 + $0x2] ss:$4 sm:$0xff] }
 0x2c9   :  { %5162 = vst [vmem:[#allocation24_spill] sm:$0xff] %v3997_v33 }
 0x2ca   :  { %714 = vst.sshfl [vmem:[#allocation1] sm:$0xff pattern:$0x73625140] %v3936_v12  ;;  %3038 = vset.pattern.permute.xlu0 %v3127_v18 }
 0x2cb   :  { %1454 = vperm.xlu0 %3038, %v3946_v55  }
 0x2cd   :  { %3029 = vset.pattern.permute.xlu2 %v3127_v18  ;;  %v5165_v18 = vmax.f32 %v3632_v8, 0.0 }
 0x2ce   :  { %1446 = vperm.xlu2 %3029, %v3812_v53  }
 0x2d1   :  { %v4002_v47 = vld [vmem:[#allocation1 + $0x3] ss:$4 sm:$0xff] }
 0x2d2   :  { %5163 = vst [vmem:[#allocation25_spill] sm:$0xff] %v4002_v47 }
 0x2d3   :  { %721 = vst.sshfl [vmem:[#allocation1] sm:$0xff pattern:$0x73625140] %v3936_v12  ;;  %3040 = vset.pattern.permute.xlu0 %v3129_v32 }
 0x2d4   :  { %1469 = vperm.xlu0 %3040, %v3946_v55  }
 0x2d6   :  { %3033 = vset.pattern.permute.xlu2 %v5104_v5 }
 0x2d7   :  { %1509 = vperm.xlu2 %3033, %v3812_v53  }
 0x2df   :  { %3034 = vset.pattern.permute.xlu2 %v3129_v32  ;;  %v1202_v32 = vpop.permute.xlu1 %1201 }
 0x2e0   :  { %1461 = vperm.xlu2 %3034, %v3812_v53  }
 0x2e8   :  { %3037 = vset.pattern.permute.xlu2 %v5161_v1 }
 0x2e9   :  { %978 = vperm.xlu2 %3037, %v3733_v27   ;;  %v1209_v27 = vmul.f32 %v1202_v32, %v3362_v45  ;;  %v5167_v32 = vld [vmem:[#allocation4_spill] sm:$0xff] }
 0x2f1   :  { %3042 = vset.pattern.permute.xlu2 %v5164_v43 }
 0x305   :  { %v3018_v37 = vpop.permute.xlu2 %3017 }
 0x306   :  { %v3019_v42 = vunpack.i.l.bf16 %v3018_v37  ;;  %v3020_v11 = vunpack.i.h.bf16 %v3018_v37  ;;  %v820_v37 = vmul.f32 %v3827_v29, %v3360_v44 }
 0x308   :  { %v502_v63 = vsel %vm499_vm1, %v5165_v18, %v3019_v42  ;;  %v1260_v50 = vsel %vm499_vm1, %v1190_v23, %v3020_v11  ;;  %v1212_v42 = vadd.f32 %v1209_v27, %v1194_v39 }
 0x309   :  { %543 = vmatmul.f32.gmra.mxu0 %v502_v63 }
 0x30d   :  { %v831_v3 = vpop.permute.xlu2 %830 }
 0x30e   :  { %v835_v43 = vmul.f32 %v831_v3, %v3362_v45  ;;  %v5166_v3 = vrot.slane %v3719_v24, 1 }
 0x310   :  { %v838_v18 = vadd.f32 %v835_v43, %v820_v37  ;;  %v5168_v43 = vld [vmem:[#allocation7_spill] sm:$0xff] }
 0x311   :  { %1285 = vmatmul.f32.vlgmr.msrb.gmra.mxu0 %v1260_v50 }
 0x312   :  { %v855_v50 = vadd.f32 %v5166_v3, %v838_v18 }
 0x316   :  { %v990_v53 = vpop.permute.xlu2 %989 }
 0x319   :  { %v1143_v34 = vpop.permute.xlu0 %1142  ;;  %v4020_v5 = vpop.permute.xlu1 %1175 }
 0x31a   :  { %v4023_v8 = vmul.f32 %v1143_v34, %v3358_v41  ;;  %v1147_v29 = vmul.f32 %v1143_v34, %v3360_v44  ;;  %v1180_v24 = vmul.f32 %v4020_v5, %v3358_v41 }
 0x31c   :  { %v5106_v23 = vrot.slane %v4023_v8, 1 }
 0x31e   :  { %v1224_v51 = vsel %vm79_vm0, %v1221_v13, %v5106_v23  ;;  %v5169_v23 = vld [vmem:[#allocation5_spill] sm:$0xff] }
 0x31f   :  { %v1229_v63 = vadd.f32 %v1224_v51, %v1212_v42  ;;  %v4033_v11 = vpop.permute.xlu2 %865  ;;  %v964_v51 = vpop.f32.mrf.mxu3 }
 0x320   :  { %v870_v39 = vmul.f32 %v4033_v11, %v855_v50  ;;  %v938_v50 = vpop.f32.mrf.mxu2 }
 0x321   :  { %v1232_v17 = vmul.f32 %v1229_v63, %v5167_v32 }
 0x322   :  { %v1158_v33 = vpop.permute.xlu0 %1157  ;;  %v881_v26 = vpop.permute.xlu1 %880 }
 0x323   :  { %v1162_v27 = vmul.f32 %v1158_v33, %v3362_v45  ;;  %v4044_v13 = vmul.f32 %v3104_v28, %v881_v26  ;;  %v1235_v37 = vadd.f32 %v1232_v17, %v5168_v43  ;;  %v965_v17 = vadd.f32 %v964_v51, %v938_v50  ;;  %v5170_v28 = vld [vmem:[#allocation6_spill] sm:$0xff] }
 0x325   :  { %v1165_v42 = vadd.f32 %v1162_v27, %v1147_v29  ;;  %v1238_v18 = vmax.f32 %v1235_v37, 0.0  ;;  %v888_v34 = vadd.f32 %v4044_v13, %v870_v39  ;;  %v4061_v39 = vmul.f32 %v3862_v6, %v990_v53  ;;  %v4077_v53 = vld [vmem:[#allocation1 + $0x3] ss:$4 sm:$0xff] }
 0x326   :  { %5172 = vst [vmem:[#allocation7_spill] sm:$0xff] %v4077_v53 }
 0x327   :  { %v1183_v63 = vadd.f32 %v1180_v24, %v1165_v42  ;;  %1245 = vrot.lane.b32.xlu1 %v1238_v18, %s3121_s19  ;;  %v891_v33 = vmax.f32 %v888_v34, 0.0 }
 0x328   :  { %v4051_v3 = vpop.permute.xlu2 %1446 }
 0x329   :  { %v1186_v26 = vmul.f32 %v1183_v63, %v5169_v23  ;;  %899 = vrot.lane.b32.xlu2 %v891_v33, %s3121_s19  ;;  %v1526_v33 = vmul.f32 %v4051_v3, %v3358_v41 }
 0x32b   :  { %v4056_v47 = vadd.f32 %v1186_v26, %v5170_v28  ;;  %v4058_v29 = vpop.permute.xlu1 %974  ;;  %v4064_v37 = vpop.permute.xlu0 %1450 }
 0x32c   :  { %v985_v27 = vmul.f32 %v4058_v29, %v965_v17  ;;  %v4073_v34 = vmul.f32 %v4064_v37, %v3358_v41 }
 0x32d   :  { %v5107_v24 = vmax.f32 %v4056_v47, 0.0 }
 0x32e   :  { %v1003_v42 = vadd.f32 %v4061_v39, %v985_v27  ;;  %v5111_v26 = vrot.slane %v4073_v34, 1 }
 0x32f   :  { %1483 = vperm.xlu1 %3032, %v3763_v61   ;;  %v1258_v18 = vrot.slane %v5107_v24, 1  ;;  %v1532_v24 = vrot.slane %v1526_v33, 1 }
 0x330   :  { %v4075_v51 = vmax.f32 %v1003_v42, 0.0 }
 0x331   :  { %v1259_v63 = vsel %vm79_vm0, %v3988_v0, %v1258_v18  ;;  %v1510_v50 = vpop.permute.xlu2 %1509  ;;  %v1534_v53 = vsel %vm79_vm0, %v1532_v24, %v5111_v26  ;;  %v3105_v24 = vld [vmem:[%s5055_s1] sm:$0xff] }
 0x332   :  { %5171 = vst [vmem:[#allocation4_spill] sm:$0xff] %v4075_v51  ;;  %2848 = vmatmul.msk.f32.gmra.mxu1 %vm499_vm1, %v1259_v63  ;;  %v1520_v27 = vmul.f32 %v1510_v50, %v3362_v45  ;;  %v5174_v50 = vld [vmem:[#allocation8_spill] sm:$0xff] }
 0x333   :  { %1017 = vst.sshfl [vmem:[#allocation1] sm:$0xff pattern:$0x73625140] %v4075_v51 }
 0x334   :  { %1009 = vst.msk [vmem:[#allocation2 + $0x1] sm:$0x1] %vm618_vm12, %v4075_v51  ;;  %v1480_v17 = vpop.permute.xlu1 %1479 }
 0x335   :  { %v1505_v42 = vmul.f32 %v1480_v17, %v3360_v44  ;;  %v1490_v26 = vmul.f32 %v1480_v17, %v3358_v41 }
 0x337   :  { %v1523_v0 = vadd.f32 %v1520_v27, %v1505_v42  ;;  %3036 = vset.pattern.permute.xlu1 %v5161_v1  ;;  %v5176_v42 = vmov 15  }
 0x338   :  { %993 = vperm.xlu1 %3036, %v3778_v9  }
 0x339   :  { %v1540_v52 = vadd.f32 %v1534_v53, %v1523_v0 }
 0x33a   :  { %v4095_v63 = vld [vmem:[#allocation1 + $0x1] ss:$4 sm:$0xff]  ;;  %2849 = vmatmul.msk.f32.gmra.mxu1 %vm499_vm1, %v1258_v18  ;;  %v1462_v53 = vpop.permute.xlu2 %1461 }
 0x33b   :  { %5173 = vst [vmem:[#allocation5_spill] sm:$0xff] %v4095_v63  ;;  %v1543_v12 = vmul.f32 %v1540_v52, %v5174_v50 }
 0x33c   :  { %1024 = vst.sshfl [vmem:[#allocation1] sm:$0xff pattern:$0x73625140] %v4075_v51 }
 0x33d   :  { %v1546_v33 = vadd.f32 %v1543_v12, %v5175_v19  ;;  %v3106_v12 = vld [vmem:[%s5055_s1 + $0x8] sm:$0xff] }
 0x33f   :  { %v1549_v27 = vmax.f32 %v1546_v33, 0.0 }
 0x340   :  { %3039 = vset.pattern.permute.xlu1 %v5176_v42 }
 0x341   :  { %1513 = vperm.xlu1 %3039, %v3763_v61   ;;  %1555 = vrot.lane.b32.xlu2 %v1549_v27, %s3121_s19  ;;  %v5178_v61 = vmov 14   ;;  %v5181_v27 = vmax.f32 %v3852_v25, 0.0 }
 0x343   :  { %v4102_v15 = vld [vmem:[#allocation1 + $0x1] ss:$4 sm:$0xff]  ;;  %v4126_v0 = vpop.permute.xlu2 %978 }
 0x344   :  { %5177 = vst [vmem:[#allocation6_spill] sm:$0xff] %v4102_v15 }
 0x345   :  { %1033 = vst.sshfl [vmem:[#allocation1] sm:$0xff pattern:$0x73625140] %v4075_v51 }
 0x349   :  { %1757 = vrot.lane.b32.xlu1 %v3105_v24, %s3131_s21  ;;  %1759 = vrot.lane.b32.xlu2 %v3106_v12, %s3131_s21  ;;  %v1472_v24 = vmul.f32 %v1462_v53, %v3362_v45  ;;  %v1457_v12 = vmul.f32 %v4051_v3, %v3360_v44  ;;  %v1466_v3 = vpop.permute.xlu0 %1465 }
 0x34a   :  { %3041 = vset.pattern.permute.xlu1 %v5178_v61  ;;  %v1473_v17 = vmul.f32 %v1466_v3, %v3362_v45  ;;  %v941_v3 = vpop.f32.mrf.mxu2 }
 0x34b   :  { %v1475_v61 = vadd.f32 %v1472_v24, %v1457_v12 }
 0x34c   :  { %v1035_v9 = vld [vmem:[#allocation1 + $0x2] ss:$4 sm:$0xff] }
 0x34d   :  { %1038 = vst.sshfl [vmem:[#allocation1] sm:$0xff pattern:$0x73625140] %v4075_v51 }
 0x34e   :  { %1037 = vst.msk [vmem:[#allocation2 + $0x3] sm:$0x1] %vm618_vm12, %v1035_v9 }
 0x351   :  { %1487 = vperm.xlu1 %3041, %v3946_v55   ;;  %1205 = vperm.xlu2 %3042, %v3946_v55  }
 0x354   :  { %v4118_v52 = vld [vmem:[#allocation1 + $0x2] ss:$4 sm:$0xff] }
 0x355   :  { %5179 = vst [vmem:[#allocation8_spill] sm:$0xff] %v4118_v52  ;;  %v5112_v52 = vmov 16  }
 0x356   :  { %1047 = vst.sshfl [vmem:[#allocation1] sm:$0xff pattern:$0x73625140] %v4075_v51  ;;  %3044 = vset.pattern.permute.xlu0 %v5112_v52 }
 0x359   :  { %3043 = vset.pattern.permute.xlu2 %v5112_v52 }
 0x35d   :  { %v4123_v18 = vld [vmem:[#allocation1 + $0x3] ss:$4 sm:$0xff] }
 0x35e   :  { %5180 = vst [vmem:[#allocation9_spill] sm:$0xff] %v4123_v18  ;;  %v1493_v18 = vadd.f32 %v1490_v26, %v1475_v61 }
 0x35f   :  { %1054 = vst.sshfl [vmem:[#allocation1] sm:$0xff pattern:$0x73625140] %v4075_v51 }
 0x360   :  { %v1496_v63 = vmul.f32 %v1493_v18, %v3702_v46  ;;  %v1458_v18 = vmul.f32 %v4064_v37, %v3360_v44 }
 0x362   :  { %v1499_v25 = vadd.f32 %v1496_v63, %v3802_v10  ;;  %v1476_v61 = vadd.f32 %v1473_v17, %v1458_v18 }
 0x383   :  { %v900_v33 = vpop.permute.xlu2 %899 }
 0x384   :  { %v914_v9 = vsel %vm499_vm1, %v5181_v27, %v900_v33  ;;  %v5182_v27 = vmax.f32 %v3980_v57, 0.0 }
 0x385   :  { %943 = vmatmul.f32.gmra.mxu2 %v914_v9  ;;  %v1502_v9 = vmax.f32 %v1499_v25, 0.0  ;;  %v3107_v25 = vld [vmem:[%s5056_s0 + $0x8] sm:$0xff]  ;;  %s3140_s0 = smov 32  }
 0x399   :  { %v1246_v33 = vpop.permute.xlu1 %1245 }
 0x39a   :  { %v1261_v53 = vsel %vm499_vm1, %v5182_v27, %v1246_v33  ;;  %v967_v27 = vpop.f32.mrf.mxu3 }
 0x39b   :  { %v1556_v24 = vpop.permute.xlu2 %1555  ;;  %1288 = vmatmul.f32.gmra.mxu0 %v1261_v53 }
 0x39c   :  { %v1572_v26 = vsel %vm499_vm1, %v1502_v9, %v1556_v24  ;;  %v968_v24 = vadd.f32 %v967_v27, %v941_v3 }
 0x39d   :  { %1597 = vmatmul.f32.vlgmr.msrb.gmra.mxu2 %v1572_v26 }
 0x39e   :  { %v986_v18 = vmul.f32 %v4126_v0, %v968_v24 }
 0x3a1   :  { %v1484_v12 = vpop.permute.xlu1 %1483 }
 0x3a2   :  { %v1491_v63 = vmul.f32 %v1484_v12, %v3358_v41 }
 0x3a3   :  { %v1760_v52 = vpop.permute.xlu2 %1759 }
 0x3a4   :  { %v1494_v57 = vadd.f32 %v1491_v63, %v1476_v61  ;;  %v4150_v33 = vmul.f32 %v3107_v25, %v1760_v52  ;;  %v1455_v52 = vpop.permute.xlu0 %1454  ;;  %v1567_v63 = vrot.slane %v1502_v9, 1  ;;  %v3133_v25 = vmov 18  }
 0x3a5   :  { %3045 = vset.pattern.permute.xlu1 %v3133_v25  ;;  %v4170_v3 = vmul.f32 %v1455_v52, %v3358_v41 }
 0x3a6   :  { %v1497_v53 = vmul.f32 %v1494_v57, %v3694_v7  ;;  %1776 = vperm.xlu0 %3044, %v4150_v33  }
 0x3a7   :  { %v5118_v9 = vrot.slane %v4170_v3, 1 }
 0x3a8   :  { %v4155_v37 = vadd.f32 %v1497_v53, %v3799_v30 }
 0x3aa   :  { %v5113_v26 = vmax.f32 %v4155_v37, 0.0  ;;  %v994_v17 = vpop.permute.xlu1 %993 }
 0x3ab   :  { %v4160_v61 = vmul.f32 %v3862_v6, %v994_v17  ;;  %v4175_v6 = vld [vmem:[#allocation1 + $0x3] ss:$4 sm:$0xff] }
 0x3ac   :  { %v4164_v57 = vrot.slane %v5113_v26, 1  ;;  %5184 = vst [vmem:[#allocation27_spill] sm:$0xff] %v4175_v6  ;;  %v5116_v26 = vmov 17  }
 0x3ad   :  { %v1004_v53 = vadd.f32 %v4160_v61, %v986_v18  ;;  %v1506_v18 = vmul.f32 %v1484_v12, %v3360_v44 }
 0x3ae   :  { %v1569_v27 = vsel %vm79_vm0, %v1567_v63, %v4164_v57  ;;  %3048 = vset.pattern.permute.xlu0 %v5116_v26 }
 0x3af   :  { %v4172_v24 = vmax.f32 %v1004_v53, 0.0  ;;  %2862 = vmatmul.msk.f32.vlgmr.msrb.gmra.mxu3 %vm499_vm1, %v1569_v27  ;;  %1792 = vperm.xlu0 %3048, %v4150_v33   ;;  %v5185_v27 = vrot.slane %v4073_v34, 1 }
 0x3b1   :  { %5183 = vst [vmem:[#allocation26_spill] sm:$0xff] %v4172_v24  ;;  %v1536_v6 = vsel %vm79_vm0, %v5185_v27, %v5118_v9 }
 0x3b2   :  { %1071 = vst.sshfl [vmem:[#allocation1] sm:$0xff pattern:$0x73625140] %v4172_v24 }
 0x3b3   :  { %1063 = vst.msk [vmem:[#allocation2 + $0x5] sm:$0x1] %vm618_vm12, %v4172_v24  ;;  %v1514_v17 = vpop.permute.xlu1 %1513 }
 0x3b4   :  { %v1521_v63 = vmul.f32 %v1514_v17, %v3362_v45 }
 0x3b6   :  { %v1524_v53 = vadd.f32 %v1521_v63, %v1506_v18  ;;  %v1470_v18 = vpop.permute.xlu0 %1469  ;;  %v1206_v63 = vpop.permute.xlu2 %1205 }
 0x3b7   :  { %3053 = vset.pattern.permute.xlu0 %v3133_v25  ;;  %v1474_v27 = vmul.f32 %v1470_v18, %v3362_v45  ;;  %v1195_v25 = vmul.f32 %v4020_v5, %v3360_v44  ;;  %v4219_v5 = vpop.f32.mrf.mxu1 }
 0x3b8   :  { %v1541_v51 = vadd.f32 %v1536_v6, %v1524_v53  ;;  %5189 = vst [vmem:[#allocation31_spill] sm:$0xff] %v4219_v5 }
 0x3b9   :  { %v4190_v15 = vld [vmem:[#allocation1 + $0x1] ss:$4 sm:$0xff] }
 0x3ba   :  { %5186 = vst [vmem:[#allocation28_spill] sm:$0xff] %v4190_v15  ;;  %v1544_v12 = vmul.f32 %v1541_v51, %v3740_v35  ;;  %v1459_v51 = vmul.f32 %v1455_v52, %v3360_v44 }
 0x3bb   :  { %1078 = vst.sshfl [vmem:[#allocation1] sm:$0xff pattern:$0x73625140] %v4172_v24  ;;  %v1758_v17 = vpop.permute.xlu1 %1757 }
 0x3bc   :  { %v4195_v30 = vmul.f32 %v3809_v54, %v1758_v17  ;;  %v1547_v26 = vadd.f32 %v1544_v12, %v3744_v38  ;;  %v1210_v54 = vmul.f32 %v1206_v63, %v3362_v45  ;;  %v1477_v53 = vadd.f32 %v1474_v27, %v1459_v51  ;;  %v4212_v12 = vpop.f32.mrf.mxu0 }
 0x3bd   :  { %5188 = vst [vmem:[#allocation30_spill] sm:$0xff] %v4212_v12  ;;  %v5190_v27 = vrot.slane %v4023_v8, 1 }
 0x3be   :  { %1771 = vperm.xlu2 %3043, %v4195_v30   ;;  %v1550_v34 = vmax.f32 %v1547_v26, 0.0  ;;  %v1213_v17 = vadd.f32 %v1210_v54, %v1195_v25 }
 0x3c0   :  { %1557 = vrot.lane.b32.xlu1 %v1550_v34, %s3121_s19  ;;  %v5119_v34 = vmov 19   ;;  %v1230_v51 = vadd.f32 %v5190_v27, %v1213_v17  ;;  %v1312_v17 = vpop.f32.mrf.mxu1 }
 0x3c2   :  { %v4200_v9 = vld [vmem:[#allocation1 + $0x1] ss:$4 sm:$0xff] }
 0x3c3   :  { %5187 = vst [vmem:[#allocation29_spill] sm:$0xff] %v4200_v9  ;;  %v4206_v6 = vpop.permute.xlu1 %1487 }
 0x3c4   :  { %1087 = vst.sshfl [vmem:[#allocation1] sm:$0xff pattern:$0x73625140] %v4172_v24  ;;  %v1492_v26 = vmul.f32 %v4206_v6, %v3358_v41 }
 0x3c6   :  { %v1495_v18 = vadd.f32 %v1492_v26, %v1477_v53  ;;  %3046 = vset.pattern.permute.xlu2 %v5119_v34  ;;  %v1233_v26 = vmul.f32 %v1230_v51, %v3906_v36  ;;  %v1286_v34 = vpop.f32.mrf.mxu0 }
 0x3c7   :  { %1836 = vperm.xlu2 %3046, %v4195_v30  }
 0x3c8   :  { %v1498_v63 = vmul.f32 %v1495_v18, %v3825_v4  ;;  %1806 = vperm.xlu1 %3045, %v4195_v30   ;;  %v5191_v18 = vmov 17  }
 0x3ca   :  { %v4224_v54 = vadd.f32 %v1498_v63, %v3845_v48  ;;  %v1313_v63 = vadd.f32 %v1312_v17, %v1286_v34 }
 0x3cb   :  { %v1089_v52 = vld [vmem:[#allocation1 + $0x2] ss:$4 sm:$0xff] }
 0x3cc   :  { %1092 = vst.sshfl [vmem:[#allocation1] sm:$0xff pattern:$0x73625140] %v4172_v24  ;;  %v5121_v25 = vmax.f32 %v4224_v54, 0.0  ;;  %v1321_v51 = vmul.f32 %v1313_v63, %v3871_v58 }
 0x3cd   :  { %1091 = vst.msk [vmem:[#allocation2 + $0x7] sm:$0x1] %vm618_vm12, %v1089_v52  ;;  %v1236_v52 = vadd.f32 %v1233_v26, %v3921_v59  ;;  %v5197_v26 = vmov 16  }
 0x3ce   :  { %v1570_v53 = vrot.slane %v5121_v25, 1 }
 0x3cf   :  { %3047 = vset.pattern.permute.xlu2 %v5191_v18  ;;  %v1239_v27 = vmax.f32 %v1236_v52, 0.0 }
 0x3d0   :  { %1761 = vrot.lane.b32.xlu1 %v3838_v40, %s3131_s21  ;;  %1788 = vperm.xlu2 %3047, %v4195_v30   ;;  %v1571_v8 = vsel %vm79_vm0, %v4164_v57, %v1570_v53  ;;  %v5194_v40 = vmov 19   ;;  %v1324_v57 = vadd.f32 %v1321_v51, %v3874_v60  ;;  %v970_v51 = vpop.f32.mrf.mxu3 }
 0x3d1   :  { %2863 = vmatmul.msk.f32.gmra.mxu3 %vm499_vm1, %v1571_v8 }
 0x3d2   :  { %v4251_v8 = vmax.f32 %v1324_v57, 0.0 }
 0x3d3   :  { %v4232_v9 = vld [vmem:[#allocation1 + $0x2] ss:$4 sm:$0xff] }
 0x3d4   :  { %5192 = vst [vmem:[#allocation32_spill] sm:$0xff] %v4232_v9 }
 0x3d5   :  { %1101 = vst.sshfl [vmem:[#allocation1] sm:$0xff pattern:$0x73625140] %v4172_v24 }
 0x3d6   :  { %5195 = vst [vmem:[#allocation34_spill] sm:$0xff] %v4251_v8 }
 0x3d8   :  { %1810 = vperm.xlu1 %3045, %v4150_v33   ;;  %1247 = vrot.lane.b32.xlu2 %v1239_v27, %s3121_s19 }
 0x3d9   :  { %2864 = vmatmul.msk.f32.gmra.mxu3 %vm499_vm1, %v1570_v53  ;;  %3050 = vset.pattern.permute.xlu2 %v5194_v40 }
 0x3dc   :  { %v4243_v25 = vld [vmem:[#allocation1 + $0x3] ss:$4 sm:$0xff] }
 0x3dd   :  { %5193 = vst [vmem:[#allocation33_spill] sm:$0xff] %v4243_v25 }
 0x3de   :  { %1108 = vst.sshfl [vmem:[#allocation1] sm:$0xff pattern:$0x73625140] %v4172_v24 }
 0x3e0   :  { %1840 = vperm.xlu2 %3050, %v4150_v33   ;;  %3049 = vset.pattern.permute.xlu1 %v5197_v26 }
 0x3e5   :  { %v4253_v34 = vld [vmem:[#allocation1 + $0x3] ss:$4 sm:$0xff] }
 0x3e6   :  { %5196 = vst [vmem:[#allocation35_spill] sm:$0xff] %v4253_v34 }
 0x3e7   :  { %1341 = vst.sshfl [vmem:[#allocation1] sm:$0xff pattern:$0x73625140] %v4251_v8 }
 0x3e8   :  { %3052 = vset.pattern.permute.xlu2 %v5191_v18 }
 0x3ee   :  { %v4258_v17 = vld [vmem:[#allocation1 + $0x1] ss:$4 sm:$0xff] }
 0x3ef   :  { %5198 = vst [vmem:[#allocation36_spill] sm:$0xff] %v4258_v17 }
 0x3f0   :  { %1348 = vst.sshfl [vmem:[#allocation1] sm:$0xff pattern:$0x73625140] %v4251_v8 }
 0x3f7   :  { %v1350_v53 = vld [vmem:[#allocation1 + $0x1] ss:$4 sm:$0xff] }
 0x3f8   :  { %1355 = vst.sshfl [vmem:[#allocation1] sm:$0xff pattern:$0x73625140] %v4251_v8  ;;  %v2851_v52 = vrot.slane %v1350_v53, 9 }
 0x3fa   :  { %1354 = vst.msk [vmem:[#allocation2 + $0xa] sm:$0x1] %vm618_vm12, %v2851_v52  ;;  %v1315_v52 = vpop.f32.mrf.mxu1 }
 0x3ff   :  { %v4264_v63 = vld [vmem:[#allocation1 + $0x2] ss:$4 sm:$0xff] }
 0x400   :  { %5199 = vst [vmem:[#allocation37_spill] sm:$0xff] %v4264_v63 }
 0x401   :  { %1362 = vst.sshfl [vmem:[#allocation1] sm:$0xff pattern:$0x73625140] %v4251_v8 }
 0x408   :  { %v4267_v27 = vld [vmem:[#allocation1 + $0x2] ss:$4 sm:$0xff]  ;;  %v944_v57 = vpop.f32.mrf.mxu2 }
 0x409   :  { %5200 = vst [vmem:[#allocation38_spill] sm:$0xff] %v4267_v27  ;;  %v4272_v18 = vadd.f32 %v970_v51, %v944_v57 }
 0x40a   :  { %1371 = vst.sshfl [vmem:[#allocation1] sm:$0xff pattern:$0x73625140] %v4251_v8 }
 0x40b   :  { %5202 = vst [vmem:[#allocation40_spill] sm:$0xff] %v4272_v18 }
 0x411   :  { %v4270_v26 = vld [vmem:[#allocation1 + $0x3] ss:$4 sm:$0xff] }
 0x412   :  { %5201 = vst [vmem:[#allocation39_spill] sm:$0xff] %v4270_v26 }
 0x413   :  { %1378 = vst.sshfl [vmem:[#allocation1] sm:$0xff pattern:$0x73625140] %v4251_v8 }
 0x418   :  { %v1289_v63 = vpop.f32.mrf.mxu0  ;;  %v1772_v9 = vpop.permute.xlu2 %1771 }
 0x419   :  { %v1316_v25 = vadd.f32 %v1315_v52, %v1289_v63  ;;  %v5205_v52 = vmax.f32 %v4155_v37, 0.0  ;;  %v1853_v18 = vmul.f32 %v1772_v9, %v3358_v41 }
 0x41a   :  { %v1380_v17 = vld [vmem:[#allocation1 + $0x3] ss:$4 sm:$0xff] }
 0x41b   :  { %v2853_v53 = vrot.slane %v1380_v17, 9  ;;  %v1322_v27 = vmul.f32 %v1316_v25, %v3923_v49  ;;  %v5204_v25 = vmax.f32 %v4056_v47, 0.0  ;;  %v1859_v47 = vrot.slane %v1853_v18, 1 }
 0x41c   :  { %v1784_v18 = vmul.f32 %v1772_v9, %v3360_v44 }
 0x41d   :  { %1384 = vst.msk [vmem:[#allocation2 + $0xc] sm:$0x1] %vm618_vm12, %v2853_v53  ;;  %v1325_v34 = vadd.f32 %v1322_v27, %v3926_v22 }
 0x41f   :  { %v4278_v15 = vmax.f32 %v1325_v34, 0.0  ;;  %v1777_v34 = vpop.permute.xlu0 %1776 }
 0x420   :  { %v4294_v12 = vmul.f32 %v1777_v34, %v3358_v41  ;;  %v1598_v8 = vpop.f32.mrf.mxu2 }
 0x421   :  { %v1837_v5 = vpop.permute.xlu2 %1836  ;;  %1396 = vst.sshfl [vmem:[#allocation1] sm:$0xff pattern:$0x73625140] %v4278_v15 }
 0x427   :  { %v1793_v49 = vpop.permute.xlu0 %1792 }
 0x428   :  { %v4281_v51 = vld [vmem:[#allocation1 + $0x1] ss:$4 sm:$0xff] }
 0x429   :  { %5203 = vst [vmem:[#allocation41_spill] sm:$0xff] %v4281_v51 }
 0x42a   :  { %1403 = vst.sshfl [vmem:[#allocation1] sm:$0xff pattern:$0x73625140] %v4278_v15  ;;  %v1789_v17 = vpop.permute.xlu2 %1788 }
 0x431   :  { %v1405_v57 = vld [vmem:[#allocation1 + $0x1] ss:$4 sm:$0xff] }
 0x432   :  { %1410 = vst.sshfl [vmem:[#allocation1] sm:$0xff pattern:$0x73625140] %v4278_v15  ;;  %v2855_v53 = vrot.slane %v1405_v57, 9  ;;  %v1248_v26 = vpop.permute.xlu2 %1247  ;;  %v1558_v63 = vpop.permute.xlu1 %1557 }
 0x433   :  { %v1262_v27 = vsel %vm499_vm1, %v5204_v25, %v1248_v26  ;;  %v1573_v51 = vsel %vm499_vm1, %v5205_v52, %v1558_v63  ;;  %v1860_v26 = vrot.slane %v4294_v12, 1  ;;  %v1847_v25 = vmul.f32 %v1837_v5, %v3362_v45  ;;  %v1624_v52 = vpop.f32.mrf.mxu3 }
 0x434   :  { %1409 = vst.msk [vmem:[#allocation2 + $0xe] sm:$0x1] %vm618_vm12, %v2855_v53  ;;  %1291 = vmatmul.f32.gmra.mxu0 %v1262_v27  ;;  %1600 = vmatmul.f32.gmra.mxu2 %v1573_v51  ;;  %v1799_v63 = vmul.f32 %v1789_v17, %v3362_v45 }
 0x435   :  { %v1861_v51 = vsel %vm79_vm0, %v1859_v47, %v1860_v26 }
 0x436   :  { %v1802_v48 = vadd.f32 %v1799_v63, %v1784_v18  ;;  %v3136_v63 = vmov 20  }
 0x439   :  { %v4296_v57 = vld [vmem:[#allocation1 + $0x2] ss:$4 sm:$0xff] }
 0x43a   :  { %5206 = vst [vmem:[#allocation42_spill] sm:$0xff] %v4296_v57  ;;  %v1807_v53 = vpop.permute.xlu1 %1806 }
 0x43b   :  { %1417 = vst.sshfl [vmem:[#allocation1] sm:$0xff pattern:$0x73625140] %v4278_v15  ;;  %v1832_v37 = vmul.f32 %v1807_v53, %v3360_v44  ;;  %v1817_v5 = vmul.f32 %v1807_v53, %v3358_v41  ;;  %v1800_v53 = vmul.f32 %v1793_v49, %v3362_v45 }
 0x43d   :  { %v1850_v27 = vadd.f32 %v1847_v25, %v1832_v37  ;;  %v1625_v25 = vadd.f32 %v1624_v52, %v1598_v8 }
 0x43f   :  { %v1867_v24 = vadd.f32 %v1861_v51, %v1850_v27  ;;  %v1785_v27 = vmul.f32 %v1777_v34, %v3360_v44  ;;  %v1820_v51 = vadd.f32 %v1817_v5, %v1802_v48 }
 0x441   :  { %v1870_v22 = vmul.f32 %v1867_v24, %v3387_v56  ;;  %v1633_v56 = vmul.f32 %v1625_v25, %v4058_v29 }
 0x442   :  { %v4306_v57 = vld [vmem:[#allocation1 + $0x2] ss:$4 sm:$0xff]  ;;  %v1762_v37 = vpop.permute.xlu1 %1761 }
 0x443   :  { %1426 = vst.sshfl [vmem:[#allocation1] sm:$0xff pattern:$0x73625140] %v4278_v15  ;;  %v4313_v47 = vmul.f32 %v3943_v2, %v1762_v37  ;;  %v1873_v17 = vadd.f32 %v1870_v22, %v3432_v14  ;;  %v1823_v14 = vmul.f32 %v1820_v51, %v3471_v16  ;;  %v1803_v22 = vadd.f32 %v1800_v53, %v1785_v27 }
 0x444   :  { %v1636_v48 = vadd.f32 %v1633_v56, %v4061_v39  ;;  %v3138_v27 = vmov 22   ;;  %v3139_v51 = vmov 21  }
 0x445   :  { %1796 = vperm.xlu2 %3052, %v4313_v47   ;;  %1781 = vperm.xlu1 %3049, %v4313_v47   ;;  %v1876_v9 = vmax.f32 %v1873_v17, 0.0  ;;  %v4329_v34 = vadd.f32 %v1823_v14, %v3482_v21 }
 0x446   :  { %v4332_v52 = vmax.f32 %v1636_v48, 0.0 }
 0x447   :  { %1882 = vrot.lane.b32.xlu0 %v1876_v9, %s3121_s19  ;;  %v1829_v5 = vmax.f32 %v4329_v34, 0.0  ;;  %v1841_v34 = vpop.permute.xlu2 %1840 }
 0x449   :  { %v1894_v37 = vrot.slane %v1829_v5, 1 }
 0x44a   :  { %v4322_v24 = vld [vmem:[#allocation1 + $0x3] ss:$4 sm:$0xff]  ;;  %v1811_v2 = vpop.permute.xlu1 %1810 }
 0x44b   :  { %1433 = vst.sshfl [vmem:[#allocation1] sm:$0xff pattern:$0x73625140] %v4278_v15  ;;  %v1818_v8 = vmul.f32 %v1811_v2, %v3358_v41 }
 0x44d   :  { %v1821_v49 = vadd.f32 %v1818_v8, %v1803_v22  ;;  %3055 = vset.pattern.permute.xlu2 %v3136_v63  ;;  %3051 = vset.pattern.permute.xlu1 %v5176_v42 }
 0x44e   :  { %2089 = vperm.xlu2 %3055, %v4150_v33   ;;  %1517 = vperm.xlu1 %3051, %v3946_v55  }
 0x44f   :  { %v1824_v16 = vmul.f32 %v1821_v49, %v3473_v20  ;;  %1814 = vperm.xlu0 %3053, %v4313_v47   ;;  %v5128_v20 = vmov 23  }
 0x451   :  { %v4341_v25 = vadd.f32 %v1824_v16, %v3479_v31 }
 0x452   :  { %v1435_v18 = vld [vmem:[#allocation1 + $0x3] ss:$4 sm:$0xff] }
 0x453   :  { %1653 = vst.sshfl [vmem:[#allocation1] sm:$0xff pattern:$0x73625140] %v4332_v52  ;;  %v2857_v21 = vrot.slane %v1435_v18, 9  ;;  %v5129_v42 = vmax.f32 %v4341_v25, 0.0 }
 0x454   :  { %v1627_v49 = vpop.f32.mrf.mxu3 }
 0x455   :  { %1439 = vst.msk [vmem:[#allocation2 + $0x10] sm:$0x1] %vm618_vm12, %v2857_v21  ;;  %v4347_v55 = vrot.slane %v5129_v42, 1 }
 0x456   :  { %3057 = vset.pattern.permute.xlu2 %v5128_v20  ;;  %3054 = vset.pattern.permute.xlu1 %v3136_v63 }
 0x457   :  { %2148 = vperm.xlu2 %3057, %v4195_v30   ;;  %2085 = vperm.xlu1 %3054, %v4195_v30   ;;  %v1896_v31 = vsel %vm79_vm0, %v1894_v37, %v4347_v55 }
 0x458   :  { %2877 = vmatmul.msk.f32.vlgmr.msra.gmra.mxu1 %vm499_vm1, %v1896_v31  ;;  %3060 = vset.pattern.permute.xlu0 %v3138_v27 }
 0x45a   :  { %v4354_v17 = vld [vmem:[#allocation1 + $0x1] ss:$4 sm:$0xff] }
 0x45b   :  { %1660 = vst.sshfl [vmem:[#allocation1] sm:$0xff pattern:$0x73625140] %v4332_v52 }
 0x45f   :  { %3059 = vset.pattern.permute.xlu2 %v3139_v51  ;;  %3056 = vset.pattern.permute.xlu1 %v3138_v27 }
 0x460   :  { %2104 = vperm.xlu2 %3059, %v4150_v33   ;;  %2118 = vperm.xlu1 %3056, %v4195_v30  }
 0x462   :  { %v1662_v9 = vld [vmem:[#allocation1 + $0x1] ss:$4 sm:$0xff] }
 0x463   :  { %1667 = vst.sshfl [vmem:[#allocation1] sm:$0xff pattern:$0x73625140] %v4332_v52  ;;  %v2866_v53 = vrot.slane %v1662_v9, 9 }
 0x465   :  { %1666 = vst.msk [vmem:[#allocation2 + $0xb] sm:$0x1] %vm618_vm12, %v2866_v53 }
 0x468   :  { %3061 = vset.pattern.permute.xlu2 %v3136_v63  ;;  %3058 = vset.pattern.permute.xlu1 %v3139_v51  ;;  %v1833_v63 = vmul.f32 %v1811_v2, %v3360_v44 }
 0x469   :  { %2093 = vperm.xlu2 %3061, %v4313_v47   ;;  %2100 = vperm.xlu1 %3058, %v4195_v30   ;;  %v1848_v30 = vmul.f32 %v1841_v34, %v3362_v45 }
 0x46a   :  { %v4365_v56 = vld [vmem:[#allocation1 + $0x2] ss:$4 sm:$0xff] }
 0x46b   :  { %1674 = vst.sshfl [vmem:[#allocation1] sm:$0xff pattern:$0x73625140] %v4332_v52 }
 0x471   :  { %3062 = vset.pattern.permute.xlu1 %v5128_v20  ;;  %3065 = vset.pattern.permute.xlu2 %v5128_v20 }
 0x472   :  { %v4371_v14 = vld [vmem:[#allocation1 + $0x2] ss:$4 sm:$0xff] }
 0x473   :  { %1683 = vst.sshfl [vmem:[#allocation1] sm:$0xff pattern:$0x73625140] %v4332_v52 }
 0x47a   :  { %v4376_v22 = vld [vmem:[#allocation1 + $0x3] ss:$4 sm:$0xff] }
 0x47b   :  { %1690 = vst.sshfl [vmem:[#allocation1] sm:$0xff pattern:$0x73625140] %v4332_v52 }
 0x482   :  { %v1692_v48 = vld [vmem:[#allocation1 + $0x3] ss:$4 sm:$0xff] }
 0x483   :  { %v2868_v8 = vrot.slane %v1692_v48, 9 }
 0x485   :  { %1696 = vst.msk [vmem:[#allocation2 + $0xd] sm:$0x1] %vm618_vm12, %v2868_v8  ;;  %v1851_v8 = vadd.f32 %v1848_v30, %v1833_v63  ;;  %v1507_v63 = vmul.f32 %v4206_v6, %v3360_v44 }
 0x49f   :  { %v1797_v20 = vpop.permute.xlu2 %1796 }
 0x4b7   :  { %v1601_v16 = vpop.f32.mrf.mxu2  ;;  %v1782_v18 = vpop.permute.xlu1 %1781 }
 0x4b8   :  { %v1628_v21 = vadd.f32 %v1627_v49, %v1601_v16  ;;  %v4383_v37 = vmul.f32 %v1782_v18, %v3358_v41 }
 0x4b9   :  { %v1883_v31 = vpop.permute.xlu0 %1882 }
 0x4ba   :  { %v1634_v9 = vmul.f32 %v1628_v21, %v4126_v0  ;;  %v1862_v53 = vrot.slane %v4383_v37, 1  ;;  %v1899_v48 = vsel %vm499_vm1, %v1829_v5, %v1883_v31  ;;  %v1786_v21 = vmul.f32 %v1782_v18, %v3360_v44 }
 0x4bb   :  { %1924 = vmatmul.f32.vlgmr.msra.gmra.mxu0 %v1899_v48  ;;  %v1801_v5 = vmul.f32 %v1797_v20, %v3362_v45  ;;  %v5207_v20 = vrot.slane %v4170_v3, 1 }
 0x4bc   :  { %v1637_v34 = vadd.f32 %v1634_v9, %v4160_v61  ;;  %v1863_v2 = vsel %vm79_vm0, %v1860_v26, %v1862_v53 }
 0x4bd   :  { %v1868_v49 = vadd.f32 %v1863_v2, %v1851_v8  ;;  %v1804_v9 = vadd.f32 %v1801_v5, %v1786_v21  ;;  %v4411_v2 = vpop.permute.xlu2 %2089 }
 0x4be   :  { %v4394_v16 = vmax.f32 %v1637_v34, 0.0 }
 0x4bf   :  { %v1871_v42 = vmul.f32 %v1868_v49, %v5167_v32 }
 0x4c0   :  { %v1518_v30 = vpop.permute.xlu1 %1517  ;;  %1708 = vst.sshfl [vmem:[#allocation1] sm:$0xff pattern:$0x73625140] %v4394_v16 }
 0x4c1   :  { %v1522_v31 = vmul.f32 %v1518_v30, %v3362_v45  ;;  %v4403_v12 = vpop.permute.xlu0 %1814  ;;  %v1874_v26 = vadd.f32 %v1871_v42, %v5168_v43 }
 0x4c2   :  { %v1819_v18 = vmul.f32 %v4403_v12, %v3358_v41 }
 0x4c3   :  { %v1525_v48 = vadd.f32 %v1522_v31, %v1507_v63  ;;  %v1877_v32 = vmax.f32 %v1874_v26, 0.0  ;;  %v4433_v26 = vmul.f32 %v4411_v2, %v3358_v41 }
 0x4c4   :  { %v1822_v8 = vadd.f32 %v1819_v18, %v1804_v9 }
 0x4c5   :  { %v1542_v34 = vadd.f32 %v5207_v20, %v1525_v48  ;;  %1884 = vrot.lane.b32.xlu0 %v1877_v32, %s3121_s19  ;;  %v2149_v9 = vpop.permute.xlu2 %2148 }
 0x4c6   :  { %v1825_v6 = vmul.f32 %v1822_v8, %v5169_v23  ;;  %v2159_v8 = vmul.f32 %v2149_v9, %v3362_v45 }
 0x4c7   :  { %v1545_v49 = vmul.f32 %v1542_v34, %v4033_v11  ;;  %v4415_v30 = vld [vmem:[#allocation1 + $0x1] ss:$4 sm:$0xff] }
 0x4c8   :  { %v4418_v43 = vadd.f32 %v1825_v6, %v5170_v28  ;;  %1715 = vst.sshfl [vmem:[#allocation1] sm:$0xff pattern:$0x73625140] %v4394_v16 }
 0x4c9   :  { %v2086_v42 = vpop.permute.xlu1 %2085  ;;  %v1548_v21 = vadd.f32 %v1545_v49, %v4044_v13 }
 0x4ca   :  { %v1831_v3 = vmax.f32 %v4418_v43, 0.0  ;;  %v2165_v23 = vmul.f32 %v2086_v42, %v3358_v41 }
 0x4cb   :  { %v1551_v5 = vmax.f32 %v1548_v21, 0.0 }
 0x4cc   :  { %v1897_v63 = vrot.slane %v1831_v3, 1  ;;  %v2171_v48 = vrot.slane %v2165_v23, 1 }
 0x4cd   :  { %2122 = vperm.xlu0 %3060, %v4150_v33   ;;  %1559 = vrot.lane.b32.xlu1 %v1551_v5, %s3121_s19 }
 0x4ce   :  { %v1898_v28 = vsel %vm79_vm0, %v4347_v55, %v1897_v63  ;;  %v2172_v55 = vrot.slane %v4433_v26, 1 }
 0x4cf   :  { %2878 = vmatmul.msk.f32.gmra.mxu1 %vm499_vm1, %v1898_v28  ;;  %v1717_v31 = vld [vmem:[#allocation1 + $0x1] ss:$4 sm:$0xff] }
 0x4d0   :  { %1722 = vst.sshfl [vmem:[#allocation1] sm:$0xff pattern:$0x73625140] %v4394_v16  ;;  %v2870_v18 = vrot.slane %v1717_v31, 9  ;;  %v2173_v6 = vsel %vm79_vm0, %v2171_v48, %v2172_v55  ;;  %v2105_v48 = vpop.permute.xlu2 %2104 }
 0x4d2   :  { %v2119_v32 = vpop.permute.xlu1 %2118  ;;  %1721 = vst.msk [vmem:[#allocation2 + $0xf] sm:$0x1] %vm618_vm12, %v2870_v18 }
 0x4d3   :  { %v2144_v20 = vmul.f32 %v2119_v32, %v3360_v44  ;;  %v2129_v9 = vmul.f32 %v2119_v32, %v3358_v41  ;;  %v4471_v32 = vpop.f32.mrf.mxu1 }
 0x4d5   :  { %v2162_v34 = vadd.f32 %v2159_v8, %v2144_v20  ;;  %3063 = vset.pattern.permute.xlu0 %v3139_v51  ;;  %2152 = vperm.xlu1 %3062, %v4150_v33   ;;  %v2096_v33 = vmul.f32 %v2086_v42, %v3360_v44  ;;  %v4473_v8 = vpop.f32.mrf.mxu0 }
 0x4d6   :  { %2108 = vperm.xlu0 %3063, %v4313_v47  }
 0x4d7   :  { %v2179_v49 = vadd.f32 %v2173_v6, %v2162_v34  ;;  %2879 = vmatmul.msk.f32.gmra.mxu1 %vm499_vm1, %v1897_v63  ;;  %v4447_v21 = vld [vmem:[#allocation1 + $0x2] ss:$4 sm:$0xff] }
 0x4d8   :  { %1729 = vst.sshfl [vmem:[#allocation1] sm:$0xff pattern:$0x73625140] %v4394_v16  ;;  %v2094_v20 = vpop.permute.xlu2 %2093 }
 0x4d9   :  { %v2182_v5 = vmul.f32 %v2179_v49, %v5174_v50 }
 0x4db   :  { %v2101_v23 = vpop.permute.xlu1 %2100  ;;  %v2185_v51 = vadd.f32 %v2182_v5, %v5175_v19  ;;  %v1951_v6 = vpop.f32.mrf.mxu1  ;;  %v5208_v5 = vmax.f32 %v4341_v25, 0.0 }
 0x4dc   :  { %v2111_v28 = vmul.f32 %v2101_v23, %v3362_v45 }
 0x4dd   :  { %3064 = vset.pattern.permute.xlu1 %v3138_v27  ;;  %v2188_v31 = vmax.f32 %v2185_v51, 0.0 }
 0x4de   :  { %v2114_v18 = vadd.f32 %v2111_v28, %v2096_v33  ;;  %2126 = vperm.xlu1 %3064, %v4313_v47   ;;  %3073 = vset.pattern.permute.xlu0 %v5143_v62  ;;  %v2097_v28 = vmul.f32 %v4411_v2, %v3360_v44 }
 0x4df   :  { %2194 = vrot.lane.b32.xlu2 %v2188_v31, %s3121_s19  ;;  %v4459_v50 = vld [vmem:[#allocation1 + $0x2] ss:$4 sm:$0xff] }
 0x4e0   :  { %v2132_v63 = vadd.f32 %v2129_v9, %v2114_v18  ;;  %1738 = vst.sshfl [vmem:[#allocation1] sm:$0xff pattern:$0x73625140] %v4394_v16 }
 0x4e2   :  { %v2135_v31 = vmul.f32 %v2132_v63, %v3702_v46  ;;  %v2167_v63 = vmul.f32 %v2094_v20, %v3358_v41 }
 0x4e6   :  { %3074 = vset.pattern.permute.xlu1 %v5161_v1 }
 0x4e7   :  { %2156 = vperm.xlu2 %3065, %v4313_v47   ;;  %v4464_v19 = vld [vmem:[#allocation1 + $0x3] ss:$4 sm:$0xff] }
 0x4e8   :  { %1745 = vst.sshfl [vmem:[#allocation1] sm:$0xff pattern:$0x73625140] %v4394_v16 }
 0x4ef   :  { %3071 = vset.pattern.permute.xlu2 %v5194_v40  ;;  %v1747_v27 = vld [vmem:[#allocation1 + $0x3] ss:$4 sm:$0xff] }
 0x4f0   :  { %1844 = vperm.xlu2 %3071, %v4313_v47   ;;  %v2872_v42 = vrot.slane %v1747_v27, 9 }
 0x4f2   :  { %1751 = vst.msk [vmem:[#allocation2 + $0x11] sm:$0x1] %vm618_vm12, %v2872_v42 }
 0x4f8   :  { %3072 = vset.pattern.permute.xlu2 %v5143_v62  ;;  %v2112_v62 = vmul.f32 %v2105_v48, %v3362_v45 }
 0x4fa   :  { %v2115_v27 = vadd.f32 %v2112_v62, %v2097_v28 }
 0x537   :  { %v1885_v34 = vpop.permute.xlu0 %1884 }
 0x538   :  { %v1925_v49 = vpop.f32.mrf.mxu0  ;;  %v1900_v40 = vsel %vm499_vm1, %v5208_v5, %v1885_v34  ;;  %v5209_v34 = vmax.f32 %v4224_v54, 0.0 }
 0x539   :  { %v1952_v23 = vadd.f32 %v1951_v6, %v1925_v49  ;;  %1927 = vmatmul.f32.gmra.mxu0 %v1900_v40  ;;  %v2195_v47 = vpop.permute.xlu2 %2194  ;;  %v5210_v49 = vld [vmem:[#allocation11_spill] sm:$0xff] }
 0x53b   :  { %v1960_v51 = vmul.f32 %v1952_v23, %v3871_v58 }
 0x53d   :  { %v1963_v33 = vadd.f32 %v1960_v51, %v3874_v60  ;;  %v2138_v60 = vadd.f32 %v2135_v31, %v3802_v10 }
 0x53f   :  { %v4484_v9 = vmax.f32 %v1963_v33, 0.0  ;;  %v2123_v18 = vpop.permute.xlu0 %2122  ;;  %v1560_v25 = vpop.permute.xlu1 %1559  ;;  %v2141_v48 = vmax.f32 %v2138_v60, 0.0 }
 0x540   :  { %v2130_v42 = vmul.f32 %v2123_v18, %v3358_v41  ;;  %v1574_v58 = vsel %vm499_vm1, %v5209_v34, %v1560_v25  ;;  %v2145_v33 = vmul.f32 %v2123_v18, %v3360_v44 }
 0x541   :  { %v2157_v6 = vpop.permute.xlu2 %2156  ;;  %1603 = vmatmul.f32.gmra.mxu2 %v1574_v58  ;;  %1980 = vst.sshfl [vmem:[#allocation1] sm:$0xff pattern:$0x73625140] %v4484_v9  ;;  %v2211_v54 = vsel %vm499_vm1, %v2141_v48, %v2195_v47  ;;  %v2206_v10 = vrot.slane %v2141_v48, 1  ;;  %v1834_v47 = vmul.f32 %v4403_v12, %v3360_v44 }
 0x542   :  { %v2133_v2 = vadd.f32 %v2130_v42, %v2115_v27 }
 0x544   :  { %v2136_v46 = vmul.f32 %v2133_v2, %v3694_v7  ;;  %v2174_v7 = vrot.slane %v2167_v63, 1  ;;  %v2098_v2 = vmul.f32 %v2094_v20, %v3360_v44  ;;  %v2161_v63 = vmul.f32 %v2157_v6, %v3362_v45 }
 0x546   :  { %v4495_v5 = vadd.f32 %v2136_v46, %v5210_v49  ;;  %v2175_v60 = vsel %vm79_vm0, %v2172_v55, %v2174_v7 }
 0x547   :  { %v2153_v40 = vpop.permute.xlu1 %2152 }
 0x548   :  { %v2142_v23 = vmax.f32 %v4495_v5, 0.0  ;;  %v2160_v51 = vmul.f32 %v2153_v40, %v3362_v45  ;;  %v1982_v62 = vld [vmem:[#allocation1 + $0x1] ss:$4 sm:$0xff]  ;;  %v2109_v28 = vpop.permute.xlu0 %2108 }
 0x549   :  { %2236 = vmatmul.f32.vlgmr.msra.gmra.mxu2 %v2211_v54  ;;  %1985 = vst.sshfl [vmem:[#allocation1] sm:$0xff pattern:$0x73625140] %v4484_v9  ;;  %v2113_v34 = vmul.f32 %v2109_v28, %v3362_v45 }
 0x54a   :  { %v1845_v31 = vpop.permute.xlu2 %1844  ;;  %v2207_v25 = vrot.slane %v2142_v23, 1  ;;  %1984 = vst.msk [vmem:[#allocation2 + $0x12] sm:$0x1] %vm618_vm12, %v1982_v62  ;;  %v2163_v27 = vadd.f32 %v2160_v51, %v2145_v33 }
 0x54b   :  { %v1849_v42 = vmul.f32 %v1845_v31, %v3362_v45  ;;  %v2116_v40 = vadd.f32 %v2113_v34, %v2098_v2 }
 0x54c   :  { %v2208_v18 = vsel %vm79_vm0, %v2206_v10, %v2207_v25  ;;  %v2180_v46 = vadd.f32 %v2175_v60, %v2163_v27  ;;  %v5211_v10 = vld [vmem:[#allocation12_spill] sm:$0xff] }
 0x54d   :  { %v1852_v58 = vadd.f32 %v1849_v42, %v1834_v47  ;;  %2892 = vmatmul.msk.f32.vlgmr.msra.gmra.mxu3 %vm499_vm1, %v2208_v18  ;;  %v5213_v18 = vld [vmem:[#allocation18_spill] sm:$0xff] }
 0x54e   :  { %v2183_v55 = vmul.f32 %v2180_v46, %v3740_v35 }
 0x54f   :  { %v1869_v12 = vadd.f32 %v1862_v53, %v1852_v58  ;;  %v5214_v58 = vld [vmem:[#allocation19_spill] sm:$0xff] }
 0x550   :  { %v2127_v48 = vpop.permute.xlu1 %2126  ;;  %v4518_v49 = vld [vmem:[#allocation1 + $0x1] ss:$4 sm:$0xff]  ;;  %v2186_v33 = vadd.f32 %v2183_v55, %v3744_v38 }
 0x551   :  { %v2131_v54 = vmul.f32 %v2127_v48, %v3358_v41  ;;  %v2146_v51 = vmul.f32 %v2127_v48, %v3360_v44  ;;  %v1872_v26 = vmul.f32 %v1869_v12, %v3906_v36  ;;  %1994 = vst.sshfl [vmem:[#allocation1] sm:$0xff pattern:$0x73625140] %v4484_v9  ;;  %v1630_v12 = vpop.f32.mrf.mxu3 }
 0x553   :  { %v2134_v20 = vadd.f32 %v2131_v54, %v2116_v40  ;;  %v2164_v62 = vadd.f32 %v2161_v63, %v2146_v51  ;;  %v1875_v37 = vadd.f32 %v1872_v26, %v3921_v59  ;;  %v2189_v59 = vmax.f32 %v2186_v33, 0.0 }
 0x555   :  { %v2137_v45 = vmul.f32 %v2134_v20, %v3825_v4  ;;  %v2181_v53 = vadd.f32 %v2174_v7, %v2164_v62  ;;  %v1878_v6 = vmax.f32 %v1875_v37, 0.0 }
 0x557   :  { %v2140_v41 = vadd.f32 %v2137_v45, %v5211_v10  ;;  %v2184_v44 = vmul.f32 %v2181_v53, %v4033_v11  ;;  %1886 = vrot.lane.b32.xlu0 %v1878_v6, %s3121_s19  ;;  %v5212_v11 = vld [vmem:[#allocation10_spill] sm:$0xff]  ;;  %v5215_v53 = vld [vmem:[#allocation3_spill] sm:$0xff] }
 0x558   :  { %v4531_v36 = vld [vmem:[#allocation1 + $0x2] ss:$4 sm:$0xff]  ;;  %v5216_v6 = vrot.slane %v5215_v53, 1 }
 0x559   :  { %v2187_v35 = vadd.f32 %v2184_v44, %v4044_v13  ;;  %v2143_v28 = vmax.f32 %v2140_v41, 0.0  ;;  %2001 = vst.sshfl [vmem:[#allocation1] sm:$0xff pattern:$0x73625140] %v4484_v9 }
 0x55b   :  { %v2209_v31 = vrot.slane %v2143_v28, 1  ;;  %v2190_v4 = vmax.f32 %v2187_v35, 0.0 }
 0x55d   :  { %v2210_v7 = vsel %vm79_vm0, %v2207_v25, %v2209_v31  ;;  %v3066_v47 = vpack.i.bf16 %v2190_v4, %v2189_v59  ;;  %v1954_v25 = vpop.f32.mrf.mxu1  ;;  %v5217_v59 = vmov 0.0  }
 0x55e   :  { %2893 = vmatmul.msk.f32.gmra.mxu3 %vm499_vm1, %v2210_v7 }
 0x55f   :  { %3067 = vrot.lane.b32.xlu1 %v3066_v47, %s3121_s19 }
 0x560   :  { %v4538_v38 = vld [vmem:[#allocation1 + $0x2] ss:$4 sm:$0xff] }
 0x561   :  { %2010 = vst.sshfl [vmem:[#allocation1] sm:$0xff pattern:$0x73625140] %v4484_v9 }
 0x566   :  { %2894 = vmatmul.msk.f32.gmra.mxu3 %vm499_vm1, %v2209_v31 }
 0x567   :  { %218 = vrot.lane.b32.xlu1 %v5212_v11, %s3111_s20  ;;  %s3141_s20 = smov 96  }
 0x568   :  { %v2012_v13 = vld [vmem:[#allocation1 + $0x3] ss:$4 sm:$0xff] }
 0x569   :  { %2015 = vst.sshfl [vmem:[#allocation1] sm:$0xff pattern:$0x73625140] %v4484_v9 }
 0x56a   :  { %2014 = vst.msk [vmem:[#allocation2 + $0x14] sm:$0x1] %vm618_vm12, %v2012_v13 }
 0x570   :  { %v4550_v46 = vld [vmem:[#allocation1 + $0x3] ss:$4 sm:$0xff] }
 0x5b6   :  { %v1928_v27 = vpop.f32.mrf.mxu0 }
 0x5b7   :  { %v1955_v42 = vadd.f32 %v1954_v25, %v1928_v27  ;;  %v5218_v25 = vld [vmem:[#allocation14_spill] sm:$0xff] }
 0x5b9   :  { %v1961_v34 = vmul.f32 %v1955_v42, %v5213_v18  ;;  %v5219_v42 = vmov 23  }
 0x5bb   :  { %v1964_v60 = vadd.f32 %v1961_v34, %v5214_v58 }
 0x5bd   :  { %v4548_v2 = vmax.f32 %v1964_v60, 0.0 }
 0x5bf   :  { %2035 = vst.sshfl [vmem:[#allocation1] sm:$0xff pattern:$0x73625140] %v4548_v2 }
 0x5c4   :  { %v1604_v63 = vpop.f32.mrf.mxu2 }
 0x5c5   :  { %v4553_v48 = vadd.f32 %v1630_v12, %v1604_v63 }
 0x5c6   :  { %v2037_v40 = vld [vmem:[#allocation1 + $0x1] ss:$4 sm:$0xff] }
 0x5c7   :  { %2040 = vst.sshfl [vmem:[#allocation1] sm:$0xff pattern:$0x73625140] %v4548_v2 }
 0x5c8   :  { %2039 = vst.msk [vmem:[#allocation2 + $0x16] sm:$0x1] %vm618_vm12, %v2037_v40 }
 0x5c9   :  { %v1887_v54 = vpop.permute.xlu0 %1886 }
 0x5ca   :  { %v1901_v51 = vsel %vm499_vm1, %v1831_v3, %v1887_v54 }
 0x5cb   :  { %1930 = vmatmul.f32.gmra.mxu0 %v1901_v51 }
 0x5ce   :  { %v4560_v26 = vld [vmem:[#allocation1 + $0x1] ss:$4 sm:$0xff] }
 0x5cf   :  { %2049 = vst.sshfl [vmem:[#allocation1] sm:$0xff pattern:$0x73625140] %v4548_v2 }
 0x5d0   :  { %v2263_v41 = vpop.f32.mrf.mxu3 }
 0x5d1   :  { %v3068_v55 = vpop.permute.xlu1 %3067 }
 0x5d2   :  { %v3069_v20 = vunpack.i.l.bf16 %v3068_v55  ;;  %v3070_v45 = vunpack.i.h.bf16 %v3068_v55 }
 0x5d4   :  { %v2212_v62 = vsel %vm499_vm1, %v2142_v23, %v3069_v20  ;;  %v2213_v10 = vsel %vm499_vm1, %v2143_v28, %v3070_v45  ;;  %v2237_v23 = vpop.f32.mrf.mxu2 }
 0x5d5   :  { %2239 = vmatmul.f32.gmra.mxu2 %v2212_v62  ;;  %v2264_v35 = vadd.f32 %v2263_v41, %v2237_v23  ;;  %v5221_v62 = vld [vmem:[#allocation34_spill] sm:$0xff]  ;;  %v5225_v23 = vld [vmem:[#allocation15_spill] sm:$0xff] }
 0x5d6   :  { %v4566_v37 = vld [vmem:[#allocation1 + $0x2] ss:$4 sm:$0xff]  ;;  %v2850_v45 = vrot.slane %v5221_v62, 9 }
 0x5d7   :  { %2056 = vst.sshfl [vmem:[#allocation1] sm:$0xff pattern:$0x73625140] %v4548_v2  ;;  %v2272_v7 = vmul.f32 %v2264_v35, %v4058_v29  ;;  %v2821_v35 = vrot.slane %v5225_v23, 9 }
 0x5d9   :  { %v219_v43 = vpop.permute.xlu1 %218  ;;  %v2275_v11 = vadd.f32 %v2272_v7, %v4061_v39  ;;  %v5220_v39 = vld [vmem:[#allocation20_spill] sm:$0xff]  ;;  %v5226_v7 = vld [vmem:[#allocation21_spill] sm:$0xff] }
 0x5da   :  { %v225_v3 = vadd.f32 %v5215_v53, %v219_v43  ;;  %v2824_v63 = vrot.slane %v5220_v39, 9  ;;  %v5222_v43 = vld [vmem:[#allocation13_spill] sm:$0xff] }
 0x5db   :  { %v4586_v34 = vmax.f32 %v2275_v11, 0.0  ;;  %v2820_v53 = vrot.slane %v5222_v43, 9 }
 0x5dc   :  { %v239_v33 = vadd.f32 %v5216_v6, %v225_v3  ;;  %v5223_v6 = vld [vmem:[#allocation26_spill] sm:$0xff] }
 0x5dd   :  { %2242 = vmatmul.f32.gmra.mxu2 %v2213_v10  ;;  %v5224_v10 = vld [vmem:[#allocation4_spill] sm:$0xff] }
 0x5de   :  { %v242_v44 = vmul.f32 64.0, %v239_v33  ;;  %v4573_v5 = vld [vmem:[#allocation1 + $0x2] ss:$4 sm:$0xff]  ;;  %v2839_v33 = vrot.slane %v5223_v6, 9  ;;  %v2835_v41 = vrot.slane %v5224_v10, 9 }
 0x5df   :  { %2065 = vst.sshfl [vmem:[#allocation1] sm:$0xff pattern:$0x73625140] %v4548_v2 }
 0x5e0   :  { %vm245_vm0 = vcmp.gt.f32.partialorder %v242_v44, 0.0 }
 0x5e1   :  { %v2812_v31 = vsel %vm245_vm0, 1.0, %v5217_v59  ;;  %v248_v4 = vsel %vm245_vm0, %v242_v44, 1.0 }
 0x5e2   :  { %606 = vperm.xlu0 %3073, %v2812_v31   ;;  %3097 = vrcp.f32 %v248_v4  ;;  %v288_v18 = vand.u32 2147483648, %v248_v4  ;;  %v286_v29 = vand.u32 2147483647, %v248_v4  ;;  %vm282_vm13 = vweird.f32 %v248_v4 }
 0x5e4   :  { %v289_v40 = vor.u32 1.1754944e-38, %v288_v18  ;;  %vm287_vm2 = vcmp.eq.f32.partialorder %v286_v29, 8.507059e+37  ;;  %v1957_v18 = vpop.f32.mrf.mxu1  ;;  %v5230_v29 = vld [vmem:[#allocation31_spill] sm:$0xff] }
 0x5e6   :  { %v2067_v28 = vld [vmem:[#allocation1 + $0x3] ss:$4 sm:$0xff] }
 0x5e7   :  { %2070 = vst.sshfl [vmem:[#allocation1] sm:$0xff pattern:$0x73625140] %v4548_v2 }
 0x5e8   :  { %v3098_v47 = vpop.eup %3097  ;;  %2069 = vst.msk [vmem:[#allocation2 + $0x18] sm:$0x1] %vm618_vm12, %v2067_v28  ;;  %v2823_v28 = vrot.slane %v5226_v7, 9 }
 0x5e9   :  { %v278_v13 = vmul.f32 %v3098_v47, %v248_v4  ;;  %vm283_vm1 = vweird.f32 %v3098_v47 }
 0x5ea   :  { %631 = vrot.lane.b32.xlu0 %v5218_v25, %s3121_s19  ;;  %vm284_vm14 = vmor %vm282_vm13, %vm283_vm1  ;;  %v5228_v25 = vld [vmem:[#allocation17_spill] sm:$0xff] }
 0x5eb   :  { %v279_v27 = vsub.f32 1.0, %v278_v13  ;;  %3076 = vset.pattern.permute.xlu0 %v5219_v42  ;;  %v2895_v13 = vrot.slane %v4586_v34, 9 }
 0x5ed   :  { %v280_v58 = vmul.f32 %v3098_v47, %v279_v27 }
 0x5ee   :  { %v4588_v60 = vld [vmem:[#allocation1 + $0x3] ss:$4 sm:$0xff] }
 0x5ef   :  { %v281_v12 = vadd.f32 %v3098_v47, %v280_v58  ;;  %2292 = vst.sshfl [vmem:[#allocation1] sm:$0xff pattern:$0x73625140] %v4586_v34  ;;  %v5229_v58 = vld [vmem:[#allocation30_spill] sm:$0xff] }
 0x5f1   :  { %v285_v54 = vsel %vm284_vm14, %v3098_v47, %v281_v12  ;;  %v5227_v47 = vld [vmem:[#allocation16_spill] sm:$0xff]  ;;  %v571_v12 = vadd.f32 %v5230_v29, %v5229_v58 }
 0x5f2   :  { %680 = vrot.lane.b32.xlu0 %v2824_v63, %s3140_s0  ;;  %v290_v51 = vsel %vm287_vm2, %v289_v40, %v285_v54  ;;  %v2822_v11 = vrot.slane %v5227_v47, 9 }
 0x5f3   :  { %v293_v55 = vsel %vm245_vm0, %v290_v51, 0.0 }
 0x5f4   :  { %982 = vperm.xlu1 %3074, %v293_v55   ;;  %585 = vperm.xlu2 %3072, %v293_v55  }
 0x5f6   :  { %v2294_v20 = vld [vmem:[#allocation1 + $0x1] ss:$4 sm:$0xff] }
 0x5f7   :  { %2296 = vst.msk [vmem:[#allocation2 + $0x13] sm:$0x1] %vm618_vm12, %v2294_v20 }
 0x5f8   :  { %2297 = vst.sshfl [vmem:[#allocation1] sm:$0xff pattern:$0x73625140] %v4586_v34 }
 0x5fa   :  { %1337 = vrot.lane.b32.xlu0 %v2850_v45, %s3121_s19 }
 0x5fc   :  { %623 = vrot.lane.b32.xlu1 %v2820_v53, %s3140_s0  ;;  %3075 = vset.pattern.permute.xlu2 %v5161_v1  ;;  %v2869_v1 = vrot.slane %v4394_v16, 9  ;;  %v2266_v53 = vpop.f32.mrf.mxu3 }
 0x5fd   :  { %997 = vperm.xlu2 %3075, %v2812_v31   ;;  %v2865_v31 = vrot.slane %v4332_v52, 9 }
 0x5ff   :  { %v4601_v3 = vld [vmem:[#allocation1 + $0x1] ss:$4 sm:$0xff] }
 0x600   :  { %2306 = vst.sshfl [vmem:[#allocation1] sm:$0xff pattern:$0x73625140] %v4586_v34 }
 0x602   :  { %1386 = vrot.lane.b32.xlu0 %v4278_v15, %s3140_s0 }
 0x604   :  { %1067 = vrot.lane.b32.xlu1 %v2839_v33, %s3140_s0 }
 0x605   :  { %1013 = vrot.lane.b32.xlu2 %v2835_v41, %s3140_s0 }
 0x607   :  { %v4610_v44 = vld [vmem:[#allocation1 + $0x2] ss:$4 sm:$0xff] }
 0x608   :  { %2313 = vst.sshfl [vmem:[#allocation1] sm:$0xff pattern:$0x73625140] %v4586_v34 }
 0x60a   :  { %1704 = vrot.lane.b32.xlu0 %v2869_v1, %s3121_s19 }
 0x60c   :  { %1331 = vrot.lane.b32.xlu1 %v5221_v62, %s3140_s0 }
 0x60d   :  { %641 = vrot.lane.b32.xlu2 %v2821_v35, %s3141_s20 }
 0x60f   :  { %v4619_v59 = vld [vmem:[#allocation1 + $0x2] ss:$4 sm:$0xff] }
 0x610   :  { %2322 = vst.sshfl [vmem:[#allocation1] sm:$0xff pattern:$0x73625140] %v4586_v34 }
 0x612   :  { %1970 = vrot.lane.b32.xlu0 %v4484_v9, %s3121_s19 }
 0x614   :  { %1649 = vrot.lane.b32.xlu1 %v2865_v31, %s3121_s19 }
 0x615   :  { %1643 = vrot.lane.b32.xlu2 %v4332_v52, %s3140_s0  ;;  %v2854_v52 = vrot.slane %v4278_v15, 9  ;;  %v3108_v15 = vld [vmem:[%s5060_s5] ss:$0 sm:$0xff] }
 0x617   :  { %v2324_v4 = vld [vmem:[#allocation1 + $0x3] ss:$4 sm:$0xff] }
 0x618   :  { %2327 = vst.sshfl [vmem:[#allocation1] sm:$0xff pattern:$0x73625140] %v4586_v34 }
 0x619   :  { %2326 = vst.msk [vmem:[#allocation2 + $0x15] sm:$0x1] %vm618_vm12, %v2324_v4  ;;  %v2269_v4 = vpop.f32.mrf.mxu3 }
 0x61a   :  { %672 = vrot.lane.b32.xlu0 %v2823_v28, %s3141_s20 }
 0x61c   :  { %1698 = vrot.lane.b32.xlu1 %v4394_v16, %s3140_s0  ;;  %v1319_v16 = vadd.f32 %v4471_v32, %v4473_v8 }
 0x61d   :  { %656 = vrot.lane.b32.xlu2 %v2822_v11, %s3140_s0  ;;  %v5231_v11 = vld [vmem:[#allocation40_spill] sm:$0xff] }
 0x61f   :  { %v4658_v31 = vld [vmem:[#allocation1 + $0x3] ss:$4 sm:$0xff] }
 0x622   :  { %2288 = vrot.lane.b32.xlu0 %v2895_v13, %s3141_s20 }
 0x624   :  { %663 = vrot.lane.b32.xlu1 %v5228_v25, %s3121_s19 }
 0x625   :  { %1392 = vrot.lane.b32.xlu2 %v2854_v52, %s3121_s19 }
 0x648   :  { %v1931_v42 = vpop.f32.mrf.mxu0 }
 0x649   :  { %v1958_v39 = vadd.f32 %v1957_v18, %v1931_v42 }
 0x64e   :  { %v586_v27 = vpop.permute.xlu2 %585 }
 0x64f   :  { %v590_v40 = vmul.f32 %v586_v27, %v571_v12  ;;  %v1323_v54 = vmul.f32 %v1319_v16, %v586_v27  ;;  %v1962_v51 = vmul.f32 %v1958_v39, %v586_v27  ;;  %v2884_v12 = vrot.slane %v4548_v2, 9 }
 0x654   :  { %v607_v63 = vpop.permute.xlu0 %606 }
 0x655   :  { %v611_v55 = vmul.f32 %v3108_v15, %v607_v63 }
 0x657   :  { %v614_v20 = vadd.f32 %v611_v55, %v590_v40  ;;  %v1326_v62 = vadd.f32 %v1323_v54, %v611_v55  ;;  %v4649_v45 = vadd.f32 %v1962_v51, %v611_v55  ;;  %v998_v43 = vpop.permute.xlu2 %997  ;;  %v5233_v54 = vld [vmem:[#allocation6_spill] sm:$0xff]  ;;  %v5234_v55 = vld [vmem:[#allocation23_spill] sm:$0xff] }
 0x658   :  { %v2240_v6 = vpop.f32.mrf.mxu2  ;;  %v1002_v47 = vmul.f32 %v3108_v15, %v998_v43  ;;  %v2836_v51 = vrot.slane %v5233_v54, 9  ;;  %v5247_v54 = vld [vmem:[#allocation29_spill] sm:$0xff] }
 0x659   :  { %v617_v33 = vmax.f32 %v614_v20, 0.0  ;;  %v1329_v10 = vmax.f32 %v1326_v62, 0.0  ;;  %v2267_v32 = vadd.f32 %v2266_v53, %v2240_v6  ;;  %v2825_v20 = vrot.slane %v5234_v55, 9  ;;  %v5248_v55 = vld [vmem:[#allocation41_spill] sm:$0xff] }
 0x65a   :  { %v2880_v62 = vrot.slane %v4484_v9, 9 }
 0x65b   :  { %v2273_v8 = vmul.f32 %v2267_v32, %v4126_v0  ;;  %1441 = vrot.lane.b32.xlu1 %v1329_v10, %s3140_s0  ;;  %730 = vst.msk [vmem:[#allocation2 + $0x8] sm:$0x1] %vm618_vm12, %v617_v33  ;;  %v5235_v33 = vld [vmem:[#allocation8_spill] sm:$0xff] }
 0x65c   :  { %v632_v41 = vpop.permute.xlu0 %631  ;;  %v2837_v10 = vrot.slane %v5235_v33, 9  ;;  %v5236_v32 = vld [vmem:[#allocation24_spill] sm:$0xff] }
 0x65d   :  { %v2276_v1 = vadd.f32 %v2273_v8, %v4160_v61  ;;  %v2826_v8 = vrot.slane %v5236_v32, 9 }
 0x65f   :  { %v4655_v23 = vmax.f32 %v2276_v1, 0.0  ;;  %v1014_v35 = vpop.permute.xlu2 %1013 }
 0x660   :  { %1016 = vst.msk [vmem:[#allocation2 + $0x1] sm:$0x1] %vm626_vm3, %v1014_v35  ;;  %v2243_v0 = vpop.f32.mrf.mxu2 }
 0x661   :  { %2337 = vrot.lane.b32.xlu0 %v4655_v23, %s3121_s19  ;;  %2347 = vst.sshfl [vmem:[#allocation1] sm:$0xff pattern:$0x73625140] %v4655_v23  ;;  %v2270_v61 = vadd.f32 %v2269_v4, %v2243_v0  ;;  %v5238_v0 = vld [vmem:[#allocation28_spill] sm:$0xff] }
 0x663   :  { %2282 = vrot.lane.b32.xlu1 %v4586_v34, %s3121_s19  ;;  %v5232_v34 = vld [vmem:[#allocation25_spill] sm:$0xff] }
 0x664   :  { %v681_v7 = vpop.permute.xlu0 %680 }
 0x665   :  { %683 = vst.msk [vmem:[#allocation2 + $0x4] sm:$0x1] %vm626_vm3, %v681_v7 }
 0x666   :  { %v983_v28 = vpop.permute.xlu1 %982 }
 0x667   :  { %v987_v13 = vmul.f32 %v983_v28, %v5231_v11  ;;  %v1635_v52 = vmul.f32 %v4553_v48, %v983_v28  ;;  %v2274_v25 = vmul.f32 %v2270_v61, %v983_v28  ;;  %v642_v27 = vpop.permute.xlu2 %641  ;;  %v5239_v61 = vld [vmem:[#allocation5_spill] sm:$0xff] }
 0x668   :  { %v2349_v42 = vld [vmem:[#allocation1 + $0x1] ss:$4 sm:$0xff] }
 0x669   :  { %v1005_v18 = vadd.f32 %v1002_v47, %v987_v13  ;;  %v1638_v58 = vadd.f32 %v1635_v52, %v1002_v47  ;;  %v4668_v29 = vadd.f32 %v2274_v25, %v1002_v47  ;;  %717 = vrot.lane.b32.xlu0 %v5232_v34, %s3121_s19  ;;  %2352 = vst.sshfl [vmem:[#allocation1] sm:$0xff pattern:$0x73625140] %v4655_v23  ;;  %v5240_v47 = vld [vmem:[#allocation35_spill] sm:$0xff]  ;;  %v5244_v34 = vld [vmem:[#allocation33_spill] sm:$0xff] }
 0x66a   :  { %2351 = vst.msk [vmem:[#allocation2 + $0x17] sm:$0x1] %vm618_vm12, %v2349_v42  ;;  %v2842_v11 = vrot.slane %v5240_v47, 9  ;;  %v5241_v13 = vld [vmem:[#allocation27_spill] sm:$0xff] }
 0x66b   :  { %v1641_v16 = vmax.f32 %v1638_v58, 0.0  ;;  %2031 = vrot.lane.b32.xlu1 %v2884_v12, %s3141_s20  ;;  %v1008_v48 = vmax.f32 %v1005_v18, 0.0  ;;  %v2838_v52 = vrot.slane %v5241_v13, 9  ;;  %v5243_v58 = vld [vmem:[#allocation39_spill] sm:$0xff]  ;;  %v5245_v12 = vld [vmem:[#allocation9_spill] sm:$0xff] }
 0x66c   :  { %v1338_v39 = vpop.permute.xlu0 %1337  ;;  %v2428_v47 = vld [vmem:[%s5061_s6 + $0xe0] sm:$0xff]  ;;  %v2413_v13 = vld [vmem:[%s5061_s6 + $0x68] sm:$0xff] }
 0x66d   :  { %1753 = vrot.lane.b32.xlu2 %v1641_v16, %s3140_s0  ;;  %1117 = vst.msk [vmem:[#allocation2 + $0x9] sm:$0x1] %vm618_vm12, %v1008_v48 }
 0x66e   :  { %v624_v63 = vpop.permute.xlu1 %623 }
 0x66f   :  { %627 = vst.msk [vmem:[#allocation2] sm:$0x1] %vm626_vm3, %v624_v63  ;;  %v1644_v40 = vpop.permute.xlu2 %1643  ;;  %v5246_v63 = vld [vmem:[#allocation38_spill] sm:$0xff] }
 0x670   :  { %635 = vst.msk [vmem:[#allocation2] sm:$0x1] %vm634_vm5, %v632_v41  ;;  %v4681_v15 = vld [vmem:[#allocation1 + $0x1] ss:$4 sm:$0xff] }
 0x671   :  { %645 = vst.msk [vmem:[#allocation2] sm:$0x1] %vm644_vm6, %v642_v27  ;;  %1029 = vrot.lane.b32.xlu0 %v2836_v51, %s3141_s20  ;;  %v5237_v41 = vld [vmem:[#allocation22_spill] sm:$0xff]  ;;  %v5242_v27 = vld [vmem:[#allocation7_spill] sm:$0xff]  ;;  %v2840_v51 = vrot.slane %v5247_v54, 9 }
 0x672   :  { %1646 = vst.msk [vmem:[#allocation2 + $0x9] sm:$0x1] %vm626_vm3, %v1644_v40  ;;  %v2827_v42 = vrot.slane %v5242_v27, 9  ;;  %v2852_v40 = vrot.slane %v5246_v63, 9 }
 0x673   :  { %696 = vrot.lane.b32.xlu1 %v2825_v20, %s3141_s20  ;;  %2361 = vst.sshfl [vmem:[#allocation1] sm:$0xff pattern:$0x73625140] %v4655_v23  ;;  %v5249_v20 = vld [vmem:[#allocation32_spill] sm:$0xff] }
 0x674   :  { %v1387_v43 = vpop.permute.xlu0 %1386 }
 0x675   :  { %1389 = vst.msk [vmem:[#allocation2 + $0xc] sm:$0x1] %vm626_vm3, %v1387_v43  ;;  %1976 = vrot.lane.b32.xlu2 %v2880_v62, %s3141_s20  ;;  %v5250_v62 = vld [vmem:[#allocation42_spill] sm:$0xff]  ;;  %v5251_v43 = vld [vmem:[#allocation36_spill] sm:$0xff] }
 0x676   :  { %v1068_v53 = vpop.permute.xlu1 %1067 }
 0x677   :  { %1070 = vst.msk [vmem:[#allocation2 + $0x5] sm:$0x1] %vm626_vm3, %v1068_v53  ;;  %v657_v6 = vpop.permute.xlu2 %656  ;;  %v2881_v53 = vrot.slane %v4518_v49, 9 }
 0x678   :  { %659 = vst.msk [vmem:[#allocation2 + $0x2] sm:$0x1] %vm626_vm3, %v657_v6  ;;  %v2882_v6 = vrot.slane %v4538_v38, 9  ;;  %v2897_v38 = vrot.slane %v4619_v59, 9  ;;  %v2898_v59 = vrot.slane %v4658_v31, 9  ;;  %v2886_v31 = vrot.slane %v4573_v5, 9 }
 0x679   :  { %1043 = vrot.lane.b32.xlu0 %v2837_v10, %s3140_s0  ;;  %v2885_v10 = vrot.slane %v4560_v26, 9  ;;  %v2441_v5 = vld [vmem:[%s5061_s6 + $0x148] sm:$0xff] }
 0x67a   :  { %v4697_v9 = vld [vmem:[#allocation1 + $0x2] ss:$4 sm:$0xff]  ;;  %2557 = vmatpush.xpose.msrb.mxu2 %v2441_v5 }
 0x67b   :  { %710 = vrot.lane.b32.xlu1 %v2826_v8, %s3140_s0  ;;  %2368 = vst.sshfl [vmem:[#allocation1] sm:$0xff pattern:$0x73625140] %v4655_v23 }
 0x67c   :  { %v1705_v7 = vpop.permute.xlu0 %1704 }
 0x67d   :  { %687 = vrot.lane.b32.xlu2 %v5237_v41, %s3121_s19 }
 0x67e   :  { %v1332_v1 = vpop.permute.xlu1 %1331  ;;  %2558 = vmatpush.xpose.msrb.mxu2 %v2428_v47 }
 0x67f   :  { %1334 = vst.msk [vmem:[#allocation2 + $0x8] sm:$0x1] %vm626_vm3, %v1332_v1  ;;  %v1393_v35 = vpop.permute.xlu2 %1392 }
 0x680   :  { %1340 = vst.msk [vmem:[#allocation2 + $0x8] sm:$0x1] %vm634_vm5, %v1338_v39  ;;  %v2856_v39 = vrot.slane %v4306_v57, 9  ;;  %v2841_v57 = vrot.slane %v5249_v20, 9 }
 0x681   :  { %1395 = vst.msk [vmem:[#allocation2 + $0xc] sm:$0x1] %vm634_vm5, %v1393_v35  ;;  %1074 = vrot.lane.b32.xlu0 %v5238_v0, %s3121_s19  ;;  %v2887_v35 = vrot.slane %v4588_v60, 9  ;;  %v2442_v60 = vld [vmem:[%s5061_s6 + $0x150] sm:$0xff] }
 0x682   :  { %v4708_v4 = vld [vmem:[#allocation1 + $0x2] ss:$4 sm:$0xff]  ;;  %2577 = vmatpush.xpose.msrb.mxu3 %v2442_v60 }
 0x683   :  { %1020 = vrot.lane.b32.xlu1 %v5239_v61, %s3121_s19  ;;  %2377 = vst.sshfl [vmem:[#allocation1] sm:$0xff pattern:$0x73625140] %v4655_v23  ;;  %v2426_v61 = vld [vmem:[%s5061_s6 + $0xd0] sm:$0xff] }
 0x684   :  { %v1971_v18 = vpop.permute.xlu0 %1970 }
 0x685   :  { %2025 = vrot.lane.b32.xlu2 %v4548_v2, %s3121_s19 }
 0x686   :  { %v1650_v28 = vpop.permute.xlu1 %1649 }
 0x687   :  { %1652 = vst.msk [vmem:[#allocation2 + $0x9] sm:$0x1] %vm634_vm5, %v1650_v28  ;;  %v2427_v28 = vld [vmem:[%s5061_s6 + $0xd8] sm:$0xff] }
 0x689   :  { %1113 = vrot.lane.b32.xlu0 %v2842_v11, %s3141_s20  ;;  %v2280_v11 = vmax.f32 %v4668_v29, 0.0  ;;  %v2900_v29 = vrot.slane %v4681_v15, 9  ;;  %v2401_v15 = vld [vmem:[%s5061_s6 + $0x8] sm:$0xff] }
 0x68a   :  { %v2379_v25 = vld [vmem:[#allocation1 + $0x3] ss:$4 sm:$0xff] }
 0x68b   :  { %1059 = vrot.lane.b32.xlu1 %v2838_v52, %s3141_s20  ;;  %2382 = vst.sshfl [vmem:[#allocation1] sm:$0xff pattern:$0x73625140] %v4655_v23  ;;  %v2414_v52 = vld [vmem:[%s5061_s6 + $0x70] sm:$0xff] }
 0x68c   :  { %2381 = vst.msk [vmem:[#allocation2 + $0x19] sm:$0x1] %vm618_vm12, %v2379_v25  ;;  %v673_v48 = vpop.permute.xlu0 %672  ;;  %v2415_v25 = vld [vmem:[%s5061_s6 + $0x78] sm:$0xff] }
 0x68d   :  { %726 = vrot.lane.b32.xlu2 %v2827_v42, %s3141_s20  ;;  %v2416_v42 = vld [vmem:[%s5061_s6 + $0x80] sm:$0xff]  ;;  %2559 = vmatpush.xpose.msrb.mxu2 %v2415_v25 }
 0x68e   :  { %v1699_v2 = vpop.permute.xlu1 %1698  ;;  %v2448_v25 = vld [vmem:[%s5061_s6 + $0x180] sm:$0xff] }
 0x68f   :  { %1701 = vst.msk [vmem:[#allocation2 + $0xd] sm:$0x1] %vm626_vm3, %v1699_v2  ;;  %v2400_v2 = vld [vmem:[%s5061_s6] sm:$0xff] }
 0x690   :  { %1707 = vst.msk [vmem:[#allocation2 + $0xd] sm:$0x1] %vm634_vm5, %v1705_v7 }
 0x691   :  { %1374 = vrot.lane.b32.xlu0 %v5243_v58, %s3141_s20  ;;  %v2402_v58 = vld [vmem:[%s5061_s6 + $0x10] sm:$0xff] }
 0x692   :  { %2560 = vmatpush.xpose.msrb.mxu2 %v2402_v58  ;;  %v2436_v58 = vld [vmem:[%s5061_s6 + $0x120] sm:$0xff] }
 0x693   :  { %1104 = vrot.lane.b32.xlu1 %v5244_v34, %s3121_s19 }
 0x695   :  { %1050 = vrot.lane.b32.xlu2 %v5245_v12, %s3121_s19  ;;  %v2403_v12 = vld [vmem:[%s5061_s6 + $0x18] sm:$0xff] }
 0x696   :  { %v664_v16 = vpop.permute.xlu1 %663 }
 0x697   :  { %666 = vst.msk [vmem:[#allocation2 + $0x2] sm:$0x1] %vm634_vm5, %v664_v16 }
 0x698   :  { %675 = vst.msk [vmem:[#allocation2 + $0x2] sm:$0x1] %vm644_vm6, %v673_v48  ;;  %v2899_v48 = vrot.slane %v4655_v23, 9 }
 0x699   :  { %1422 = vrot.lane.b32.xlu0 %v2856_v39, %s3121_s19 }
 0x69b   :  { %1367 = vrot.lane.b32.xlu1 %v2852_v40, %s3121_s19  ;;  %v2384_v40 = vld [vmem:[#allocation1 + $0x3] ss:$4 sm:$0xff] }
 0x69d   :  { %1083 = vrot.lane.b32.xlu2 %v2840_v51, %s3141_s20  ;;  %v2902_v51 = vrot.slane %v2384_v40, 9  ;;  %v2423_v40 = vld [vmem:[%s5061_s6 + $0xb8] sm:$0xff] }
 0x6a1   :  { %1656 = vrot.lane.b32.xlu0 %v4354_v17, %s3141_s20  ;;  %v5252_v17 = vld [vmem:[#allocation37_spill] sm:$0xff] }
 0x6a3   :  { %1399 = vrot.lane.b32.xlu1 %v5248_v55, %s3141_s20 }
 0x6a5   :  { %1097 = vrot.lane.b32.xlu2 %v2841_v57, %s3140_s0 }
 0x6a9   :  { %1670 = vrot.lane.b32.xlu0 %v4365_v56, %s3140_s0  ;;  %v2871_v56 = vrot.slane %v4459_v50, 9  ;;  %v2883_v50 = vrot.slane %v4550_v46, 9 }
 0x6ab   :  { %1413 = vrot.lane.b32.xlu1 %v5250_v62, %s3140_s0 }
 0x6ad   :  { %1344 = vrot.lane.b32.xlu2 %v5251_v43, %s3141_s20 }
 0x6b1   :  { %1741 = vrot.lane.b32.xlu0 %v4464_v19, %s3141_s20 }
 0x6b3   :  { %1686 = vrot.lane.b32.xlu1 %v4376_v22, %s3141_s20  ;;  %v2867_v22 = vrot.slane %v4371_v14, 9 }
 0x6b5   :  { %1358 = vrot.lane.b32.xlu2 %v5252_v17, %s3140_s0  ;;  %v2443_v17 = vld [vmem:[%s5061_s6 + $0x158] sm:$0xff] }
 0x6b9   :  { %1990 = vrot.lane.b32.xlu0 %v2881_v53, %s3140_s0  ;;  %v2444_v53 = vld [vmem:[%s5061_s6 + $0x160] sm:$0xff] }
 0x6bb   :  { %1734 = vrot.lane.b32.xlu1 %v2871_v56, %s3121_s19  ;;  %v2445_v56 = vld [vmem:[%s5061_s6 + $0x168] sm:$0xff] }
 0x6bc   :  { %2637 = vmatpush.xpose.msra.mxu2 %v2445_v56 }
 0x6bd   :  { %1429 = vrot.lane.b32.xlu2 %v4322_v24, %s3141_s20  ;;  %v2289_v24 = vpop.permute.xlu0 %2288 }
 0x6c1   :  { %2006 = vrot.lane.b32.xlu0 %v2882_v6, %s3141_s20 }
 0x6c3   :  { %1997 = vrot.lane.b32.xlu1 %v4531_v36, %s3121_s19  ;;  %v2896_v36 = vrot.slane %v4601_v3, 9  ;;  %v2901_v3 = vrot.slane %v4708_v4, 9 }
 0x6c5   :  { %1679 = vrot.lane.b32.xlu2 %v2867_v22, %s3121_s19  ;;  %v2446_v22 = vld [vmem:[%s5061_s6 + $0x170] sm:$0xff] }
 0x6c7   :  { %v1754_v19 = vpop.permute.xlu2 %1753 }
 0x6c8   :  { %1756 = vst.msk [vmem:[#allocation2 + $0x11] sm:$0x1] %vm626_vm3, %v1754_v19 }
 0x6c9   :  { %2052 = vrot.lane.b32.xlu0 %v4566_v37, %s3121_s19 }
 0x6cb   :  { %2020 = vrot.lane.b32.xlu1 %v2883_v50, %s3140_s0 }
 0x6cd   :  { %v1442_v49 = vpop.permute.xlu1 %1441  ;;  %1711 = vrot.lane.b32.xlu2 %v4415_v30, %s3141_s20 }
 0x6ce   :  { %1444 = vst.msk [vmem:[#allocation2 + $0x10] sm:$0x1] %vm626_vm3, %v1442_v49 }
 0x6cf   :  { %1973 = vst.msk [vmem:[#allocation2 + $0x10] sm:$0x1] %vm634_vm5, %v1971_v18  ;;  %v1977_v14 = vpop.permute.xlu2 %1976 }
 0x6d0   :  { %1979 = vst.msk [vmem:[#allocation2 + $0x10] sm:$0x1] %vm644_vm6, %v1977_v14 }
 0x6d1   :  { %2302 = vrot.lane.b32.xlu0 %v2896_v36, %s3140_s0 }
 0x6d3   :  { %2318 = vrot.lane.b32.xlu1 %v2897_v38, %s3141_s20  ;;  %v4784_v46 = vpop.permute.xlu0 %2337  ;;  %v2430_v38 = vld [vmem:[%s5061_s6 + $0xf0] sm:$0xff] }
 0x6d5   :  { %v2283_v37 = vpop.permute.xlu1 %2282  ;;  %1725 = vrot.lane.b32.xlu2 %v4447_v21, %s3140_s0  ;;  %v1968_v21 = vmax.f32 %v4649_v45, 0.0  ;;  %v2439_v45 = vld [vmem:[%s5061_s6 + $0x138] sm:$0xff] }
 0x6d6   :  { %2285 = vst.msk [vmem:[#allocation2 + $0x11] sm:$0x1] %vm634_vm5, %v2283_v37  ;;  %2517 = vmatpush.xpose.msrb.mxu0 %v2439_v45  ;;  %v2431_v37 = vld [vmem:[%s5061_s6 + $0xf8] sm:$0xff] }
 0x6d7   :  { %2291 = vst.msk [vmem:[#allocation2 + $0x11] sm:$0x1] %vm644_vm6, %v2289_v24  ;;  %v688_v30 = vpop.permute.xlu2 %687  ;;  %v2407_v45 = vld [vmem:[%s5061_s6 + $0x38] sm:$0xff] }
 0x6d8   :  { %690 = vst.msk [vmem:[#allocation2 + $0x4] sm:$0x1] %vm634_vm5, %v688_v30  ;;  %v2432_v30 = vld [vmem:[%s5061_s6 + $0x100] sm:$0xff] }
 0x6d9   :  { %2373 = vrot.lane.b32.xlu0 %v2901_v3, %s3141_s20  ;;  %v2433_v3 = vld [vmem:[%s5061_s6 + $0x108] sm:$0xff]  ;;  %2638 = vmatpush.xpose.msra.mxu2 %v2432_v30 }
 0x6da   :  { %2518 = vmatpush.xpose.msrb.mxu0 %v2426_v61 }
 0x6db   :  { %2332 = vrot.lane.b32.xlu1 %v2898_v59, %s3140_s0  ;;  %v718_v33 = vpop.permute.xlu0 %717  ;;  %v2417_v59 = vld [vmem:[%s5061_s6 + $0x88] sm:$0xff] }
 0x6dd   :  { %v4796_v32 = vpop.permute.xlu1 %2031  ;;  %2045 = vrot.lane.b32.xlu2 %v2885_v10, %s3140_s0  ;;  %v2418_v10 = vld [vmem:[%s5061_s6 + $0x90] sm:$0xff] }
 0x6de   :  { %2519 = vmatpush.xpose.msrb.mxu0 %v2413_v13 }
 0x6df   :  { %v4800_v8 = vpop.permute.xlu2 %2025 }
 0x6e1   :  { %2080 = vrot.lane.b32.xlu0 %v1968_v21, %s3121_s19  ;;  %v2419_v21 = vld [vmem:[%s5061_s6 + $0x98] sm:$0xff] }
 0x6e2   :  { %2520 = vmatpush.xpose.msrb.mxu0 %v2400_v2  ;;  %2639 = vmatpush.xpose.msra.mxu2 %v2419_v21  ;;  %v2434_v2 = vld [vmem:[%s5061_s6 + $0x110] sm:$0xff]  ;;  %v3079_v21 = vld [vmem:[%s5062_s7] ss:$0 sm:$0xff] }
 0x6e3   :  { %v1030_v41 = vpop.permute.xlu0 %1029  ;;  %2364 = vrot.lane.b32.xlu1 %v4697_v9, %s3121_s19  ;;  %v2440_v9 = vld [vmem:[%s5061_s6 + $0x140] sm:$0xff] }
 0x6e4   :  { %2537 = vmatpush.xpose.msrb.mxu1 %v2440_v9 }
 0x6e5   :  { %v697_v1 = vpop.permute.xlu1 %696  ;;  %2061 = vrot.lane.b32.xlu2 %v2886_v31, %s3141_s20 }
 0x6e6   :  { %699 = vst.msk [vmem:[#allocation2 + $0x4] sm:$0x1] %vm644_vm6, %v697_v1  ;;  %2597 = vmatpush.xpose.msra.mxu0 %v2443_v17 }
 0x6e7   :  { %v727_v26 = vpop.permute.xlu2 %726 }
 0x6e8   :  { %2538 = vmatpush.xpose.msrb.mxu1 %v2427_v28 }
 0x6ea   :  { %2598 = vmatpush.xpose.msra.mxu0 %v2430_v38 }
 0x6eb   :  { %v1044_v0 = vpop.permute.xlu0 %1043  ;;  %2075 = vrot.lane.b32.xlu1 %v2887_v35, %s3140_s0  ;;  %v2405_v35 = vld [vmem:[%s5061_s6 + $0x28] sm:$0xff] }
 0x6ec   :  { %1046 = vst.msk [vmem:[#allocation2 + $0x3] sm:$0x1] %vm626_vm3, %v1044_v0  ;;  %2539 = vmatpush.xpose.msrb.mxu1 %v2414_v52  ;;  %v2406_v0 = vld [vmem:[%s5061_s6 + $0x30] sm:$0xff]  ;;  %v2447_v52 = vld [vmem:[%s5061_s6 + $0x178] sm:$0xff] }
 0x6ed   :  { %v711_v4 = vpop.permute.xlu1 %710  ;;  %2309 = vrot.lane.b32.xlu2 %v4610_v44, %s3121_s19  ;;  %v2429_v44 = vld [vmem:[%s5061_s6 + $0xe8] sm:$0xff]  ;;  %2640 = vmatpush.xpose.msra.mxu2 %v2406_v0 }
 0x6ee   :  { %713 = vst.msk [vmem:[#allocation2 + $0x6] sm:$0x1] %vm626_vm3, %v711_v4  ;;  %2578 = vmatpush.xpose.msrb.mxu3 %v2429_v44  ;;  %2599 = vmatpush.xpose.msra.mxu0 %v2417_v59 }
 0x6ef   :  { %720 = vst.msk [vmem:[#allocation2 + $0x6] sm:$0x1] %vm634_vm5, %v718_v33  ;;  %v1051_v7 = vpop.permute.xlu2 %1050 }
 0x6f0   :  { %729 = vst.msk [vmem:[#allocation2 + $0x6] sm:$0x1] %vm644_vm6, %v727_v26  ;;  %2540 = vmatpush.xpose.msrb.mxu1 %v2401_v15  ;;  %v2404_v26 = vld [vmem:[%s5061_s6 + $0x20] sm:$0xff]  ;;  %v2435_v15 = vld [vmem:[%s5061_s6 + $0x118] sm:$0xff] }
 0x6f1   :  { %1053 = vst.msk [vmem:[#allocation2 + $0x3] sm:$0x1] %vm634_vm5, %v1051_v7 }
 0x6f2   :  { %2579 = vmatpush.xpose.msrb.mxu3 %v2416_v42  ;;  %2600 = vmatpush.xpose.msra.mxu0 %v2404_v26  ;;  %v2450_v42 = vld [vmem:[%s5061_s6 + $0x190] sm:$0xff] }
 0x6f3   :  { %v1075_v27 = vpop.permute.xlu0 %1074  ;;  %2392 = vrot.lane.b32.xlu1 %v2280_v11, %s3121_s19 }
 0x6f4   :  { %1077 = vst.msk [vmem:[#allocation2 + $0x5] sm:$0x1] %vm634_vm5, %v1075_v27  ;;  %2617 = vmatpush.xpose.msra.mxu1 %v2444_v53  ;;  %v2449_v27 = vld [vmem:[%s5061_s6 + $0x188] sm:$0xff]  ;;  %v2438_v53 = vld [vmem:[%s5061_s6 + $0x130] sm:$0xff] }
 0x6f5   :  { %v1021_v18 = vpop.permute.xlu1 %1020  ;;  %2357 = vrot.lane.b32.xlu2 %v2900_v29, %s3140_s0 }
 0x6f6   :  { %1023 = vst.msk [vmem:[#allocation2 + $0x1] sm:$0x1] %vm634_vm5, %v1021_v18  ;;  %2580 = vmatpush.xpose.msrb.mxu3 %v2403_v12 }
 0x6f7   :  { %1032 = vst.msk [vmem:[#allocation2 + $0x1] sm:$0x1] %vm644_vm6, %v1030_v41  ;;  %v1084_v34 = vpop.permute.xlu2 %1083  ;;  %v2420_v41 = vld [vmem:[%s5061_s6 + $0xa0] sm:$0xff] }
 0x6f8   :  { %1086 = vst.msk [vmem:[#allocation2 + $0x5] sm:$0x1] %vm644_vm6, %v1084_v34  ;;  %2618 = vmatpush.xpose.msra.mxu1 %v2431_v37 }
 0x6fa   :  { %2657 = vmatpush.xpose.msra.mxu3 %v2446_v22 }
 0x6fb   :  { %v1114_v16 = vpop.permute.xlu0 %1113 }
 0x6fc   :  { %2619 = vmatpush.xpose.msra.mxu1 %v2418_v10 }
 0x6fd   :  { %v1060_v39 = vpop.permute.xlu1 %1059  ;;  %2343 = vrot.lane.b32.xlu2 %v2899_v48, %s3141_s20 }
 0x6fe   :  { %1062 = vst.msk [vmem:[#allocation2 + $0x3] sm:$0x1] %vm644_vm6, %v1060_v39  ;;  %2658 = vmatpush.xpose.msra.mxu3 %v2433_v3  ;;  %v2421_v39 = vld [vmem:[%s5061_s6 + $0xa8] sm:$0xff] }
 0x6ff   :  { %v1098_v63 = vpop.permute.xlu2 %1097 }
 0x700   :  { %1100 = vst.msk [vmem:[#allocation2 + $0x7] sm:$0x1] %vm626_vm3, %v1098_v63  ;;  %2620 = vmatpush.xpose.msra.mxu1 %v2405_v35  ;;  %v2422_v63 = vld [vmem:[%s5061_s6 + $0xb0] sm:$0xff] }
 0x702   :  { %2659 = vmatpush.xpose.msra.mxu3 %v2420_v41 }
 0x703   :  { %v1375_v54 = vpop.permute.xlu0 %1374 }
 0x705   :  { %v1105_v55 = vpop.permute.xlu1 %1104  ;;  %2387 = vrot.lane.b32.xlu2 %v2902_v51, %s3140_s0  ;;  %v2424_v51 = vld [vmem:[%s5061_s6 + $0xc0] sm:$0xff] }
 0x706   :  { %1107 = vst.msk [vmem:[#allocation2 + $0x7] sm:$0x1] %vm634_vm5, %v1105_v55  ;;  %2660 = vmatpush.xpose.msra.mxu3 %v2407_v45  ;;  %v2769_v45 = vld [vmem:[%s5064_s8 + $0x18] sm:$0xff] }
 0x707   :  { %1116 = vst.msk [vmem:[#allocation2 + $0x7] sm:$0x1] %vm644_vm6, %v1114_v16  ;;  %v1345_v20 = vpop.permute.xlu2 %1344 }
 0x708   :  { %1347 = vst.msk [vmem:[#allocation2 + $0x8] sm:$0x1] %vm644_vm6, %v1345_v20  ;;  %v2408_v20 = vld [vmem:[%s5061_s6 + $0x40] sm:$0xff] }
 0x70b   :  { %v1423_v23 = vpop.permute.xlu0 %1422 }
 0x70d   :  { %v1368_v57 = vpop.permute.xlu1 %1367 }
 0x70e   :  { %v2396_v62 = vld [vmem:[#allocation2] sm:$0xff] }
 0x70f   :  { %2460 = vst [vmem:[#allocation1] ss:$4 sm:$0xff] %v2396_v62  ;;  %v1359_v43 = vpop.permute.xlu2 %1358  ;;  %v2411_v62 = vld [vmem:[%s5061_s6 + $0x58] sm:$0xff] }
 0x710   :  { %1361 = vst.msk [vmem:[#allocation2 + $0xa] sm:$0x1] %vm626_vm3, %v1359_v43  ;;  %v2451_v43 = vld [vmem:[%s5061_s6 + $0x198] sm:$0xff] }
 0x711   :  { %1370 = vst.msk [vmem:[#allocation2 + $0xa] sm:$0x1] %vm634_vm5, %v1368_v57  ;;  %v2410_v57 = vld [vmem:[%s5061_s6 + $0x50] sm:$0xff] }
 0x712   :  { %1377 = vst.msk [vmem:[#allocation2 + $0xa] sm:$0x1] %vm644_vm6, %v1375_v54 }
 0x713   :  { %v1657_v6 = vpop.permute.xlu0 %1656 }
 0x714   :  { %1659 = vst.msk [vmem:[#allocation2 + $0x9] sm:$0x1] %vm644_vm6, %v1657_v6  ;;  %v2425_v6 = vld [vmem:[%s5061_s6 + $0xc8] sm:$0xff] }
 0x715   :  { %v1400_v19 = vpop.permute.xlu1 %1399 }
 0x716   :  { %1402 = vst.msk [vmem:[#allocation2 + $0xc] sm:$0x1] %vm644_vm6, %v1400_v19  ;;  %v2463_v50 = vld.sshfl [vmem:[#allocation1] sm:$0xff pattern:$0x73625140] }
 0x717   :  { %v1430_v24 = vpop.permute.xlu2 %1429  ;;  %2521 = vmatmul.f32.vlgmr.msrb.gmra.mxu0 %v2463_v50  ;;  %v2464_v49 = vld.sshfl [vmem:[#allocation1 + $0x8] sm:$0xff pattern:$0x73625140]  ;;  %v2465_v14 = vld.sshfl [vmem:[#allocation1 + $0x10] sm:$0xff pattern:$0x73625140] }
 0x718   :  { %2541 = vmatmul.f32.vlgmr.msrb.gmra.mxu1 %v2464_v49  ;;  %2561 = vmatmul.f32.vlgmr.msrb.gmra.mxu2 %v2465_v14  ;;  %v2466_v36 = vld.sshfl [vmem:[#allocation1 + $0x18] sm:$0xff pattern:$0x73625140]  ;;  %v2412_v19 = vld [vmem:[%s5061_s6 + $0x60] sm:$0xff] }
 0x719   :  { %2581 = vmatmul.f32.vlgmr.msrb.gmra.mxu3 %v2466_v36  ;;  %2677 = vmatpush.xpose.msrb.mxu0 %v2447_v52 }
 0x71a   :  { %2697 = vmatpush.xpose.msrb.mxu1 %v2448_v25  ;;  %2717 = vmatpush.xpose.msrb.mxu2 %v2449_v27 }
 0x71b   :  { %v1671_v33 = vpop.permute.xlu0 %1670  ;;  %2737 = vmatpush.xpose.msrb.mxu3 %v2450_v42 }
 0x71c   :  { %1673 = vst.msk [vmem:[#allocation2 + $0xb] sm:$0x1] %vm626_vm3, %v1671_v33 }
 0x71d   :  { %v1414_v31 = vpop.permute.xlu1 %1413  ;;  %2678 = vmatpush.xpose.msrb.mxu0 %v2434_v2 }
 0x71e   :  { %1416 = vst.msk [vmem:[#allocation2 + $0xe] sm:$0x1] %vm626_vm3, %v1414_v31  ;;  %2698 = vmatpush.xpose.msrb.mxu1 %v2435_v15  ;;  %2718 = vmatpush.xpose.msrb.mxu2 %v2436_v58 }
 0x71f   :  { %1425 = vst.msk [vmem:[#allocation2 + $0xe] sm:$0x1] %vm634_vm5, %v1423_v23  ;;  %v1680_v1 = vpop.permute.xlu2 %1679  ;;  %v2409_v23 = vld [vmem:[%s5061_s6 + $0x48] sm:$0xff] }
 0x720   :  { %1432 = vst.msk [vmem:[#allocation2 + $0xe] sm:$0x1] %vm644_vm6, %v1430_v24 }
 0x721   :  { %1682 = vst.msk [vmem:[#allocation2 + $0xb] sm:$0x1] %vm634_vm5, %v1680_v1  ;;  %2679 = vmatpush.xpose.msrb.mxu0 %v2421_v39 }
 0x722   :  { %2699 = vmatpush.xpose.msrb.mxu1 %v2422_v63  ;;  %2719 = vmatpush.xpose.msrb.mxu2 %v2423_v40 }
 0x723   :  { %v1742_v9 = vpop.permute.xlu0 %1741 }
 0x725   :  { %v1687_v5 = vpop.permute.xlu1 %1686  ;;  %2680 = vmatpush.xpose.msrb.mxu0 %v2408_v20 }
 0x726   :  { %1689 = vst.msk [vmem:[#allocation2 + $0xb] sm:$0x1] %vm644_vm6, %v1687_v5  ;;  %2700 = vmatpush.xpose.msrb.mxu1 %v2409_v23  ;;  %2720 = vmatpush.xpose.msrb.mxu2 %v2410_v57  ;;  %v2767_v5 = vld [vmem:[%s5064_s8 + $0x8] sm:$0xff] }
 0x727   :  { %v1712_v60 = vpop.permute.xlu2 %1711 }
 0x728   :  { %1714 = vst.msk [vmem:[#allocation2 + $0xd] sm:$0x1] %vm644_vm6, %v1712_v60 }
 0x72b   :  { %v1991_v4 = vpop.permute.xlu0 %1990 }
 0x72c   :  { %1993 = vst.msk [vmem:[#allocation2 + $0x12] sm:$0x1] %vm626_vm3, %v1991_v4 }
 0x72d   :  { %v1735_v7 = vpop.permute.xlu1 %1734 }
 0x72f   :  { %v1726_v61 = vpop.permute.xlu2 %1725 }
 0x730   :  { %1728 = vst.msk [vmem:[#allocation2 + $0xf] sm:$0x1] %vm626_vm3, %v1726_v61  ;;  %v2766_v61 = vld [vmem:[%s5064_s8] sm:$0xff] }
 0x731   :  { %1737 = vst.msk [vmem:[#allocation2 + $0xf] sm:$0x1] %vm634_vm5, %v1735_v7 }
 0x732   :  { %1744 = vst.msk [vmem:[#allocation2 + $0xf] sm:$0x1] %vm644_vm6, %v1742_v9  ;;  %v2768_v9 = vld [vmem:[%s5064_s8 + $0x10] sm:$0xff] }
 0x733   :  { %v2007_v28 = vpop.permute.xlu0 %2006 }
 0x735   :  { %v1998_v47 = vpop.permute.xlu1 %1997 }
 0x736   :  { %2000 = vst.msk [vmem:[#allocation2 + $0x12] sm:$0x1] %vm634_vm5, %v1998_v47 }
 0x737   :  { %2009 = vst.msk [vmem:[#allocation2 + $0x12] sm:$0x1] %vm644_vm6, %v2007_v28  ;;  %v2046_v44 = vpop.permute.xlu2 %2045 }
 0x738   :  { %2048 = vst.msk [vmem:[#allocation2 + $0x16] sm:$0x1] %vm626_vm3, %v2046_v44 }
 0x739   :  { %v2397_v11 = vld [vmem:[#allocation2 + $0x8] sm:$0xff] }
 0x73a   :  { %2462 = vst [vmem:[#allocation1 + $0x20] ss:$4 sm:$0xff] %v2397_v11 }
 0x73b   :  { %v2053_v13 = vpop.permute.xlu0 %2052 }
 0x73c   :  { %2055 = vst.msk [vmem:[#allocation2 + $0x16] sm:$0x1] %vm634_vm5, %v2053_v13 }
 0x73d   :  { %v2021_v29 = vpop.permute.xlu1 %2020 }
 0x73e   :  { %2023 = vst.msk [vmem:[#allocation2 + $0x14] sm:$0x1] %vm626_vm3, %v2021_v29 }
 0x73f   :  { %2028 = vst.msk [vmem:[#allocation2 + $0x14] sm:$0x1] %vm634_vm5, %v4800_v8  ;;  %v2062_v18 = vpop.permute.xlu2 %2061 }
 0x740   :  { %2034 = vst.msk [vmem:[#allocation2 + $0x14] sm:$0x1] %vm644_vm6, %v4796_v32  ;;  %v2437_v32 = vld [vmem:[%s5061_s6 + $0x128] sm:$0xff] }
 0x741   :  { %2064 = vst.msk [vmem:[#allocation2 + $0x16] sm:$0x1] %vm644_vm6, %v2062_v18  ;;  %v2467_v34 = vld.sshfl [vmem:[#allocation1 + $0x20] sm:$0xff pattern:$0x73625140]  ;;  %2738 = vmatpush.xpose.msrb.mxu3 %v2437_v32 }
 0x742   :  { %2601 = vmatmul.f32.vlgmr.msra.gmra.mxu0 %v2467_v34  ;;  %v2468_v8 = vld.sshfl [vmem:[#allocation1 + $0x28] sm:$0xff pattern:$0x73625140]  ;;  %v2469_v12 = vld.sshfl [vmem:[#allocation1 + $0x30] sm:$0xff pattern:$0x73625140] }
 0x743   :  { %2621 = vmatmul.f32.vlgmr.msra.gmra.mxu1 %v2468_v8  ;;  %2641 = vmatmul.f32.vlgmr.msra.gmra.mxu2 %v2469_v12  ;;  %v2470_v16 = vld.sshfl [vmem:[#allocation1 + $0x38] sm:$0xff pattern:$0x73625140]  ;;  %v2303_v48 = vpop.permute.xlu0 %2302 }
 0x744   :  { %2661 = vmatmul.f32.vlgmr.msra.gmra.mxu3 %v2470_v16  ;;  %2305 = vst.msk [vmem:[#allocation2 + $0x13] sm:$0x1] %vm626_vm3, %v2303_v48  ;;  %2903 = vmatpush.xpose.msk.msra.mxu0 %vm2490_vm7, %v2451_v43  ;;  %v3080_v16 = vld [vmem:[%s5063_s9] ss:$0 sm:$0xff] }
 0x745   :  { %v2319_v54 = vpop.permute.xlu1 %2318  ;;  %2739 = vmatpush.xpose.msrb.mxu3 %v2424_v51  ;;  %2790 = vmatpush.msra.mxu1 %v2769_v45 }
 0x747   :  { %v2310_v55 = vpop.permute.xlu2 %2309  ;;  %2791 = vmatpush.msra.mxu1 %v2768_v9 }
 0x748   :  { %2312 = vst.msk [vmem:[#allocation2 + $0x13] sm:$0x1] %vm634_vm5, %v2310_v55  ;;  %2904 = vmatpush.xpose.msk.msra.mxu0 %vm2490_vm7, %v2438_v53 }
 0x749   :  { %2321 = vst.msk [vmem:[#allocation2 + $0x13] sm:$0x1] %vm644_vm6, %v2319_v54  ;;  %2740 = vmatpush.xpose.msrb.mxu3 %v2411_v62  ;;  %2792 = vmatpush.msra.mxu1 %v2767_v5 }
 0x74b   :  { %v2374_v22 = vpop.permute.xlu0 %2373  ;;  %2793 = vmatpush.msra.mxu1 %v2766_v61 }
 0x74c   :  { %2905 = vmatpush.xpose.msk.msra.mxu0 %vm2490_vm7, %v2425_v6 }
 0x74d   :  { %v2333_v17 = vpop.permute.xlu1 %2332 }
 0x74e   :  { %2335 = vst.msk [vmem:[#allocation2 + $0x15] sm:$0x1] %vm626_vm3, %v2333_v17 }
 0x74f   :  { %2340 = vst.msk [vmem:[#allocation2 + $0x15] sm:$0x1] %vm634_vm5, %v4784_v46  ;;  %v2358_v56 = vpop.permute.xlu2 %2357 }
 0x750   :  { %2360 = vst.msk [vmem:[#allocation2 + $0x17] sm:$0x1] %vm626_vm3, %v2358_v56  ;;  %2906 = vmatpush.xpose.msk.msra.mxu0 %vm2490_vm7, %v2412_v19 }
 0x753   :  { %v2081_v49 = vpop.permute.xlu0 %2080 }
 0x755   :  { %v2365_v50 = vpop.permute.xlu1 %2364 }
 0x756   :  { %2367 = vst.msk [vmem:[#allocation2 + $0x17] sm:$0x1] %vm634_vm5, %v2365_v50 }
 0x757   :  { %2376 = vst.msk [vmem:[#allocation2 + $0x17] sm:$0x1] %vm644_vm6, %v2374_v22  ;;  %v2344_v46 = vpop.permute.xlu2 %2343 }
 0x758   :  { %2346 = vst.msk [vmem:[#allocation2 + $0x15] sm:$0x1] %vm644_vm6, %v2344_v46 }
 0x75d   :  { %v2076_v24 = vpop.permute.xlu1 %2075 }
 0x75e   :  { %2078 = vst.msk [vmem:[#allocation2 + $0x18] sm:$0x1] %vm626_vm3, %v2076_v24 }
 0x75f   :  { %v2398_v14 = vld [vmem:[#allocation2 + $0x10] sm:$0xff]  ;;  %2083 = vst.msk [vmem:[#allocation2 + $0x18] sm:$0x1] %vm634_vm5, %v2081_v49  ;;  %v2388_v36 = vpop.permute.xlu2 %2387 }
 0x760   :  { %2471 = vst [vmem:[#allocation1] ss:$4 sm:$0xff] %v2398_v14 }
 0x761   :  { %2390 = vst.msk [vmem:[#allocation2 + $0x19] sm:$0x1] %vm626_vm3, %v2388_v36 }
 0x765   :  { %v2393_v38 = vpop.permute.xlu1 %2392 }
 0x766   :  { %2395 = vst.msk [vmem:[#allocation2 + $0x19] sm:$0x1] %vm634_vm5, %v2393_v38 }
 0x767   :  { %v2473_v37 = vld.sshfl [vmem:[#allocation1] sm:$0xff pattern:$0x73625140]  ;;  %v2474_v30 = vld.sshfl [vmem:[#allocation1 + $0x8] sm:$0xff pattern:$0x73625140] }
 0x768   :  { %2681 = vmatmul.f32.vlgmr.msrb.gmra.mxu0 %v2473_v37  ;;  %2701 = vmatmul.f32.vlgmr.msrb.gmra.mxu1 %v2474_v30  ;;  %v2475_v3 = vld.sshfl [vmem:[#allocation1 + $0x10] sm:$0xff pattern:$0x73625140]  ;;  %v2476_v59 = vld.sshfl [vmem:[#allocation1 + $0x18] sm:$0xff pattern:$0x73625140] }
 0x769   :  { %2721 = vmatmul.f32.vlgmr.msrb.gmra.mxu2 %v2475_v3  ;;  %2741 = vmatmul.f32.vlgmr.msrb.gmra.mxu3 %v2476_v59 }
 0x76d   :  { %v2399_v33 = vld [vmem:[#allocation2 + $0x18] sm:$0x3] }
 0x76e   :  { %2472 = vst [vmem:[#allocation1 + $0x20] ss:$4 sm:$0xff] %v2399_v33 }
 0x775   :  { %v2477_v10 = vld.sshfl [vmem:[#allocation1 + $0x20] sm:$0xff pattern:$0x73625140] }
 0x776   :  { %2907 = vmatmul.msk.f32.vlgmr.msra.gmra.mxu0 %vm2490_vm7, %v2477_v10 }
 0x794   :  { %v2522_v41 = vpop.f32.mrf.mxu0 }
 0x795   :  { %v2523_v31 = vadd.f32 %v3079_v21, %v2522_v41  ;;  %v2542_v1 = vpop.f32.mrf.mxu1 }
 0x797   :  { %v2543_v35 = vadd.f32 %v2542_v1, %v2523_v31 }
 0x79b   :  { %v2562_v26 = vpop.f32.mrf.mxu2 }
 0x79c   :  { %v2563_v0 = vadd.f32 %v2562_v26, %v2543_v35  ;;  %v2582_v60 = vpop.f32.mrf.mxu3 }
 0x79e   :  { %v2583_v7 = vadd.f32 %v2582_v60, %v2563_v0 }
 0x7bf   :  { %v2602_v4 = vpop.f32.mrf.mxu0 }
 0x7c0   :  { %v2603_v28 = vadd.f32 %v2602_v4, %v2583_v7  ;;  %v2622_v47 = vpop.f32.mrf.mxu1 }
 0x7c2   :  { %v2623_v11 = vadd.f32 %v2622_v47, %v2603_v28 }
 0x7c6   :  { %v2642_v44 = vpop.f32.mrf.mxu2 }
 0x7c7   :  { %v2643_v13 = vadd.f32 %v2642_v44, %v2623_v11  ;;  %v2662_v52 = vpop.f32.mrf.mxu3 }
 0x7c9   :  { %v2663_v27 = vadd.f32 %v2662_v52, %v2643_v13 }
 0x7e5   :  { %v2682_v25 = vpop.f32.mrf.mxu0  ;;  %v2702_v42 = vpop.f32.mrf.mxu1 }
 0x7e6   :  { %v2683_v29 = vadd.f32 %v2682_v25, %v2663_v27 }
 0x7e8   :  { %v2703_v18 = vadd.f32 %v2702_v42, %v2683_v29 }
 0x7ec   :  { %v2722_v2 = vpop.f32.mrf.mxu2  ;;  %v2742_v58 = vpop.f32.mrf.mxu3 }
 0x7ed   :  { %v2723_v15 = vadd.f32 %v2722_v2, %v2703_v18 }
 0x7ef   :  { %v2743_v34 = vadd.f32 %v2742_v58, %v2723_v15 }
 0x7f3   :  { %v2762_v32 = vpop.f32.mrf.mxu0 }
 0x7f4   :  { %v2763_v8 = vadd.f32 %v2762_v32, %v2743_v34 }
 0x7f6   :  { %3099 = vtanh.f32 %v2763_v8 }
 0x7fc   :  { %v3100_v12 = vpop.eup %3099 }
 0x7fd   :  { %2908 = vmatmul.msk.f32.vlgmr.msra.gmra.mxu1 %vm2774_vm4, %v3100_v12 }
 0x87a   :  { %v2795_v48 = vpop.f32.mrf.mxu1 }
 0x87b   :  { %v2796_v39 = vadd.f32 %v3080_v16, %v2795_v48 }
 0x87d   :  { %2799 = vst.msk [vmem:[%s5065_s10] sm:$0x3] %vm2798_vm8, %v2796_v39 }

</bundles_post_ra>
